<compile_context>
chip_gen: v7x
topology: tpu7x:2x2x1
jax: 0.10.0
libtpu: 0.0.40
codegen_flags: <defaults>
</compile_context>

<pallas_src>
import functools

import jax
import jax.numpy as jnp
from jax.experimental import pallas as pl
from jax.experimental.pallas import tpu as pltpu

# Module hyper-parameters (defaults of RelationNetwork.__init__)
NUM_SUP = 10
NUM_QUE = 10
FEAT_SUP = 64
FEAT_QUE = 64
LOG_SUP = 41
LOG_QUE = 0
LABEL_SUP = 3
D_IN = FEAT_SUP + FEAT_QUE + LOG_SUP + LOG_QUE + LABEL_SUP  # 172
D_PAD = 256                       # zero-pad feature dim to 2 full lane groups
H1, H2, H3 = 512, 256, 64
EPS = 1e-5                        # nn.LayerNorm default eps
TILE_ROWS = 256                   # row tile: matches 256-wide MXU M dimension


def _layernorm_relu(x, gamma, beta):
    # Single-pass LayerNorm (+ ReLU): var = E[x^2] - mean^2, gamma folded into
    # the scale so the normalize is one multiply-add. rsqrt goes to the EUP.
    mean = jnp.mean(x, axis=-1, keepdims=True)
    msq = jnp.mean(x * x, axis=-1, keepdims=True)
    var = jnp.maximum(msq - mean * mean, 0.0)
    s = gamma * jax.lax.rsqrt(var + EPS)
    return jnp.maximum(x * s + (beta - mean * s), 0.0)


def relation_mlp_kernel(x_ref,
                        w1_ref, b1_ref, g1_ref, be1_ref,
                        w2_ref, b2_ref, g2_ref, be2_ref,
                        w3_ref, b3_ref,
                        w4_ref, b4_ref,
                        o_ref):
    x = x_ref[...]                                   # (T, D_PAD) bf16
    # layer1: Linear(256->512, zero-padded cols inert) + LayerNorm(512) + ReLU
    h = jnp.dot(x, w1_ref[...], preferred_element_type=jnp.float32) + b1_ref[...]
    h = _layernorm_relu(h, g1_ref[...], be1_ref[...])
    # layer2: Linear(512->256) + LayerNorm(256) + ReLU
    h = jnp.dot(h.astype(jnp.bfloat16), w2_ref[...],
                preferred_element_type=jnp.float32) + b2_ref[...]
    h = _layernorm_relu(h, g2_ref[...], be2_ref[...])
    # fc1: Linear(256->64) + ReLU
    h = jnp.dot(h.astype(jnp.bfloat16), w3_ref[...],
                preferred_element_type=jnp.float32) + b3_ref[...]
    h = jnp.maximum(h, 0.0)                          # (T, 64) f32
    # fc2: contract (1,64) against (T,64) on the shared 64-dim -> (1, T).
    # Logits come out lane-dense so the final store is a full-lane vst.
    logits = jax.lax.dot_general(
        w4_ref[...], h.astype(jnp.bfloat16),
        dimension_numbers=(((1,), (1,)), ((), ())),
        preferred_element_type=jnp.float32) + b4_ref[...]      # (1, T)
    o_ref[...] = jax.nn.sigmoid(logits).reshape(1, 1, TILE_ROWS)


def init_params(key):
    ks = jax.random.split(key, 8)

    def lin(kw, kb, fan_in, fan_out):
        bound = 1.0 / jnp.sqrt(fan_in)
        w = jax.random.uniform(kw, (fan_in, fan_out), jnp.float32, -bound, bound)
        b = jax.random.uniform(kb, (1, fan_out), jnp.float32, -bound, bound)
        return w, b

    w1, b1 = lin(ks[0], ks[1], D_IN, H1)
    w2, b2 = lin(ks[2], ks[3], H1, H2)
    w3, b3 = lin(ks[4], ks[5], H2, H3)
    w4, b4 = lin(ks[6], ks[7], H3, 1)
    g1 = jnp.ones((1, H1), jnp.float32)
    be1 = jnp.zeros((1, H1), jnp.float32)
    g2 = jnp.ones((1, H2), jnp.float32)
    be2 = jnp.zeros((1, H2), jnp.float32)
    # TODO(synk): self.classifier = nn.Linear(10, 1) is never used in forward; omitted.
    return dict(w1=w1, b1=b1, g1=g1, be1=be1,
                w2=w2, b2=b2, g2=g2, be2=be2,
                w3=w3, b3=b3, w4=w4, b4=b4)


def pack_relation_pairs(x_feat_sup, x_feat_que, x_log_sup, x_log_que, label_sup):
    # Exact JAX replica of RelationNetwork.pack_relation_pairs (in_log_que_sz == 0).
    B = x_feat_sup.shape[0]
    extras_sup = jnp.concatenate([x_log_sup, label_sup], axis=2)[:, :, None, :]  # (B,10,1,44)
    feat_sup = jnp.concatenate([x_feat_sup, extras_sup], axis=3)                 # (B,10,1,108)
    feat_sup_ext = jnp.broadcast_to(
        feat_sup[:, None], (B, NUM_QUE, NUM_SUP, 1, feat_sup.shape[-1]))
    feat_que_ext = jnp.broadcast_to(
        x_feat_que[:, :, None], (B, NUM_QUE, NUM_SUP, 1, x_feat_que.shape[-1]))
    return jnp.concatenate([feat_sup_ext, feat_que_ext], axis=4)                 # (B,10,10,1,172)


@functools.partial(jax.jit, static_argnames=())
def relation_network_forward(x_sup, x_que, x_log_sup, y_log_que, label_sup, params):
    pairs = pack_relation_pairs(x_sup, x_que, x_log_sup, y_log_que, label_sup)
    B = pairs.shape[0]
    rows = pairs.reshape(-1, D_IN).astype(jnp.float32)                 # (B*100, 172)
    n = rows.shape[0]
    n_pad = pl.cdiv(n, TILE_ROWS) * TILE_ROWS
    num_tiles = n_pad // TILE_ROWS
    # Zero-pad rows (tail rows + feature tail 172->256) and cast to bf16 for the MXU.
    rows_p = jnp.pad(rows, ((0, n_pad - n), (0, D_PAD - D_IN))).astype(jnp.bfloat16)

    # bf16 matmul operands; w1 zero-padded on K to match the padded feature dim,
    # w4 pre-transposed to a (1, 64) row for the lane-dense fc2 contraction.
    w1 = jnp.pad(params["w1"], ((0, D_PAD - D_IN), (0, 0))).astype(jnp.bfloat16)
    w2 = params["w2"].astype(jnp.bfloat16)
    w3 = params["w3"].astype(jnp.bfloat16)
    w4 = params["w4"].T.astype(jnp.bfloat16)                           # (1, H3)

    full = lambda i: (0, 0)
    out = pl.pallas_call(
        relation_mlp_kernel,
        out_shape=jax.ShapeDtypeStruct((num_tiles, 1, TILE_ROWS), jnp.float32),
        grid_spec=pltpu.PrefetchScalarGridSpec(
            num_scalar_prefetch=0,
            grid=(num_tiles,),
            in_specs=[
                pl.BlockSpec((TILE_ROWS, D_PAD), lambda i: (i, 0)),
                pl.BlockSpec((D_PAD, H1), full), pl.BlockSpec((1, H1), full),
                pl.BlockSpec((1, H1), full),     pl.BlockSpec((1, H1), full),
                pl.BlockSpec((H1, H2), full),    pl.BlockSpec((1, H2), full),
                pl.BlockSpec((1, H2), full),     pl.BlockSpec((1, H2), full),
                pl.BlockSpec((H2, H3), full),    pl.BlockSpec((1, H3), full),
                pl.BlockSpec((1, H3), full),     pl.BlockSpec((1, 1), full),
            ],
            out_specs=pl.BlockSpec((1, 1, TILE_ROWS), lambda i: (i, 0, 0)),
        ),
        compiler_params=pltpu.CompilerParams(
            dimension_semantics=("parallel",)),
    )(rows_p,
      w1, params["b1"], params["g1"], params["be1"],
      w2, params["b2"], params["g2"], params["be2"],
      w3, params["b3"], w4, params["b4"])

    out = out.reshape(n_pad)[:n]                     # drop row padding
    return out.reshape(B, NUM_QUE, NUM_SUP, 1)       # == out.view(-1, 10, 10, 1)


if __name__ == "__main__":
    key = jax.random.PRNGKey(0)
    k_in, k_par = jax.random.split(key)
    kis = jax.random.split(k_in, 5)

    B = 2
    x_sup = jax.random.normal(kis[0], (B, NUM_SUP, 1, FEAT_SUP), jnp.float32)
    x_que = jax.random.normal(kis[1], (B, NUM_QUE, 1, FEAT_QUE), jnp.float32)
    x_log_sup = jax.random.normal(kis[2], (B, NUM_SUP, LOG_SUP), jnp.float32)
    y_log_que = jnp.zeros((B, NUM_QUE, 0), jnp.float32)  # in_log_que_sz == 0 -> unused
    label_sup = jax.random.normal(kis[3], (B, NUM_SUP, LABEL_SUP), jnp.float32)

    params = init_params(k_par)

    out = relation_network_forward(x_sup, x_que, x_log_sup, y_log_que, label_sup, params)
    out = jax.block_until_ready(out)
    assert out.shape == (B, 10, 10, 1), out.shape
    assert bool(jnp.all(jnp.isfinite(out)))
    assert bool(jnp.all((out >= 0.0) & (out <= 1.0)))
    print("KERNEL_OK")
</pallas_src>

<mosaic_0001>
module attributes {stable_mosaic.version = 11 : i64} {
  func.func @relation_mlp_kernel(%arg0: i32, %arg1: memref<256x256xbf16, #tpu.memory_space<vmem>>, %arg2: memref<256x512xbf16, #tpu.memory_space<vmem>>, %arg3: memref<1x512xf32, #tpu.memory_space<vmem>>, %arg4: memref<1x512xf32, #tpu.memory_space<vmem>>, %arg5: memref<1x512xf32, #tpu.memory_space<vmem>>, %arg6: memref<512x256xbf16, #tpu.memory_space<vmem>>, %arg7: memref<1x256xf32, #tpu.memory_space<vmem>>, %arg8: memref<1x256xf32, #tpu.memory_space<vmem>>, %arg9: memref<1x256xf32, #tpu.memory_space<vmem>>, %arg10: memref<256x64xbf16, #tpu.memory_space<vmem>>, %arg11: memref<1x64xf32, #tpu.memory_space<vmem>>, %arg12: memref<1x64xbf16, #tpu.memory_space<vmem>>, %arg13: memref<1x1xf32, #tpu.memory_space<vmem>>, %arg14: memref<1x1x256xf32, #tpu.memory_space<vmem>>) attributes {dimension_semantics = [#tpu.dimension_semantics<parallel>], iteration_bounds = array<i64: 1>, scalar_prefetch = 0 : i64, scratch_operands = 0 : i64, tpu.core_type = #tpu.core_type<tc>, window_params = [{transform_indices = @transform_0, window_bounds = array<i64: 256, 256>}, {pipeline_mode = #tpu.pipeline_mode<synchronous>, transform_indices = @transform_1, window_bounds = array<i64: 256, 512>}, {pipeline_mode = #tpu.pipeline_mode<synchronous>, transform_indices = @transform_2, window_bounds = array<i64: 1, 512>}, {pipeline_mode = #tpu.pipeline_mode<synchronous>, transform_indices = @transform_3, window_bounds = array<i64: 1, 512>}, {pipeline_mode = #tpu.pipeline_mode<synchronous>, transform_indices = @transform_4, window_bounds = array<i64: 1, 512>}, {pipeline_mode = #tpu.pipeline_mode<synchronous>, transform_indices = @transform_5, window_bounds = array<i64: 512, 256>}, {pipeline_mode = #tpu.pipeline_mode<synchronous>, transform_indices = @transform_6, window_bounds = array<i64: 1, 256>}, {pipeline_mode = #tpu.pipeline_mode<synchronous>, transform_indices = @transform_7, window_bounds = array<i64: 1, 256>}, {pipeline_mode = #tpu.pipeline_mode<synchronous>, transform_indices = @transform_8, window_bounds = array<i64: 1, 256>}, {pipeline_mode = #tpu.pipeline_mode<synchronous>, transform_indices = @transform_9, window_bounds = array<i64: 256, 64>}, {pipeline_mode = #tpu.pipeline_mode<synchronous>, transform_indices = @transform_10, window_bounds = array<i64: 1, 64>}, {pipeline_mode = #tpu.pipeline_mode<synchronous>, transform_indices = @transform_11, window_bounds = array<i64: 1, 64>}, {pipeline_mode = #tpu.pipeline_mode<synchronous>, transform_indices = @transform_12, window_bounds = array<i64: 1, 1>}, {transform_indices = @transform_13, window_bounds = array<i64: 1, 1, 256>}]} {
    %c0 = arith.constant 0 : index
    %c0_0 = arith.constant 0 : index
    %0 = vector.load %arg1[%c0, %c0_0] : memref<256x256xbf16, #tpu.memory_space<vmem>>, vector<256x256xbf16>
    %c0_1 = arith.constant 0 : index
    %c0_2 = arith.constant 0 : index
    %1 = vector.load %arg2[%c0_1, %c0_2] : memref<256x512xbf16, #tpu.memory_space<vmem>>, vector<256x512xbf16>
    %cst = arith.constant dense<0.000000e+00> : vector<256x512xf32>
    %2 = tpu.matmul %0, %1, %cst {dimension_numbers = #tpu.dot_dimension_numbers<[1], [0], [0], [1], [0, 0, 1, 1], [], []>} : vector<256x256xbf16>, vector<256x512xbf16>, vector<256x512xf32> -> vector<256x512xf32>
    %c0_3 = arith.constant 0 : index
    %c0_4 = arith.constant 0 : index
    %3 = vector.load %arg3[%c0_3, %c0_4] : memref<1x512xf32, #tpu.memory_space<vmem>>, vector<1x512xf32>
    %4 = vector.broadcast %3 : vector<1x512xf32> to vector<256x512xf32>
    %5 = arith.addf %2, %4 : vector<256x512xf32>
    %c0_5 = arith.constant 0 : index
    %c0_6 = arith.constant 0 : index
    %6 = vector.load %arg4[%c0_5, %c0_6] : memref<1x512xf32, #tpu.memory_space<vmem>>, vector<1x512xf32>
    %c0_7 = arith.constant 0 : index
    %c0_8 = arith.constant 0 : index
    %7 = vector.load %arg5[%c0_7, %c0_8] : memref<1x512xf32, #tpu.memory_space<vmem>>, vector<1x512xf32>
    %cst_9 = arith.constant dense<0.000000e+00> : vector<256xf32>
    %8 = vector.multi_reduction <add>, %5, %cst_9 [1] : vector<256x512xf32> to vector<256xf32>
    %9 = vector.shape_cast %8 : vector<256xf32> to vector<256x1xf32>
    %cst_10 = arith.constant 5.120000e+02 : f32
    %10 = vector.broadcast %cst_10 : f32 to vector<256x1xf32>
    %11 = arith.divf %9, %10 : vector<256x1xf32>
    %12 = arith.mulf %5, %5 : vector<256x512xf32>
    %cst_11 = arith.constant dense<0.000000e+00> : vector<256xf32>
    %13 = vector.multi_reduction <add>, %12, %cst_11 [1] : vector<256x512xf32> to vector<256xf32>
    %14 = vector.shape_cast %13 : vector<256xf32> to vector<256x1xf32>
    %cst_12 = arith.constant 5.120000e+02 : f32
    %15 = vector.broadcast %cst_12 : f32 to vector<256x1xf32>
    %16 = arith.divf %14, %15 : vector<256x1xf32>
    %17 = arith.mulf %11, %11 : vector<256x1xf32>
    %18 = arith.subf %16, %17 : vector<256x1xf32>
    %cst_13 = arith.constant 0.000000e+00 : f32
    %19 = vector.broadcast %cst_13 : f32 to vector<256x1xf32>
    %20 = arith.maximumf %18, %19 : vector<256x1xf32>
    %cst_14 = arith.constant 9.99999974E-6 : f32
    %21 = vector.broadcast %cst_14 : f32 to vector<256x1xf32>
    %22 = arith.addf %20, %21 : vector<256x1xf32>
    %23 = math.rsqrt %22 : vector<256x1xf32>
    %24 = vector.broadcast %6 : vector<1x512xf32> to vector<256x512xf32>
    %25 = vector.broadcast %23 : vector<256x1xf32> to vector<256x512xf32>
    %26 = arith.mulf %24, %25 : vector<256x512xf32>
    %27 = arith.mulf %5, %26 : vector<256x512xf32>
    %28 = vector.broadcast %11 : vector<256x1xf32> to vector<256x512xf32>
    %29 = arith.mulf %28, %26 : vector<256x512xf32>
    %30 = vector.broadcast %7 : vector<1x512xf32> to vector<256x512xf32>
    %31 = arith.subf %30, %29 : vector<256x512xf32>
    %32 = arith.addf %27, %31 : vector<256x512xf32>
    %cst_15 = arith.constant 0.000000e+00 : f32
    %33 = vector.broadcast %cst_15 : f32 to vector<256x512xf32>
    %34 = arith.maximumf %32, %33 : vector<256x512xf32>
    %35 = arith.truncf %34 : vector<256x512xf32> to vector<256x512xbf16>
    %c0_16 = arith.constant 0 : index
    %c0_17 = arith.constant 0 : index
    %36 = vector.load %arg6[%c0_16, %c0_17] : memref<512x256xbf16, #tpu.memory_space<vmem>>, vector<512x256xbf16>
    %cst_18 = arith.constant dense<0.000000e+00> : vector<256x256xf32>
    %37 = tpu.matmul %35, %36, %cst_18 {dimension_numbers = #tpu.dot_dimension_numbers<[1], [0], [0], [1], [0, 0, 1, 1], [], []>} : vector<256x512xbf16>, vector<512x256xbf16>, vector<256x256xf32> -> vector<256x256xf32>
    %c0_19 = arith.constant 0 : index
    %c0_20 = arith.constant 0 : index
    %38 = vector.load %arg7[%c0_19, %c0_20] : memref<1x256xf32, #tpu.memory_space<vmem>>, vector<1x256xf32>
    %39 = vector.broadcast %38 : vector<1x256xf32> to vector<256x256xf32>
    %40 = arith.addf %37, %39 : vector<256x256xf32>
    %c0_21 = arith.constant 0 : index
    %c0_22 = arith.constant 0 : index
    %41 = vector.load %arg8[%c0_21, %c0_22] : memref<1x256xf32, #tpu.memory_space<vmem>>, vector<1x256xf32>
    %c0_23 = arith.constant 0 : index
    %c0_24 = arith.constant 0 : index
    %42 = vector.load %arg9[%c0_23, %c0_24] : memref<1x256xf32, #tpu.memory_space<vmem>>, vector<1x256xf32>
    %cst_25 = arith.constant dense<0.000000e+00> : vector<256xf32>
    %43 = vector.multi_reduction <add>, %40, %cst_25 [1] : vector<256x256xf32> to vector<256xf32>
    %44 = vector.shape_cast %43 : vector<256xf32> to vector<256x1xf32>
    %cst_26 = arith.constant 2.560000e+02 : f32
    %45 = vector.broadcast %cst_26 : f32 to vector<256x1xf32>
    %46 = arith.divf %44, %45 : vector<256x1xf32>
    %47 = arith.mulf %40, %40 : vector<256x256xf32>
    %cst_27 = arith.constant dense<0.000000e+00> : vector<256xf32>
    %48 = vector.multi_reduction <add>, %47, %cst_27 [1] : vector<256x256xf32> to vector<256xf32>
    %49 = vector.shape_cast %48 : vector<256xf32> to vector<256x1xf32>
    %cst_28 = arith.constant 2.560000e+02 : f32
    %50 = vector.broadcast %cst_28 : f32 to vector<256x1xf32>
    %51 = arith.divf %49, %50 : vector<256x1xf32>
    %52 = arith.mulf %46, %46 : vector<256x1xf32>
    %53 = arith.subf %51, %52 : vector<256x1xf32>
    %cst_29 = arith.constant 0.000000e+00 : f32
    %54 = vector.broadcast %cst_29 : f32 to vector<256x1xf32>
    %55 = arith.maximumf %53, %54 : vector<256x1xf32>
    %cst_30 = arith.constant 9.99999974E-6 : f32
    %56 = vector.broadcast %cst_30 : f32 to vector<256x1xf32>
    %57 = arith.addf %55, %56 : vector<256x1xf32>
    %58 = math.rsqrt %57 : vector<256x1xf32>
    %59 = vector.broadcast %41 : vector<1x256xf32> to vector<256x256xf32>
    %60 = vector.broadcast %58 : vector<256x1xf32> to vector<256x256xf32>
    %61 = arith.mulf %59, %60 : vector<256x256xf32>
    %62 = arith.mulf %40, %61 : vector<256x256xf32>
    %63 = vector.broadcast %46 : vector<256x1xf32> to vector<256x256xf32>
    %64 = arith.mulf %63, %61 : vector<256x256xf32>
    %65 = vector.broadcast %42 : vector<1x256xf32> to vector<256x256xf32>
    %66 = arith.subf %65, %64 : vector<256x256xf32>
    %67 = arith.addf %62, %66 : vector<256x256xf32>
    %cst_31 = arith.constant 0.000000e+00 : f32
    %68 = vector.broadcast %cst_31 : f32 to vector<256x256xf32>
    %69 = arith.maximumf %67, %68 : vector<256x256xf32>
    %70 = arith.truncf %69 : vector<256x256xf32> to vector<256x256xbf16>
    %c0_32 = arith.constant 0 : index
    %c0_33 = arith.constant 0 : index
    %71 = vector.load %arg10[%c0_32, %c0_33] : memref<256x64xbf16, #tpu.memory_space<vmem>>, vector<256x64xbf16>
    %cst_34 = arith.constant dense<0.000000e+00> : vector<256x64xf32>
    %72 = tpu.matmul %70, %71, %cst_34 {dimension_numbers = #tpu.dot_dimension_numbers<[1], [0], [0], [1], [0, 0, 1, 1], [], []>} : vector<256x256xbf16>, vector<256x64xbf16>, vector<256x64xf32> -> vector<256x64xf32>
    %c0_35 = arith.constant 0 : index
    %c0_36 = arith.constant 0 : index
    %73 = vector.load %arg11[%c0_35, %c0_36] : memref<1x64xf32, #tpu.memory_space<vmem>>, vector<1x64xf32>
    %74 = vector.broadcast %73 : vector<1x64xf32> to vector<256x64xf32>
    %75 = arith.addf %72, %74 : vector<256x64xf32>
    %cst_37 = arith.constant 0.000000e+00 : f32
    %76 = vector.broadcast %cst_37 : f32 to vector<256x64xf32>
    %77 = arith.maximumf %75, %76 : vector<256x64xf32>
    %c0_38 = arith.constant 0 : index
    %c0_39 = arith.constant 0 : index
    %78 = vector.load %arg12[%c0_38, %c0_39] : memref<1x64xbf16, #tpu.memory_space<vmem>>, vector<1x64xbf16>
    %79 = arith.truncf %77 : vector<256x64xf32> to vector<256x64xbf16>
    %cst_40 = arith.constant dense<0.000000e+00> : vector<1x256xf32>
    %80 = tpu.matmul %78, %79, %cst_40 {dimension_numbers = #tpu.dot_dimension_numbers<[1], [1], [0], [0], [0, 0, 1, 0], [], []>} : vector<1x64xbf16>, vector<256x64xbf16>, vector<1x256xf32> -> vector<1x256xf32>
    %c0_41 = arith.constant 0 : index
    %c0_42 = arith.constant 0 : index
    %81 = vector.load %arg13[%c0_41, %c0_42] : memref<1x1xf32, #tpu.memory_space<vmem>>, vector<1x1xf32>
    %82 = vector.broadcast %81 : vector<1x1xf32> to vector<1x256xf32>
    %83 = arith.addf %80, %82 : vector<1x256xf32>
    %84 = arith.negf %83 : vector<1x256xf32>
    %85 = math.exp %84 : vector<1x256xf32>
    %cst_43 = arith.constant 1.000000e+00 : f32
    %86 = vector.broadcast %cst_43 : f32 to vector<1x256xf32>
    %87 = arith.addf %86, %85 : vector<1x256xf32>
    %88 = arith.divf %86, %87 : vector<1x256xf32>
    %89 = vector.shape_cast %88 : vector<1x256xf32> to vector<1x1x256xf32>
    %c0_44 = arith.constant 0 : index
    %c0_45 = arith.constant 0 : index
    %c0_46 = arith.constant 0 : index
    %90 = vector.load %arg14[%c0_44, %c0_45, %c0_46] : memref<1x1x256xf32, #tpu.memory_space<vmem>>, vector<1x1x256xf32>
    tpu.vector_store %arg14[%c0_44, %c0_45, %c0_46], %89 {strides = array<i32>} : memref<1x1x256xf32, #tpu.memory_space<vmem>>, vector<1x1x256xf32>,
    return
  }
  func.func @transform_0(%arg0: i32) -> (i32, i32) {
    %c0_i32 = arith.constant 0 : i32
    %c0_i32_0 = arith.constant 0 : i32
    return %arg0, %c0_i32 : i32, i32
  }
  func.func @transform_1(%arg0: i32) -> (i32, i32) {
    %c0_i32 = arith.constant 0 : i32
    %c0_i32_0 = arith.constant 0 : i32
    %c0_i32_1 = arith.constant 0 : i32
    return %c0_i32, %c0_i32_0 : i32, i32
  }
  func.func @transform_2(%arg0: i32) -> (i32, i32) {
    %c0_i32 = arith.constant 0 : i32
    %c0_i32_0 = arith.constant 0 : i32
    %c0_i32_1 = arith.constant 0 : i32
    return %c0_i32, %c0_i32_0 : i32, i32
  }
  func.func @transform_3(%arg0: i32) -> (i32, i32) {
    %c0_i32 = arith.constant 0 : i32
    %c0_i32_0 = arith.constant 0 : i32
    %c0_i32_1 = arith.constant 0 : i32
    return %c0_i32, %c0_i32_0 : i32, i32
  }
  func.func @transform_4(%arg0: i32) -> (i32, i32) {
    %c0_i32 = arith.constant 0 : i32
    %c0_i32_0 = arith.constant 0 : i32
    %c0_i32_1 = arith.constant 0 : i32
    return %c0_i32, %c0_i32_0 : i32, i32
  }
  func.func @transform_5(%arg0: i32) -> (i32, i32) {
    %c0_i32 = arith.constant 0 : i32
    %c0_i32_0 = arith.constant 0 : i32
    %c0_i32_1 = arith.constant 0 : i32
    return %c0_i32, %c0_i32_0 : i32, i32
  }
  func.func @transform_6(%arg0: i32) -> (i32, i32) {
    %c0_i32 = arith.constant 0 : i32
    %c0_i32_0 = arith.constant 0 : i32
    %c0_i32_1 = arith.constant 0 : i32
    return %c0_i32, %c0_i32_0 : i32, i32
  }
  func.func @transform_7(%arg0: i32) -> (i32, i32) {
    %c0_i32 = arith.constant 0 : i32
    %c0_i32_0 = arith.constant 0 : i32
    %c0_i32_1 = arith.constant 0 : i32
    return %c0_i32, %c0_i32_0 : i32, i32
  }
  func.func @transform_8(%arg0: i32) -> (i32, i32) {
    %c0_i32 = arith.constant 0 : i32
    %c0_i32_0 = arith.constant 0 : i32
    %c0_i32_1 = arith.constant 0 : i32
    return %c0_i32, %c0_i32_0 : i32, i32
  }
  func.func @transform_9(%arg0: i32) -> (i32, i32) {
    %c0_i32 = arith.constant 0 : i32
    %c0_i32_0 = arith.constant 0 : i32
    %c0_i32_1 = arith.constant 0 : i32
    return %c0_i32, %c0_i32_0 : i32, i32
  }
  func.func @transform_10(%arg0: i32) -> (i32, i32) {
    %c0_i32 = arith.constant 0 : i32
    %c0_i32_0 = arith.constant 0 : i32
    %c0_i32_1 = arith.constant 0 : i32
    return %c0_i32, %c0_i32_0 : i32, i32
  }
  func.func @transform_11(%arg0: i32) -> (i32, i32) {
    %c0_i32 = arith.constant 0 : i32
    %c0_i32_0 = arith.constant 0 : i32
    %c0_i32_1 = arith.constant 0 : i32
    return %c0_i32, %c0_i32_0 : i32, i32
  }
  func.func @transform_12(%arg0: i32) -> (i32, i32) {
    %c0_i32 = arith.constant 0 : i32
    %c0_i32_0 = arith.constant 0 : i32
    %c0_i32_1 = arith.constant 0 : i32
    return %c0_i32, %c0_i32_0 : i32, i32
  }
  func.func @transform_13(%arg0: i32) -> (i32, i32, i32) {
    %c0_i32 = arith.constant 0 : i32
    %c0_i32_0 = arith.constant 0 : i32
    %c0_i32_1 = arith.constant 0 : i32
    return %arg0, %c0_i32, %c0_i32_0 : i32, i32, i32
  }
}

</mosaic_0001>

<bundles_post_ra>
// kernel: relation_network_forward.1
= control target key start
LH: loop header
LB: loop body
LE: loop exit
PB: predicated region body
PF: predicated region fallthrough
CT: control target
= control target key end

     0   :  { %vm4638_vm0 = vcmask 523264   ;;  %s9099_s1 = inlined_call_operand.vmem [shape: bf16[256,512], index: 1, kind: input, shape index: {}]   ;;  %s9100_s0 = inlined_call_operand.vmem [shape: bf16[256,256], index: 0, kind: input, shape index: {}]   ;;  %s9101_s2 = inlined_call_operand.vmem [shape: f32[1,512], index: 2, kind: input, shape index: {}]   ;;  %s9102_s5 = inlined_call_operand.vmem [shape: bf16[512,256], index: 5, kind: input, shape index: {}]   ;;  %s9103_s3 = inlined_call_operand.vmem [shape: f32[1,512], index: 3, kind: input, shape index: {}]   ;;  %s9104_s4 = inlined_call_operand.vmem [shape: f32[1,512], index: 4, kind: input, shape index: {}]   ;;  %s9105_s6 = inlined_call_operand.vmem [shape: f32[1,256], index: 6, kind: input, shape index: {}]   ;;  %s9106_s9 = inlined_call_operand.vmem [shape: bf16[256,64], index: 9, kind: input, shape index: {}]   ;;  %s9107_s7 = inlined_call_operand.vmem [shape: f32[1,256], index: 7, kind: input, shape index: {}]   ;;  %s9108_s8 = inlined_call_operand.vmem [shape: f32[1,256], index: 8, kind: input, shape index: {}]   ;;  %s9109_s10 = inlined_call_operand.vmem [shape: f32[1,64], index: 10, kind: input, shape index: {}]   ;;  %s9110_s11 = inlined_call_operand.vmem [shape: bf16[1,64], index: 11, kind: input, shape index: {}]   ;;  %s9111_s12 = inlined_call_operand.<no memory space> [shape: f32[1,1], index: 12, kind: input, shape index: {}]   ;;  %s9112_s13 = inlined_call_operand.vmem [shape: f32[1,1,256], index: 13, kind: output, shape index: {}]  }
   0x1   :  { %v5251_v0 = vld [vmem:[%s9099_s1 + $0x4] ss:$16 sps:$4 sm:$0xff]   ;;  %v5253_v1 = vld [vmem:[%s9099_s1] ss:$16 sps:$4 sm:$0xff]   ;;  %v5304_v34 = vld [vmem:[%s9099_s1 + $0xc] ss:$16 sps:$4 sm:$0xff]  }
   0x2   :  { %5080 = vmatprep.subr.bf16.mxu1 %v5251_v0  ;;  %v5254_v2 = vld [vmem:[%s9099_s1 + $0x24] ss:$16 sps:$4 sm:$0xff]   ;;  %645 = vmatprep.subr.bf16.mxu0 %v5251_v0  ;;  %v5256_v3 = vld [vmem:[%s9099_s1 + $0x20] ss:$16 sps:$4 sm:$0xff]   ;;  %v5302_v37 = vld [vmem:[%s9099_s1 + $0x8] ss:$16 sps:$4 sm:$0xff]  }
   0x3   :  { %5096 = vmatpush1.bf16.msra.mxu1 %v5253_v1  ;;  %646 = vmatpush1.bf16.msra.mxu0 %v5253_v1  ;;  %v5257_v4 = vld [vmem:[%s9099_s1 + $0x44] ss:$16 sps:$4 sm:$0xff]   ;;  %v5259_v5 = vld [vmem:[%s9099_s1 + $0x40] ss:$16 sps:$4 sm:$0xff]   ;;  %v5307_v39 = vld [vmem:[%s9099_s1 + $0x2c] ss:$16 sps:$4 sm:$0xff]  }
   0x4   :  { %5081 = vmatprep.subr.bf16.mxu1 %v5254_v2  ;;  %647 = vmatprep.subr.bf16.mxu0 %v5254_v2  ;;  %v5260_v6 = vld [vmem:[%s9099_s1 + $0x64] ss:$16 sps:$4 sm:$0xff]   ;;  %v5262_v7 = vld [vmem:[%s9099_s1 + $0x60] ss:$16 sps:$4 sm:$0xff]   ;;  %v5305_v41 = vld [vmem:[%s9099_s1 + $0x28] ss:$16 sps:$4 sm:$0xff]  }
   0x5   :  { %v5263_v8 = vld [vmem:[%s9099_s1 + $0x84] ss:$16 sps:$4 sm:$0xff]   ;;  %v5265_v9 = vld [vmem:[%s9099_s1 + $0x80] ss:$16 sps:$4 sm:$0xff]   ;;  %v5313_v42 = vld [vmem:[%s9099_s1 + $0x4c] ss:$16 sps:$4 sm:$0xff]  }
   0x6   :  { %v5266_v10 = vld [vmem:[%s9099_s1 + $0xa4] ss:$16 sps:$4 sm:$0xff]   ;;  %v5268_v11 = vld [vmem:[%s9099_s1 + $0xa0] ss:$16 sps:$4 sm:$0xff]   ;;  %v5311_v45 = vld [vmem:[%s9099_s1 + $0x48] ss:$16 sps:$4 sm:$0xff]  }
   0x7   :  { %5097 = vmatpush1.bf16.msra.mxu1 %v5256_v3  ;;  %648 = vmatpush1.bf16.msra.mxu0 %v5256_v3  ;;  %v5269_v12 = vld [vmem:[%s9099_s1 + $0xc4] ss:$16 sps:$4 sm:$0xff]   ;;  %v5271_v14 = vld [vmem:[%s9099_s1 + $0xc0] ss:$16 sps:$4 sm:$0xff]   ;;  %v5316_v47 = vld [vmem:[%s9099_s1 + $0x6c] ss:$16 sps:$4 sm:$0xff]  }
   0x8   :  { %5082 = vmatprep.subr.bf16.mxu1 %v5257_v4  ;;  %649 = vmatprep.subr.bf16.mxu0 %v5257_v4  ;;  %v5759_v13 = vld [vmem:[%s9100_s0 + $0x84] ss:$8 sps:$4 sm:$0xff]   ;;  %v5274_v16 = vld [vmem:[%s9099_s1 + $0xe0] ss:$16 sps:$4 sm:$0xff]   ;;  %v5844_v38 = vld [vmem:[%s9100_s0 + $0x94] ss:$8 sps:$4 sm:$0xff]  }
   0x9   :  { %v5272_v15 = vld [vmem:[%s9099_s1 + $0xe4] ss:$16 sps:$4 sm:$0xff]   ;;  %757 = vmatprep.mubr.bf16.mxu1 %v5759_v13  ;;  %v5277_v18 = vld [vmem:[%s9099_s1 + $0x100] ss:$16 sps:$4 sm:$0xff]   ;;  %v5314_v49 = vld [vmem:[%s9099_s1 + $0x68] ss:$16 sps:$4 sm:$0xff]  }
   0xa   :  { %v5275_v17 = vld [vmem:[%s9099_s1 + $0x104] ss:$16 sps:$4 sm:$0xff]   ;;  %v5280_v20 = vld [vmem:[%s9099_s1 + $0x120] ss:$16 sps:$4 sm:$0xff]   ;;  %v5322_v50 = vld [vmem:[%s9099_s1 + $0x8c] ss:$16 sps:$4 sm:$0xff]  }
   0xb   :  { %5098 = vmatpush1.bf16.msra.mxu1 %v5259_v5  ;;  %650 = vmatpush1.bf16.msra.mxu0 %v5259_v5  ;;  %v5278_v19 = vld [vmem:[%s9099_s1 + $0x124] ss:$16 sps:$4 sm:$0xff]   ;;  %v5283_v22 = vld [vmem:[%s9099_s1 + $0x140] ss:$16 sps:$4 sm:$0xff]   ;;  %v5320_v53 = vld [vmem:[%s9099_s1 + $0x88] ss:$16 sps:$4 sm:$0xff]  }
   0xc   :  { %5083 = vmatprep.subr.bf16.mxu1 %v5260_v6  ;;  %651 = vmatprep.subr.bf16.mxu0 %v5260_v6  ;;  %v5281_v21 = vld [vmem:[%s9099_s1 + $0x144] ss:$16 sps:$4 sm:$0xff]   ;;  %v5286_v24 = vld [vmem:[%s9099_s1 + $0x160] ss:$16 sps:$4 sm:$0xff]   ;;  %v5325_v55 = vld [vmem:[%s9099_s1 + $0xac] ss:$16 sps:$4 sm:$0xff]  }
   0xd   :  { %v5284_v23 = vld [vmem:[%s9099_s1 + $0x164] ss:$16 sps:$4 sm:$0xff]   ;;  %v5289_v26 = vld [vmem:[%s9099_s1 + $0x180] ss:$16 sps:$4 sm:$0xff]   ;;  %v5323_v57 = vld [vmem:[%s9099_s1 + $0xa8] ss:$16 sps:$4 sm:$0xff]  }
   0xe   :  { %v5287_v25 = vld [vmem:[%s9099_s1 + $0x184] ss:$16 sps:$4 sm:$0xff]   ;;  %v5292_v28 = vld [vmem:[%s9099_s1 + $0x1a0] ss:$16 sps:$4 sm:$0xff]   ;;  %v5331_v58 = vld [vmem:[%s9099_s1 + $0xcc] ss:$16 sps:$4 sm:$0xff]  }
   0xf   :  { %5099 = vmatpush1.bf16.msra.mxu1 %v5262_v7  ;;  %652 = vmatpush1.bf16.msra.mxu0 %v5262_v7  ;;  %v5290_v27 = vld [vmem:[%s9099_s1 + $0x1a4] ss:$16 sps:$4 sm:$0xff]   ;;  %v5295_v31 = vld [vmem:[%s9099_s1 + $0x1c0] ss:$16 sps:$4 sm:$0xff]   ;;  %v5329_v61 = vld [vmem:[%s9099_s1 + $0xc8] ss:$16 sps:$4 sm:$0xff]  }
  0x10   :  { %5084 = vmatprep.subr.bf16.mxu1 %v5263_v8  ;;  %653 = vmatprep.subr.bf16.mxu0 %v5263_v8  ;;  %v5293_v29 = vld [vmem:[%s9099_s1 + $0x1c4] ss:$16 sps:$4 sm:$0xff]   ;;  %v5298_v33 = vld [vmem:[%s9099_s1 + $0x1e0] ss:$16 sps:$4 sm:$0xff]   ;;  %v5334_v63 = vld [vmem:[%s9099_s1 + $0xec] ss:$16 sps:$4 sm:$0xff]  }
  0x11   :  { %v5813_v30 = vld [vmem:[%s9100_s0 + $0x4] ss:$8 sps:$4 sm:$0xff]   ;;  %v5831_v35 = vld [vmem:[%s9100_s0 + $0x80] ss:$8 sps:$4 sm:$0xff]   ;;  %v5852_v40 = vld [vmem:[%s9100_s0 + $0x14] ss:$8 sps:$4 sm:$0xff]  }
  0x12   :  { %v5296_v32 = vld [vmem:[%s9099_s1 + $0x1e4] ss:$16 sps:$4 sm:$0xff]   ;;  %677 = vmatprep.mubr.bf16.mxu0 %v5813_v30  ;;  %v5836_v36 = vld [vmem:[%s9100_s0] ss:$8 sps:$4 sm:$0xff]   ;;  %v5867_v43 = vld [vmem:[%s9100_s0 + $0x90] ss:$8 sps:$4 sm:$0xff]  }
  0x13   :  { %5100 = vmatpush1.bf16.msra.mxu1 %v5265_v9  ;;  %654 = vmatpush1.bf16.msra.mxu0 %v5265_v9  ;;  %v5872_v44 = vld [vmem:[%s9100_s0 + $0x10] ss:$8 sps:$4 sm:$0xff]   ;;  %v5880_v46 = vld [vmem:[%s9100_s0 + $0xa4] ss:$8 sps:$4 sm:$0xff]   ;;  %v5903_v51 = vld [vmem:[%s9100_s0 + $0xa0] ss:$8 sps:$4 sm:$0xff]  }
  0x14   :  { %5085 = vmatprep.subr.bf16.mxu1 %v5266_v10  ;;  %655 = vmatprep.subr.bf16.mxu0 %v5266_v10  ;;  %v5888_v48 = vld [vmem:[%s9100_s0 + $0x24] ss:$8 sps:$4 sm:$0xff]   ;;  %v5908_v52 = vld [vmem:[%s9100_s0 + $0x20] ss:$8 sps:$4 sm:$0xff]   ;;  %v5916_v54 = vld [vmem:[%s9100_s0 + $0xb4] ss:$8 sps:$4 sm:$0xff]  }
  0x15   :  { %v5924_v56 = vld [vmem:[%s9100_s0 + $0x34] ss:$8 sps:$4 sm:$0xff]   ;;  %v5939_v59 = vld [vmem:[%s9100_s0 + $0xb0] ss:$8 sps:$4 sm:$0xff]   ;;  %v5952_v62 = vld [vmem:[%s9100_s0 + $0xc4] ss:$8 sps:$4 sm:$0xff]  }
  0x16   :  { %v5944_v60 = vld [vmem:[%s9100_s0 + $0x30] ss:$8 sps:$4 sm:$0xff]   ;;  %v5960_v0 = vld [vmem:[%s9100_s0 + $0x44] ss:$8 sps:$4 sm:$0xff]   ;;  %v5975_v3 = vld [vmem:[%s9100_s0 + $0xc0] ss:$8 sps:$4 sm:$0xff]  }
  0x17   :  { %5101 = vmatpush1.bf16.msra.mxu1 %v5268_v11  ;;  %656 = vmatpush1.bf16.msra.mxu0 %v5268_v11  ;;  %v5332_v1 = vld [vmem:[%s9099_s1 + $0xe8] ss:$16 sps:$4 sm:$0xff]   ;;  %v5340_v2 = vld [vmem:[%s9099_s1 + $0x10c] ss:$16 sps:$4 sm:$0xff]  }
  0x18   :  { %5086 = vmatprep.subr.bf16.mxu1 %v5269_v12  ;;  %657 = vmatprep.subr.bf16.mxu0 %v5269_v12  ;;  %v5980_v4 = vld [vmem:[%s9100_s0 + $0x40] ss:$8 sps:$4 sm:$0xff]   ;;  %v5988_v6 = vld [vmem:[%s9100_s0 + $0xd4] ss:$8 sps:$4 sm:$0xff]   ;;  %v6008_v11 = vld [vmem:[%s9100_s0 + $0xd0] ss:$8 sps:$4 sm:$0xff]  }
  0x19   :  { %v5338_v5 = vld [vmem:[%s9099_s1 + $0x108] ss:$16 sps:$4 sm:$0xff]   ;;  %v5343_v7 = vld [vmem:[%s9099_s1 + $0x12c] ss:$16 sps:$4 sm:$0xff]  }
  0x1a   :  { %v5386_v8 = vld [vmem:[%s9100_s0 + $0x54] ss:$8 sps:$4 sm:$0xff]   ;;  %v5341_v9 = vld [vmem:[%s9099_s1 + $0x128] ss:$16 sps:$4 sm:$0xff]  }
  0x1b   :  { %5102 = vmatpush1.bf16.msra.mxu1 %v5271_v14  ;;  %658 = vmatpush1.bf16.msra.mxu0 %v5271_v14  ;;  %v5349_v10 = vld [vmem:[%s9099_s1 + $0x14c] ss:$16 sps:$4 sm:$0xff]   ;;  %v5388_v12 = vld [vmem:[%s9100_s0 + $0x50] ss:$8 sps:$4 sm:$0xff]  }
  0x1c   :  { %5087 = vmatprep.subr.bf16.mxu1 %v5272_v15  ;;  %659 = vmatprep.subr.bf16.mxu0 %v5272_v15  ;;  %v5347_v14 = vld [vmem:[%s9099_s1 + $0x148] ss:$16 sps:$4 sm:$0xff]   ;;  %v6019_v15 = vld [vmem:[%s9100_s0 + $0xe4] ss:$8 sps:$4 sm:$0xff]  }
  0x1f   :  { %5103 = vmatpush1.bf16.msra.mxu1 %v5274_v16  ;;  %660 = vmatpush1.bf16.msra.mxu0 %v5274_v16  ;;  %v5352_v16 = vld [vmem:[%s9099_s1 + $0x16c] ss:$16 sps:$4 sm:$0xff]  }
  0x20   :  { %5088 = vmatprep.subr.bf16.mxu1 %v5275_v17  ;;  %661 = vmatprep.subr.bf16.mxu0 %v5275_v17  ;;  %v5389_v17 = vld [vmem:[%s9100_s0 + $0x64] ss:$8 sps:$4 sm:$0xff]  }
  0x23   :  { %5104 = vmatpush1.bf16.msra.mxu1 %v5277_v18  ;;  %662 = vmatpush1.bf16.msra.mxu0 %v5277_v18  ;;  %v5350_v18 = vld [vmem:[%s9099_s1 + $0x168] ss:$16 sps:$4 sm:$0xff]  }
  0x24   :  { %5089 = vmatprep.subr.bf16.mxu1 %v5278_v19  ;;  %663 = vmatprep.subr.bf16.mxu0 %v5278_v19  ;;  %v5358_v19 = vld [vmem:[%s9099_s1 + $0x18c] ss:$16 sps:$4 sm:$0xff]  }
  0x27   :  { %5105 = vmatpush1.bf16.msra.mxu1 %v5280_v20  ;;  %664 = vmatpush1.bf16.msra.mxu0 %v5280_v20  ;;  %v5355_v20 = vld [vmem:[%s9100_s0 + $0xe0] ss:$8 sps:$4 sm:$0xff]  }
  0x28   :  { %5090 = vmatprep.subr.bf16.mxu1 %v5281_v21  ;;  %665 = vmatprep.subr.bf16.mxu0 %v5281_v21  ;;  %v5391_v21 = vld [vmem:[%s9100_s0 + $0x60] ss:$8 sps:$4 sm:$0xff]  }
  0x2b   :  { %5106 = vmatpush1.bf16.msra.mxu1 %v5283_v22  ;;  %666 = vmatpush1.bf16.msra.mxu0 %v5283_v22  ;;  %v5356_v22 = vld [vmem:[%s9099_s1 + $0x188] ss:$16 sps:$4 sm:$0xff]  }
  0x2c   :  { %5091 = vmatprep.subr.bf16.mxu1 %v5284_v23  ;;  %667 = vmatprep.subr.bf16.mxu0 %v5284_v23  ;;  %v5362_v23 = vld [vmem:[%s9100_s0 + $0xf4] ss:$8 sps:$4 sm:$0xff]  }
  0x2f   :  { %5107 = vmatpush1.bf16.msra.mxu1 %v5286_v24  ;;  %668 = vmatpush1.bf16.msra.mxu0 %v5286_v24  ;;  %v5361_v24 = vld [vmem:[%s9099_s1 + $0x1ac] ss:$16 sps:$4 sm:$0xff]  }
  0x30   :  { %5092 = vmatprep.subr.bf16.mxu1 %v5287_v25  ;;  %669 = vmatprep.subr.bf16.mxu0 %v5287_v25  ;;  %v5392_v25 = vld [vmem:[%s9100_s0 + $0x74] ss:$8 sps:$4 sm:$0xff]  }
  0x33   :  { %5108 = vmatpush1.bf16.msra.mxu1 %v5289_v26  ;;  %670 = vmatpush1.bf16.msra.mxu0 %v5289_v26  ;;  %v5359_v26 = vld [vmem:[%s9099_s1 + $0x1a8] ss:$16 sps:$4 sm:$0xff]  }
  0x34   :  { %5093 = vmatprep.subr.bf16.mxu1 %v5290_v27  ;;  %671 = vmatprep.subr.bf16.mxu0 %v5290_v27  ;;  %v5367_v27 = vld [vmem:[%s9099_s1 + $0x1cc] ss:$16 sps:$4 sm:$0xff]  }
  0x37   :  { %5109 = vmatpush1.bf16.msra.mxu1 %v5292_v28  ;;  %672 = vmatpush1.bf16.msra.mxu0 %v5292_v28  ;;  %v5364_v28 = vld [vmem:[%s9100_s0 + $0xf0] ss:$8 sps:$4 sm:$0xff]  }
  0x38   :  { %5094 = vmatprep.subr.bf16.mxu1 %v5293_v29  ;;  %673 = vmatprep.subr.bf16.mxu0 %v5293_v29  ;;  %v5394_v29 = vld [vmem:[%s9100_s0 + $0x70] ss:$8 sps:$4 sm:$0xff]  }
  0x3b   :  { %5110 = vmatpush1.bf16.msra.mxu1 %v5295_v31  ;;  %674 = vmatpush1.bf16.msra.mxu0 %v5295_v31  ;;  %v5365_v31 = vld [vmem:[%s9099_s1 + $0x1c8] ss:$16 sps:$4 sm:$0xff]  }
  0x3c   :  { %5095 = vmatprep.subr.bf16.mxu1 %v5296_v32  ;;  %675 = vmatprep.subr.bf16.mxu0 %v5296_v32  ;;  %v5373_v32 = vld [vmem:[%s9099_s1 + $0x1ec] ss:$16 sps:$4 sm:$0xff]  }
  0x3f   :  { %5111 = vmatpush1.bf16.msra.mxu1 %v5298_v33  ;;  %676 = vmatpush1.bf16.msra.mxu0 %v5298_v33  ;;  %v5371_v33 = vld [vmem:[%s9099_s1 + $0x1e8] ss:$16 sps:$4 sm:$0xff]  }
  0x40   :  { %838 = vmatprep.subr.bf16.mxu1 %v5304_v34 }
  0x42   :  { %758 = vmatmul.mubr.bf16.vlgmr.msra.gmra.mrb[0].mxu1 %v5831_v35  ;;  %678 = vmatmul.mubr.bf16.vlgmr.msra.gmra.mrb[0].mxu0 %v5836_v36 }
  0x43   :  { %839 = vmatpush1.bf16.msra.mxu1 %v5302_v37  ;;  %767 = vmatprep.mubr.bf16.mxu1 %v5844_v38 }
  0x44   :  { %840 = vmatprep.subr.bf16.mxu1 %v5307_v39  ;;  %687 = vmatprep.mubr.bf16.mxu0 %v5852_v40 }
  0x47   :  { %841 = vmatpush1.bf16.msra.mxu1 %v5305_v41 }
  0x48   :  { %842 = vmatprep.subr.bf16.mxu1 %v5313_v42 }
  0x4a   :  { %768 = vmatmul.mubr.bf16.gmra.mrb[4].mxu1 %v5867_v43  ;;  %688 = vmatmul.mubr.bf16.gmra.mrb[4].mxu0 %v5872_v44 }
  0x4b   :  { %843 = vmatpush1.bf16.msra.mxu1 %v5311_v45  ;;  %777 = vmatprep.mubr.bf16.mxu1 %v5880_v46 }
  0x4c   :  { %844 = vmatprep.subr.bf16.mxu1 %v5316_v47  ;;  %697 = vmatprep.mubr.bf16.mxu0 %v5888_v48 }
  0x4f   :  { %845 = vmatpush1.bf16.msra.mxu1 %v5314_v49 }
  0x50   :  { %846 = vmatprep.subr.bf16.mxu1 %v5322_v50 }
  0x52   :  { %778 = vmatmul.mubr.bf16.gmra.mrb[8].mxu1 %v5903_v51  ;;  %698 = vmatmul.mubr.bf16.gmra.mrb[8].mxu0 %v5908_v52 }
  0x53   :  { %847 = vmatpush1.bf16.msra.mxu1 %v5320_v53  ;;  %787 = vmatprep.mubr.bf16.mxu1 %v5916_v54 }
  0x54   :  { %848 = vmatprep.subr.bf16.mxu1 %v5325_v55  ;;  %707 = vmatprep.mubr.bf16.mxu0 %v5924_v56 }
  0x57   :  { %849 = vmatpush1.bf16.msra.mxu1 %v5323_v57 }
  0x58   :  { %850 = vmatprep.subr.bf16.mxu1 %v5331_v58 }
  0x5a   :  { %788 = vmatmul.mubr.bf16.gmra.mrb[12].mxu1 %v5939_v59  ;;  %708 = vmatmul.mubr.bf16.gmra.mrb[12].mxu0 %v5944_v60 }
  0x5b   :  { %851 = vmatpush1.bf16.msra.mxu1 %v5329_v61  ;;  %797 = vmatprep.mubr.bf16.mxu1 %v5952_v62 }
  0x5c   :  { %852 = vmatprep.subr.bf16.mxu1 %v5334_v63  ;;  %717 = vmatprep.mubr.bf16.mxu0 %v5960_v0 }
  0x5f   :  { %853 = vmatpush1.bf16.msra.mxu1 %v5332_v1 }
  0x60   :  { %854 = vmatprep.subr.bf16.mxu1 %v5340_v2 }
  0x62   :  { %798 = vmatmul.mubr.bf16.gmra.mrb[16].mxu1 %v5975_v3  ;;  %718 = vmatmul.mubr.bf16.gmra.mrb[16].mxu0 %v5980_v4 }
  0x63   :  { %855 = vmatpush1.bf16.msra.mxu1 %v5338_v5  ;;  %807 = vmatprep.mubr.bf16.mxu1 %v5988_v6 }
  0x64   :  { %856 = vmatprep.subr.bf16.mxu1 %v5343_v7  ;;  %727 = vmatprep.mubr.bf16.mxu0 %v5386_v8 }
  0x67   :  { %857 = vmatpush1.bf16.msra.mxu1 %v5341_v9 }
  0x68   :  { %858 = vmatprep.subr.bf16.mxu1 %v5349_v10 }
  0x6a   :  { %808 = vmatmul.mubr.bf16.gmra.mrb[20].mxu1 %v6008_v11  ;;  %728 = vmatmul.mubr.bf16.gmra.mrb[20].mxu0 %v5388_v12 }
  0x6b   :  { %859 = vmatpush1.bf16.msra.mxu1 %v5347_v14  ;;  %817 = vmatprep.mubr.bf16.mxu1 %v6019_v15 }
  0x6c   :  { %860 = vmatprep.subr.bf16.mxu1 %v5352_v16  ;;  %737 = vmatprep.mubr.bf16.mxu0 %v5389_v17 }
  0x6f   :  { %861 = vmatpush1.bf16.msra.mxu1 %v5350_v18 }
  0x70   :  { %862 = vmatprep.subr.bf16.mxu1 %v5358_v19 }
  0x72   :  { %818 = vmatmul.mubr.bf16.gmra.mrb[24].mxu1 %v5355_v20  ;;  %738 = vmatmul.mubr.bf16.gmra.mrb[24].mxu0 %v5391_v21 }
  0x73   :  { %863 = vmatpush1.bf16.msra.mxu1 %v5356_v22  ;;  %827 = vmatprep.mubr.bf16.mxu1 %v5362_v23 }
  0x74   :  { %864 = vmatprep.subr.bf16.mxu1 %v5361_v24  ;;  %747 = vmatprep.mubr.bf16.mxu0 %v5392_v25 }
  0x77   :  { %865 = vmatpush1.bf16.msra.mxu1 %v5359_v26 }
  0x78   :  { %866 = vmatprep.subr.bf16.mxu1 %v5367_v27 }
  0x7a   :  { %828 = vmatmul.mubr.bf16.gmra.mrb[28].mxu1 %v5364_v28  ;;  %748 = vmatmul.mubr.bf16.gmra.mrb[28].mxu0 %v5394_v29 }
  0x7b   :  { %867 = vmatpush1.bf16.msra.mxu1 %v5365_v31  ;;  %870 = vmatprep.mubr.bf16.mxu1 %v5813_v30 }
  0x7c   :  { %868 = vmatprep.subr.bf16.mxu1 %v5373_v32 }
  0x7f   :  { %869 = vmatpush1.bf16.msra.mxu1 %v5371_v33 }
  0x82   :  { %871 = vmatmul.mubr.bf16.vlgmr.msra.gmra.mrb[32].mxu1 %v5836_v36 }
  0x83   :  { %880 = vmatprep.mubr.bf16.mxu1 %v5852_v40 }
  0x8a   :  { %881 = vmatmul.mubr.bf16.gmra.mrb[36].mxu1 %v5872_v44 }
  0x8b   :  { %890 = vmatprep.mubr.bf16.mxu1 %v5888_v48 }
  0x92   :  { %891 = vmatmul.mubr.bf16.gmra.mrb[40].mxu1 %v5908_v52 }
  0x93   :  { %900 = vmatprep.mubr.bf16.mxu1 %v5924_v56 }
  0x9a   :  { %901 = vmatmul.mubr.bf16.gmra.mrb[44].mxu1 %v5944_v60 }
  0x9b   :  { %910 = vmatprep.mubr.bf16.mxu1 %v5960_v0 }
  0xa2   :  { %911 = vmatmul.mubr.bf16.gmra.mrb[48].mxu1 %v5980_v4 }
  0xa3   :  { %920 = vmatprep.mubr.bf16.mxu1 %v5386_v8 }
  0xaa   :  { %921 = vmatmul.mubr.bf16.gmra.mrb[52].mxu1 %v5388_v12 }
  0xab   :  { %930 = vmatprep.mubr.bf16.mxu1 %v5389_v17 }
  0xb2   :  { %931 = vmatmul.mubr.bf16.gmra.mrb[56].mxu1 %v5391_v21 }
  0xb3   :  { %940 = vmatprep.mubr.bf16.mxu1 %v5392_v25 }
  0xba   :  { %941 = vmatmul.mubr.bf16.gmra.mrb[60].mxu1 %v5394_v29 }
  0xbb   :  { %950 = vmatprep.mubr.bf16.mxu1 %v5759_v13  ;;  %v9113_v13 = vlaneseq }
  0xbd   :  { %v6098_v30 = vshrl.u32 %v9113_v13, 7 }
  0xbf   :  { %9360 = vst [vmem:[#allocation3_spill] sm:$0xff] %v6098_v30  ;;  %v6101_v34 = vsub.s32 0, %v6098_v30  ;;  %v6109_v36 = vsub.s32 1, %v6098_v30 }
  0xc1   :  { %9361 = vst [vmem:[#allocation4_spill] sm:$0xff] %v6101_v34  ;;  %9362 = vst [vmem:[#allocation5_spill] sm:$0xff] %v6109_v36 }
  0xc2   :  { %951 = vmatmul.mubr.bf16.gmra.mrb[64].mxu1 %v5831_v35  ;;  %v6106_v35 = vld [vmem:[%s9101_s2] sm:$0xf] }
  0xc3   :  { %960 = vmatprep.mubr.bf16.mxu1 %v5844_v38  ;;  %v6113_v37 = vrot.slane %v6106_v35, %v6101_v34  ;;  %v6117_v38 = vrot.slane %v6106_v35, %v6109_v36 }
  0xca   :  { %961 = vmatmul.mubr.bf16.gmra.mrb[68].mxu1 %v5867_v43 }
  0xcb   :  { %970 = vmatprep.mubr.bf16.mxu1 %v5880_v46 }
  0xd2   :  { %971 = vmatmul.mubr.bf16.gmra.mrb[72].mxu1 %v5903_v51 }
  0xd3   :  { %980 = vmatprep.mubr.bf16.mxu1 %v5916_v54 }
  0xda   :  { %981 = vmatmul.mubr.bf16.gmra.mrb[76].mxu1 %v5939_v59 }
  0xdb   :  { %990 = vmatprep.mubr.bf16.mxu1 %v5952_v62 }
  0xe2   :  { %991 = vmatmul.mubr.bf16.gmra.mrb[80].mxu1 %v5975_v3 }
  0xe3   :  { %1000 = vmatprep.mubr.bf16.mxu1 %v5988_v6 }
  0xea   :  { %1001 = vmatmul.mubr.bf16.gmra.mrb[84].mxu1 %v6008_v11 }
  0xeb   :  { %1010 = vmatprep.mubr.bf16.mxu1 %v6019_v15 }
  0xf2   :  { %1011 = vmatmul.mubr.bf16.gmra.mrb[88].mxu1 %v5355_v20 }
  0xf3   :  { %1020 = vmatprep.mubr.bf16.mxu1 %v5362_v23 }
  0xfa   :  { %1021 = vmatmul.mubr.bf16.gmra.mrb[92].mxu1 %v5364_v28 }
 0x115   :  { %v759_v39 = vpop.f32.mrb[0].mxu1  ;;  %v6119_v40 = vpop.f32.mrb[0].mxu0 }
 0x116   :  { %v6122_v41 = vadd.f32 %v759_v39, %v6113_v37  ;;  %v761_v42 = vpop.f32.mrb[1].mxu1  ;;  %v6124_v43 = vpop.f32.mrb[1].mxu0 }
 0x117   :  { %v6127_v44 = vadd.f32 %v761_v42, %v6117_v38  ;;  %v763_v45 = vpop.f32.mrb[2].mxu1  ;;  %v6129_v46 = vpop.f32.mrb[2].mxu0 }
 0x118   :  { %9363 = vst [vmem:[#allocation6_spill] sm:$0xff] %v6122_v41  ;;  %v6132_v47 = vadd.f32 %v763_v45, %v6113_v37  ;;  %v765_v48 = vpop.f32.mrb[3].mxu1  ;;  %v6134_v49 = vpop.f32.mrb[3].mxu0 }
 0x119   :  { %v6137_v50 = vadd.f32 %v765_v48, %v6117_v38 }
 0x11a   :  { %9364 = vst [vmem:[#allocation7_spill] sm:$0xff] %v6132_v47 }
 0x11d   :  { %v769_v51 = vpop.f32.mrb[4].mxu1  ;;  %v6139_v52 = vpop.f32.mrb[4].mxu0 }
 0x11e   :  { %v6142_v53 = vadd.f32 %v769_v51, %v6113_v37  ;;  %v771_v54 = vpop.f32.mrb[5].mxu1  ;;  %v6144_v55 = vpop.f32.mrb[5].mxu0 }
 0x11f   :  { %v6147_v56 = vadd.f32 %v771_v54, %v6117_v38  ;;  %v773_v57 = vpop.f32.mrb[6].mxu1  ;;  %v6149_v58 = vpop.f32.mrb[6].mxu0 }
 0x120   :  { %9365 = vst [vmem:[#allocation8_spill] sm:$0xff] %v6142_v53  ;;  %v6152_v59 = vadd.f32 %v773_v57, %v6113_v37  ;;  %v775_v60 = vpop.f32.mrb[7].mxu1  ;;  %v6154_v61 = vpop.f32.mrb[7].mxu0 }
 0x121   :  { %9366 = vst [vmem:[#allocation9_spill] sm:$0xff] %v6147_v56  ;;  %v6157_v62 = vadd.f32 %v775_v60, %v6117_v38 }
 0x122   :  { %9367 = vst [vmem:[#allocation10_spill] sm:$0xff] %v6152_v59 }
 0x123   :  { %9368 = vst [vmem:[#allocation11_spill] sm:$0xff] %v6157_v62 }
 0x125   :  { %v779_v63 = vpop.f32.mrb[8].mxu1  ;;  %v6159_v0 = vpop.f32.mrb[8].mxu0 }
 0x126   :  { %v6162_v1 = vadd.f32 %v779_v63, %v6113_v37  ;;  %v781_v2 = vpop.f32.mrb[9].mxu1  ;;  %v6164_v3 = vpop.f32.mrb[9].mxu0 }
 0x127   :  { %v6167_v4 = vadd.f32 %v781_v2, %v6117_v38  ;;  %v783_v5 = vpop.f32.mrb[10].mxu1  ;;  %v6169_v6 = vpop.f32.mrb[10].mxu0 }
 0x128   :  { %9369 = vst [vmem:[#allocation12_spill] sm:$0xff] %v6162_v1  ;;  %v6172_v7 = vadd.f32 %v783_v5, %v6113_v37  ;;  %v785_v8 = vpop.f32.mrb[11].mxu1  ;;  %v6174_v9 = vpop.f32.mrb[11].mxu0 }
 0x129   :  { %9370 = vst [vmem:[#allocation13_spill] sm:$0xff] %v6167_v4  ;;  %v6177_v10 = vadd.f32 %v785_v8, %v6117_v38 }
 0x12a   :  { %9371 = vst [vmem:[#allocation14_spill] sm:$0xff] %v6172_v7 }
 0x12b   :  { %9372 = vst [vmem:[#allocation15_spill] sm:$0xff] %v6177_v10 }
 0x12d   :  { %v789_v11 = vpop.f32.mrb[12].mxu1  ;;  %v6179_v12 = vpop.f32.mrb[12].mxu0 }
 0x12e   :  { %v6182_v14 = vadd.f32 %v789_v11, %v6113_v37  ;;  %v791_v15 = vpop.f32.mrb[13].mxu1  ;;  %v6184_v16 = vpop.f32.mrb[13].mxu0 }
 0x12f   :  { %v6187_v17 = vadd.f32 %v791_v15, %v6117_v38  ;;  %v793_v18 = vpop.f32.mrb[14].mxu1  ;;  %v6189_v19 = vpop.f32.mrb[14].mxu0 }
 0x130   :  { %9373 = vst [vmem:[#allocation16_spill] sm:$0xff] %v6182_v14  ;;  %v6192_v20 = vadd.f32 %v793_v18, %v6113_v37  ;;  %v795_v21 = vpop.f32.mrb[15].mxu1  ;;  %v6194_v22 = vpop.f32.mrb[15].mxu0  ;;  %v6404_v14 = vadd.f32 %v6159_v0, %v6113_v37 }
 0x131   :  { %9374 = vst [vmem:[#allocation17_spill] sm:$0xff] %v6187_v17  ;;  %v6197_v23 = vadd.f32 %v795_v21, %v6117_v38 }
 0x132   :  { %9375 = vst [vmem:[#allocation18_spill] sm:$0xff] %v6192_v20 }
 0x133   :  { %9376 = vst [vmem:[#allocation19_spill] sm:$0xff] %v6197_v23 }
 0x135   :  { %v799_v24 = vpop.f32.mrb[16].mxu1  ;;  %v6199_v25 = vpop.f32.mrb[16].mxu0 }
 0x136   :  { %v6202_v26 = vadd.f32 %v799_v24, %v6113_v37  ;;  %v801_v27 = vpop.f32.mrb[17].mxu1  ;;  %v6204_v28 = vpop.f32.mrb[17].mxu0 }
 0x137   :  { %v6207_v29 = vadd.f32 %v801_v27, %v6117_v38  ;;  %v803_v31 = vpop.f32.mrb[18].mxu1  ;;  %v6209_v32 = vpop.f32.mrb[18].mxu0 }
 0x138   :  { %9377 = vst [vmem:[#allocation20_spill] sm:$0xff] %v6202_v26  ;;  %v6212_v33 = vadd.f32 %v803_v31, %v6113_v37  ;;  %v805_v39 = vpop.f32.mrb[19].mxu1  ;;  %v6214_v42 = vpop.f32.mrb[19].mxu0  ;;  %v6337_v26 = vadd.f32 %v6144_v55, %v6117_v38 }
 0x139   :  { %9378 = vst [vmem:[#allocation21_spill] sm:$0xff] %v6207_v29  ;;  %v6217_v45 = vadd.f32 %v805_v39, %v6117_v38  ;;  %v6333_v29 = vadd.f32 %v6139_v52, %v6113_v37 }
 0x13a   :  { %9379 = vst [vmem:[#allocation22_spill] sm:$0xff] %v6212_v33  ;;  %9400 = vst [vmem:[#allocation43_spill] sm:$0xff] %v6337_v26 }
 0x13b   :  { %9380 = vst [vmem:[#allocation23_spill] sm:$0xff] %v6217_v45  ;;  %v6300_v45 = vadd.f32 %v6134_v49, %v6117_v38  ;;  %v5398_v49 = vld [vmem:[%s9102_s5 + $0x10] ss:$8 sps:$4 sm:$0xff]   ;;  %9399 = vst [vmem:[#allocation42_spill] sm:$0xff] %v6333_v29  ;;  %v1043_v17 = vadd.f32 %v6337_v26, %v6333_v29 }
 0x13d   :  { %v809_v48 = vpop.f32.mrb[20].mxu1  ;;  %v6219_v51 = vpop.f32.mrb[20].mxu0  ;;  %9397 = vst [vmem:[#allocation40_spill] sm:$0xff] %v6300_v45 }
 0x13e   :  { %v6222_v54 = vadd.f32 %v809_v48, %v6113_v37  ;;  %v811_v57 = vpop.f32.mrb[21].mxu1  ;;  %v6224_v60 = vpop.f32.mrb[21].mxu0 }
 0x13f   :  { %v6227_v63 = vadd.f32 %v811_v57, %v6117_v38  ;;  %v813_v2 = vpop.f32.mrb[22].mxu1  ;;  %v6229_v5 = vpop.f32.mrb[22].mxu0 }
 0x140   :  { %9381 = vst [vmem:[#allocation24_spill] sm:$0xff] %v6222_v54  ;;  %v6232_v8 = vadd.f32 %v813_v2, %v6113_v37  ;;  %v815_v11 = vpop.f32.mrb[23].mxu1  ;;  %v6234_v15 = vpop.f32.mrb[23].mxu0  ;;  %v6296_v54 = vadd.f32 %v6129_v46, %v6113_v37 }
 0x141   :  { %9382 = vst [vmem:[#allocation25_spill] sm:$0xff] %v6227_v63  ;;  %v6237_v18 = vadd.f32 %v815_v11, %v6117_v38 }
 0x142   :  { %9383 = vst [vmem:[#allocation26_spill] sm:$0xff] %v6232_v8  ;;  %9396 = vst [vmem:[#allocation39_spill] sm:$0xff] %v6296_v54  ;;  %v1038_v52 = vadd.f32 %v6300_v45, %v6296_v54 }
 0x143   :  { %9384 = vst [vmem:[#allocation27_spill] sm:$0xff] %v6237_v18  ;;  %v6263_v18 = vsub.s32 3, %v6098_v30 }
 0x145   :  { %v819_v21 = vpop.f32.mrb[24].mxu1  ;;  %v6239_v24 = vpop.f32.mrb[24].mxu0  ;;  %9390 = vst [vmem:[#allocation33_spill] sm:$0xff] %v6263_v18 }
 0x146   :  { %v6242_v27 = vadd.f32 %v819_v21, %v6113_v37  ;;  %v821_v31 = vpop.f32.mrb[25].mxu1  ;;  %v6244_v39 = vpop.f32.mrb[25].mxu0 }
 0x147   :  { %v6247_v48 = vadd.f32 %v821_v31, %v6117_v38  ;;  %v823_v57 = vpop.f32.mrb[26].mxu1  ;;  %v6249_v2 = vpop.f32.mrb[26].mxu0 }
 0x148   :  { %9385 = vst [vmem:[#allocation28_spill] sm:$0xff] %v6242_v27  ;;  %v6252_v13 = vadd.f32 %v823_v57, %v6113_v37  ;;  %v825_v11 = vpop.f32.mrb[27].mxu1  ;;  %v6254_v34 = vpop.f32.mrb[27].mxu0  ;;  %v6260_v27 = vsub.s32 2, %v6098_v30  ;;  %v5397_v30 = vld [vmem:[%s9102_s5 + $0x4] ss:$8 sps:$4 sm:$0xff]  }
 0x149   :  { %9386 = vst [vmem:[#allocation29_spill] sm:$0xff] %v6247_v48  ;;  %v6257_v36 = vadd.f32 %v825_v11, %v6117_v38  ;;  %v6276_v11 = vadd.f32 %v6124_v43, %v6117_v38  ;;  %2976 = vmatprep.subr.bf16.mxu0 %v5397_v30  ;;  %v5400_v30 = vld [vmem:[%s9102_s5 + $0x14] ss:$8 sps:$4 sm:$0xff]  }
 0x14a   :  { %9387 = vst [vmem:[#allocation30_spill] sm:$0xff] %v6252_v13  ;;  %9389 = vst [vmem:[#allocation32_spill] sm:$0xff] %v6260_v27  ;;  %v6272_v13 = vadd.f32 %v6119_v40, %v6113_v37  ;;  %v5395_v40 = vld [vmem:[%s9102_s5] ss:$8 sps:$4 sm:$0xff]   ;;  %v6313_v46 = vrot.slane %v6106_v35, %v6260_v27 }
 0x14b   :  { %9388 = vst [vmem:[#allocation31_spill] sm:$0xff] %v6257_v36  ;;  %9393 = vst [vmem:[#allocation36_spill] sm:$0xff] %v6276_v11  ;;  %2977 = vmatpush1.bf16.msra.mxu0 %v5395_v40  ;;  %v6323_v40 = vrot.slane %v6106_v35, %v6263_v18 }
 0x14c   :  { %9392 = vst [vmem:[#allocation35_spill] sm:$0xff] %v6272_v13  ;;  %v1033_v27 = vadd.f32 %v6276_v11, %v6272_v13  ;;  %2978 = vmatprep.subr.bf16.mxu0 %v5400_v30  ;;  %v5403_v30 = vld [vmem:[%s9102_s5 + $0x24] ss:$8 sps:$4 sm:$0xff]  }
 0x14d   :  { %v829_v21 = vpop.f32.mrb[28].mxu1  ;;  %v6265_v31 = vpop.f32.mrb[28].mxu0 }
 0x14e   :  { %v6268_v48 = vadd.f32 %v829_v21, %v6113_v37  ;;  %v831_v57 = vpop.f32.mrb[29].mxu1  ;;  %v6278_v36 = vpop.f32.mrb[29].mxu0 }
 0x14f   :  { %v6284_v8 = vadd.f32 %v831_v57, %v6117_v38  ;;  %v833_v21 = vpop.f32.mrb[30].mxu1  ;;  %2979 = vmatpush1.bf16.msra.mxu0 %v5398_v49 }
 0x150   :  { %9391 = vst [vmem:[#allocation34_spill] sm:$0xff] %v6268_v48  ;;  %v6286_v48 = vpop.f32.mrb[30].mxu0  ;;  %v6292_v63 = vadd.f32 %v833_v21, %v6113_v37  ;;  %v835_v43 = vpop.f32.mrb[31].mxu1  ;;  %v1226_v21 = vmul.f32 %v6272_v13, %v6272_v13  ;;  %v5401_v13 = vld [vmem:[%s9102_s5 + $0x20] ss:$8 sps:$4 sm:$0xff]   ;;  %2980 = vmatprep.subr.bf16.mxu0 %v5403_v30 }
 0x151   :  { %9394 = vst [vmem:[#allocation37_spill] sm:$0xff] %v6284_v8  ;;  %v6302_v57 = vpop.f32.mrb[31].mxu0  ;;  %v6305_v8 = vadd.f32 %v835_v43, %v6117_v38  ;;  %v1230_v43 = vmul.f32 %v6296_v54, %v6296_v54  ;;  %v5404_v30 = vld [vmem:[%s9102_s5 + $0x30] ss:$8 sps:$4 sm:$0xff]  }
 0x152   :  { %9395 = vst [vmem:[#allocation38_spill] sm:$0xff] %v6292_v63  ;;  %v1227_v63 = vmul.f32 %v6276_v11, %v6276_v11 }
 0x153   :  { %9398 = vst [vmem:[#allocation41_spill] sm:$0xff] %v6305_v8  ;;  %v1231_v8 = vmul.f32 %v6300_v45, %v6300_v45  ;;  %v1234_v45 = vmul.f32 %v6333_v29, %v6333_v29  ;;  %2981 = vmatpush1.bf16.msra.mxu0 %v5401_v13 }
 0x154   :  { %v1354_v23 = vadd.f32 %v1227_v63, %v1226_v21  ;;  %v6359_v63 = vadd.f32 %v6154_v61, %v6117_v38 }
 0x155   :  { %v872_v33 = vpop.f32.mrb[32].mxu1 }
 0x156   :  { %v6340_v35 = vadd.f32 %v872_v33, %v6313_v46  ;;  %v874_v18 = vpop.f32.mrb[33].mxu1  ;;  %v6355_v33 = vadd.f32 %v6149_v58, %v6113_v37  ;;  %v1235_v58 = vmul.f32 %v6337_v26, %v6337_v26 }
 0x157   :  { %v6351_v55 = vadd.f32 %v874_v18, %v6323_v40  ;;  %v876_v49 = vpop.f32.mrb[34].mxu1  ;;  %v1359_v18 = vadd.f32 %v1231_v8, %v1230_v43 }
 0x158   :  { %9401 = vst [vmem:[#allocation44_spill] sm:$0xff] %v6340_v35  ;;  %9403 = vst [vmem:[#allocation46_spill] sm:$0xff] %v6355_v33  ;;  %v6362_v21 = vadd.f32 %v876_v49, %v6313_v46  ;;  %v878_v11 = vpop.f32.mrb[35].mxu1  ;;  %v1034_v20 = vadd.f32 %v1033_v27, %v6340_v35  ;;  %v1228_v54 = vmul.f32 %v6340_v35, %v6340_v35 }
 0x159   :  { %9402 = vst [vmem:[#allocation45_spill] sm:$0xff] %v6351_v55  ;;  %v6372_v61 = vadd.f32 %v878_v11, %v6323_v40  ;;  %v1229_v49 = vmul.f32 %v6351_v55, %v6351_v55  ;;  %v5406_v11 = vld [vmem:[%s9102_s5 + $0x34] ss:$8 sps:$4 sm:$0xff]   ;;  %v1238_v13 = vmul.f32 %v6355_v33, %v6355_v33  ;;  %v1048_v29 = vadd.f32 %v6359_v63, %v6355_v33 }
 0x15a   :  { %9404 = vst [vmem:[#allocation47_spill] sm:$0xff] %v6362_v21  ;;  %v1232_v27 = vmul.f32 %v6362_v21, %v6362_v21  ;;  %v1035_v35 = vadd.f32 %v1034_v20, %v6351_v55  ;;  %v1355_v8 = vadd.f32 %v1354_v23, %v1228_v54  ;;  %v1039_v43 = vadd.f32 %v1038_v52, %v6362_v21  ;;  %v5409_v23 = vld [vmem:[%s9102_s5 + $0x44] ss:$8 sps:$4 sm:$0xff]   ;;  %v5407_v55 = vld [vmem:[%s9102_s5 + $0x40] ss:$8 sps:$4 sm:$0xff]  }
 0x15b   :  { %9405 = vst [vmem:[#allocation48_spill] sm:$0xff] %v6372_v61  ;;  %v1239_v20 = vmul.f32 %v6359_v63, %v6359_v63  ;;  %v1233_v52 = vmul.f32 %v6372_v61, %v6372_v61  ;;  %2982 = vmatprep.subr.bf16.mxu0 %v5406_v11  ;;  %v1364_v11 = vadd.f32 %v1235_v58, %v1234_v45 }
 0x15c   :  { %1036 = vadd.xlane.f32.xlu0 %v1035_v35  ;;  %v1356_v54 = vadd.f32 %v1355_v8, %v1229_v49  ;;  %v1360_v21 = vadd.f32 %v1359_v18, %v1232_v27  ;;  %v6408_v35 = vadd.f32 %v6164_v3, %v6117_v38  ;;  %2983 = vmatpush1.bf16.msra.mxu0 %v5404_v30  ;;  %v5412_v18 = vld [vmem:[%s9102_s5 + $0x54] ss:$8 sps:$4 sm:$0xff]  }
 0x15d   :  { %v882_v26 = vpop.f32.mrb[36].mxu1  ;;  %v1040_v8 = vadd.f32 %v1039_v43, %v6372_v61  ;;  %2984 = vmatprep.subr.bf16.mxu0 %v5409_v23  ;;  %v6422_v3 = vadd.f32 %v6169_v6, %v6113_v37  ;;  %v6426_v30 = vadd.f32 %v6174_v9, %v6117_v38  ;;  %v5415_v9 = vld [vmem:[%s9102_s5 + $0x64] ss:$8 sps:$4 sm:$0xff]   ;;  %v6459_v61 = vadd.f32 %v6179_v12, %v6113_v37 }
 0x15e   :  { %v6414_v49 = vadd.f32 %v882_v26, %v6313_v46  ;;  %v884_v27 = vpop.f32.mrb[37].mxu1  ;;  %1357 = vadd.xlane.f32.xlu1 %v1356_v54  ;;  %v1369_v26 = vadd.f32 %v1239_v20, %v1238_v13  ;;  %v5410_v54 = vld [vmem:[%s9102_s5 + $0x50] ss:$8 sps:$4 sm:$0xff]   ;;  %v1361_v23 = vadd.f32 %v1360_v21, %v1233_v52  ;;  %v1242_v13 = vmul.f32 %v6404_v14, %v6404_v14 }
 0x15f   :  { %v6418_v0 = vadd.f32 %v884_v27, %v6323_v40  ;;  %v886_v33 = vpop.f32.mrb[38].mxu1  ;;  %9408 = vst [vmem:[#allocation51_spill] sm:$0xff] %v6422_v3  ;;  %v1243_v20 = vmul.f32 %v6408_v35, %v6408_v35 }
 0x160   :  { %9406 = vst [vmem:[#allocation49_spill] sm:$0xff] %v6414_v49  ;;  %v1236_v45 = vmul.f32 %v6414_v49, %v6414_v49  ;;  %v6434_v58 = vadd.f32 %v886_v33, %v6313_v46  ;;  %v888_v43 = vpop.f32.mrb[39].mxu1  ;;  %1041 = vadd.xlane.f32.xlu0 %v1040_v8  ;;  %v1044_v6 = vadd.f32 %v1043_v17, %v6414_v49 }
 0x161   :  { %9407 = vst [vmem:[#allocation50_spill] sm:$0xff] %v6418_v0  ;;  %v6445_v27 = vadd.f32 %v888_v43, %v6323_v40  ;;  %v1237_v33 = vmul.f32 %v6418_v0, %v6418_v0  ;;  %2985 = vmatpush1.bf16.msra.mxu0 %v5407_v55  ;;  %v1246_v49 = vmul.f32 %v6422_v3, %v6422_v3 }
 0x162   :  { %9409 = vst [vmem:[#allocation52_spill] sm:$0xff] %v6434_v58  ;;  %v1240_v17 = vmul.f32 %v6434_v58, %v6434_v58  ;;  %1362 = vadd.xlane.f32.xlu1 %v1361_v23  ;;  %v1045_v21 = vadd.f32 %v1044_v6, %v6418_v0  ;;  %v1049_v52 = vadd.f32 %v1048_v29, %v6434_v58  ;;  %v5413_v29 = vld [vmem:[%s9102_s5 + $0x60] ss:$8 sps:$4 sm:$0xff]  }
 0x163   :  { %9410 = vst [vmem:[#allocation53_spill] sm:$0xff] %v6445_v27  ;;  %v1365_v8 = vadd.f32 %v1364_v11, %v1236_v45  ;;  %v1247_v43 = vmul.f32 %v6426_v30, %v6426_v30  ;;  %v6463_v55 = vadd.f32 %v6184_v16, %v6117_v38  ;;  %2986 = vmatprep.subr.bf16.mxu0 %v5412_v18 }
 0x164   :  { %v1053_v11 = vadd.f32 %v6408_v35, %v6404_v14  ;;  %1046 = vadd.xlane.f32.xlu0 %v1045_v21  ;;  %v1050_v45 = vadd.f32 %v1049_v52, %v6445_v27  ;;  %v1241_v23 = vmul.f32 %v6445_v27, %v6445_v27  ;;  %v1370_v12 = vadd.f32 %v1369_v26, %v1240_v17 }
 0x165   :  { %v1058_v6 = vadd.f32 %v6426_v30, %v6422_v3  ;;  %v892_v16 = vpop.f32.mrb[40].mxu1  ;;  %v6477_v18 = vadd.f32 %v6189_v19, %v6113_v37  ;;  %v6481_v58 = vadd.f32 %v6194_v22, %v6117_v38  ;;  %2987 = vmatpush1.bf16.msra.mxu0 %v5410_v54  ;;  %v1366_v27 = vadd.f32 %v1365_v8, %v1237_v33 }
 0x166   :  { %v6484_v21 = vadd.f32 %v892_v16, %v6313_v46  ;;  %v894_v52 = vpop.f32.mrb[41].mxu1  ;;  %1051 = vadd.xlane.f32.xlu1 %v1050_v45  ;;  %v1374_v26 = vadd.f32 %v1243_v20, %v1242_v13  ;;  %2988 = vmatprep.subr.bf16.mxu0 %v5415_v9  ;;  %v1250_v19 = vmul.f32 %v6459_v61, %v6459_v61 }
 0x167   :  { %v6487_v17 = vadd.f32 %v894_v52, %v6323_v40  ;;  %v896_v0 = vpop.f32.mrb[42].mxu1  ;;  %v1251_v22 = vmul.f32 %v6463_v55, %v6463_v55  ;;  %v1379_v3 = vadd.f32 %v1247_v43, %v1246_v49  ;;  %v1371_v9 = vadd.f32 %v1370_v12, %v1241_v23  ;;  %v5418_v23 = vld [vmem:[%s9102_s5 + $0x74] ss:$8 sps:$4 sm:$0xff]  }
 0x168   :  { %9411 = vst [vmem:[#allocation54_spill] sm:$0xff] %v6484_v21  ;;  %v1244_v54 = vmul.f32 %v6484_v21, %v6484_v21  ;;  %v6496_v16 = vadd.f32 %v896_v0, %v6313_v46  ;;  %v898_v33 = vpop.f32.mrb[43].mxu1  ;;  %1367 = vadd.xlane.f32.xlu0 %v1366_v27  ;;  %v1054_v13 = vadd.f32 %v1053_v11, %v6484_v21 }
 0x169   :  { %9412 = vst [vmem:[#allocation55_spill] sm:$0xff] %v6487_v17  ;;  %v6500_v20 = vadd.f32 %v898_v33, %v6323_v40  ;;  %v1254_v8 = vmul.f32 %v6477_v18, %v6477_v18  ;;  %v1255_v49 = vmul.f32 %v6481_v58, %v6481_v58  ;;  %v1245_v43 = vmul.f32 %v6487_v17, %v6487_v17 }
 0x16a   :  { %9413 = vst [vmem:[#allocation56_spill] sm:$0xff] %v6496_v16  ;;  %2989 = vmatpush1.bf16.msra.mxu0 %v5413_v29  ;;  %v1248_v0 = vmul.f32 %v6496_v16, %v6496_v16  ;;  %1372 = vadd.xlane.f32.xlu1 %v1371_v9  ;;  %v1055_v27 = vadd.f32 %v1054_v13, %v6487_v17 }
 0x16b   :  { %9414 = vst [vmem:[#allocation57_spill] sm:$0xff] %v6500_v20  ;;  %v1059_v11 = vadd.f32 %v1058_v6, %v6496_v16  ;;  %v1375_v45 = vadd.f32 %v1374_v26, %v1244_v54  ;;  %v6517_v12 = vadd.f32 %v6199_v25, %v6113_v37  ;;  %v6521_v29 = vadd.f32 %v6204_v28, %v6117_v38  ;;  %v5416_v6 = vld [vmem:[%s9102_s5 + $0x70] ss:$8 sps:$4 sm:$0xff]  }
 0x16c   :  { %v1249_v52 = vmul.f32 %v6500_v20, %v6500_v20  ;;  %v1063_v26 = vadd.f32 %v6463_v55, %v6459_v61  ;;  %1056 = vadd.xlane.f32.xlu0 %v1055_v27  ;;  %v1380_v33 = vadd.f32 %v1379_v3, %v1248_v0  ;;  %2990 = vmatprep.subr.bf16.mxu0 %v5418_v23  ;;  %v5421_v23 = vld [vmem:[%s9102_s5 + $0x84] ss:$8 sps:$4 sm:$0xff]  }
 0x16d   :  { %v1060_v54 = vadd.f32 %v1059_v11, %v6500_v20  ;;  %v1068_v25 = vadd.f32 %v6481_v58, %v6477_v18  ;;  %v902_v28 = vpop.f32.mrb[44].mxu1  ;;  %v6535_v9 = vadd.f32 %v6209_v32, %v6113_v37  ;;  %v6539_v13 = vadd.f32 %v6214_v42, %v6117_v38 }
 0x16e   :  { %2991 = vmatpush1.bf16.msra.mxu0 %v5416_v6  ;;  %v6542_v21 = vadd.f32 %v902_v28, %v6313_v46  ;;  %v904_v27 = vpop.f32.mrb[45].mxu1  ;;  %v1376_v3 = vadd.f32 %v1375_v45, %v1245_v43  ;;  %v1384_v0 = vadd.f32 %v1251_v22, %v1250_v19  ;;  %v1389_v11 = vadd.f32 %v1255_v49, %v1254_v8  ;;  %v5419_v19 = vld [vmem:[%s9102_s5 + $0x80] ss:$8 sps:$4 sm:$0xff]  }
 0x16f   :  { %1061 = vadd.xlane.f32.xlu1 %v1060_v54  ;;  %v6548_v32 = vadd.f32 %v904_v27, %v6323_v40  ;;  %v1258_v42 = vmul.f32 %v6517_v12, %v6517_v12  ;;  %v906_v16 = vpop.f32.mrb[46].mxu1  ;;  %v1259_v6 = vmul.f32 %v6521_v29, %v6521_v29  ;;  %v1381_v28 = vadd.f32 %v1380_v33, %v1249_v52 }
 0x170   :  { %9415 = vst [vmem:[#allocation58_spill] sm:$0xff] %v6542_v21  ;;  %v1252_v22 = vmul.f32 %v6542_v21, %v6542_v21  ;;  %v6560_v8 = vadd.f32 %v906_v16, %v6313_v46  ;;  %v908_v49 = vpop.f32.mrb[47].mxu1  ;;  %1377 = vadd.xlane.f32.xlu0 %v1376_v3  ;;  %v1064_v43 = vadd.f32 %v1063_v26, %v6542_v21 }
 0x171   :  { %9416 = vst [vmem:[#allocation59_spill] sm:$0xff] %v6548_v32  ;;  %2992 = vmatprep.subr.bf16.mxu0 %v5421_v23  ;;  %v6564_v45 = vadd.f32 %v908_v49, %v6323_v40  ;;  %v1262_v52 = vmul.f32 %v6535_v9, %v6535_v9  ;;  %v1263_v54 = vmul.f32 %v6539_v13, %v6539_v13  ;;  %v5424_v23 = vld [vmem:[%s9102_s5 + $0x94] ss:$8 sps:$4 sm:$0xff]  }
 0x172   :  { %9417 = vst [vmem:[#allocation60_spill] sm:$0xff] %v6560_v8  ;;  %v1253_v33 = vmul.f32 %v6548_v32, %v6548_v32  ;;  %2993 = vmatpush1.bf16.msra.mxu0 %v5419_v19  ;;  %v1256_v16 = vmul.f32 %v6560_v8, %v6560_v8  ;;  %v1065_v26 = vadd.f32 %v1064_v43, %v6548_v32 }
 0x173   :  { %9418 = vst [vmem:[#allocation61_spill] sm:$0xff] %v6564_v45  ;;  %1382 = vadd.xlane.f32.xlu1 %v1381_v28  ;;  %v1069_v27 = vadd.f32 %v1068_v25, %v6560_v8  ;;  %v1385_v3 = vadd.f32 %v1384_v0, %v1252_v22  ;;  %v6581_v49 = vadd.f32 %v6219_v51, %v6113_v37  ;;  %v5422_v25 = vld [vmem:[%s9102_s5 + $0x90] ss:$8 sps:$4 sm:$0xff]  }
 0x174   :  { %v6585_v19 = vadd.f32 %v6224_v60, %v6117_v38  ;;  %v1257_v28 = vmul.f32 %v6564_v45, %v6564_v45  ;;  %v1073_v0 = vadd.f32 %v6521_v29, %v6517_v12  ;;  %1066 = vadd.xlane.f32.xlu0 %v1065_v26  ;;  %v1390_v43 = vadd.f32 %v1389_v11, %v1256_v16 }
 0x175   :  { %v1070_v22 = vadd.f32 %v1069_v27, %v6564_v45  ;;  %2994 = vmatprep.subr.bf16.mxu0 %v5424_v23  ;;  %v1078_v51 = vadd.f32 %v6539_v13, %v6535_v9  ;;  %v912_v60 = vpop.f32.mrb[48].mxu1  ;;  %v6599_v21 = vadd.f32 %v6229_v5, %v6113_v37  ;;  %v6603_v8 = vadd.f32 %v6234_v15, %v6117_v38  ;;  %v5427_v23 = vld [vmem:[%s9102_s5 + $0xa4] ss:$8 sps:$4 sm:$0xff]  }
 0x176   :  { %2995 = vmatpush1.bf16.msra.mxu0 %v5422_v25  ;;  %v6606_v32 = vadd.f32 %v912_v60, %v6313_v46  ;;  %v914_v26 = vpop.f32.mrb[49].mxu1  ;;  %v1386_v11 = vadd.f32 %v1385_v3, %v1253_v33  ;;  %v1394_v16 = vadd.f32 %v1259_v6, %v1258_v42  ;;  %v1399_v27 = vadd.f32 %v1263_v54, %v1262_v52  ;;  %v5425_v42 = vld [vmem:[%s9102_s5 + $0xa0] ss:$8 sps:$4 sm:$0xff]  }
 0x177   :  { %1071 = vadd.xlane.f32.xlu1 %v1070_v22  ;;  %v6612_v5 = vadd.f32 %v914_v26, %v6323_v40  ;;  %v1266_v15 = vmul.f32 %v6581_v49, %v6581_v49  ;;  %v916_v45 = vpop.f32.mrb[50].mxu1  ;;  %v1267_v25 = vmul.f32 %v6585_v19, %v6585_v19  ;;  %v1391_v60 = vadd.f32 %v1390_v43, %v1257_v28 }
 0x178   :  { %9419 = vst [vmem:[#allocation62_spill] sm:$0xff] %v6606_v32  ;;  %v1260_v6 = vmul.f32 %v6606_v32, %v6606_v32  ;;  %v6624_v52 = vadd.f32 %v916_v45, %v6313_v46  ;;  %v918_v54 = vpop.f32.mrb[51].mxu1  ;;  %1387 = vadd.xlane.f32.xlu0 %v1386_v11  ;;  %v1074_v33 = vadd.f32 %v1073_v0, %v6606_v32 }
 0x179   :  { %9420 = vst [vmem:[#allocation63_spill] sm:$0xff] %v6612_v5  ;;  %2996 = vmatprep.subr.bf16.mxu0 %v5427_v23  ;;  %v6628_v3 = vadd.f32 %v918_v54, %v6323_v40  ;;  %v1270_v28 = vmul.f32 %v6599_v21, %v6599_v21  ;;  %v1271_v22 = vmul.f32 %v6603_v8, %v6603_v8  ;;  %v5430_v23 = vld [vmem:[%s9102_s5 + $0xb4] ss:$8 sps:$4 sm:$0xff]  }
 0x17a   :  { %9421 = vst [vmem:[#allocation64_spill] sm:$0xff] %v6624_v52  ;;  %v1261_v43 = vmul.f32 %v6612_v5, %v6612_v5  ;;  %2997 = vmatpush1.bf16.msra.mxu0 %v5425_v42  ;;  %v1264_v45 = vmul.f32 %v6624_v52, %v6624_v52  ;;  %v1075_v0 = vadd.f32 %v1074_v33, %v6612_v5 }
 0x17b   :  { %9422 = vst [vmem:[#allocation65_spill] sm:$0xff] %v6628_v3  ;;  %1392 = vadd.xlane.f32.xlu1 %v1391_v60  ;;  %v1079_v26 = vadd.f32 %v1078_v51, %v6624_v52  ;;  %v1395_v11 = vadd.f32 %v1394_v16, %v1260_v6  ;;  %v6645_v54 = vadd.f32 %v6239_v24, %v6113_v37  ;;  %v5428_v51 = vld [vmem:[%s9102_s5 + $0xb0] ss:$8 sps:$4 sm:$0xff]  }
 0x17c   :  { %v6649_v42 = vadd.f32 %v6244_v39, %v6117_v38  ;;  %v1265_v60 = vmul.f32 %v6628_v3, %v6628_v3  ;;  %v1083_v16 = vadd.f32 %v6585_v19, %v6581_v49  ;;  %1076 = vadd.xlane.f32.xlu0 %v1075_v0  ;;  %v1400_v33 = vadd.f32 %v1399_v27, %v1264_v45 }
 0x17d   :  { %v1080_v6 = vadd.f32 %v1079_v26, %v6628_v3  ;;  %2998 = vmatprep.subr.bf16.mxu0 %v5430_v23  ;;  %v1088_v24 = vadd.f32 %v6603_v8, %v6599_v21  ;;  %v922_v39 = vpop.f32.mrb[52].mxu1  ;;  %v6663_v32 = vadd.f32 %v6249_v2, %v6113_v37  ;;  %v6667_v52 = vadd.f32 %v6254_v34, %v6117_v38  ;;  %v5433_v23 = vld [vmem:[%s9102_s5 + $0xc4] ss:$8 sps:$4 sm:$0xff]  }
 0x17e   :  { %2999 = vmatpush1.bf16.msra.mxu0 %v5428_v51  ;;  %v6670_v5 = vadd.f32 %v922_v39, %v6313_v46  ;;  %v924_v0 = vpop.f32.mrb[53].mxu1  ;;  %v1396_v27 = vadd.f32 %v1395_v11, %v1261_v43  ;;  %v1404_v45 = vadd.f32 %v1267_v25, %v1266_v15  ;;  %v1409_v26 = vadd.f32 %v1271_v22, %v1270_v28  ;;  %v5431_v15 = vld [vmem:[%s9102_s5 + $0xc0] ss:$8 sps:$4 sm:$0xff]  }
 0x17f   :  { %1081 = vadd.xlane.f32.xlu1 %v1080_v6  ;;  %v6676_v2 = vadd.f32 %v924_v0, %v6323_v40  ;;  %v1274_v34 = vmul.f32 %v6645_v54, %v6645_v54  ;;  %v926_v3 = vpop.f32.mrb[54].mxu1  ;;  %v1275_v51 = vmul.f32 %v6649_v42, %v6649_v42  ;;  %v1401_v39 = vadd.f32 %v1400_v33, %v1265_v60 }
 0x180   :  { %9423 = vst [vmem:[#allocation66_spill] sm:$0xff] %v6670_v5  ;;  %v1268_v25 = vmul.f32 %v6670_v5, %v6670_v5  ;;  %v6688_v28 = vadd.f32 %v926_v3, %v6313_v46  ;;  %v928_v22 = vpop.f32.mrb[55].mxu1  ;;  %1397 = vadd.xlane.f32.xlu0 %v1396_v27  ;;  %v1084_v43 = vadd.f32 %v1083_v16, %v6670_v5 }
 0x181   :  { %9424 = vst [vmem:[#allocation67_spill] sm:$0xff] %v6676_v2  ;;  %3000 = vmatprep.subr.bf16.mxu0 %v5433_v23  ;;  %v6692_v11 = vadd.f32 %v928_v22, %v6323_v40  ;;  %v1278_v60 = vmul.f32 %v6663_v32, %v6663_v32  ;;  %v1279_v6 = vmul.f32 %v6667_v52, %v6667_v52  ;;  %v5436_v23 = vld [vmem:[%s9102_s5 + $0xd4] ss:$8 sps:$4 sm:$0xff]  }
 0x182   :  { %9425 = vst [vmem:[#allocation68_spill] sm:$0xff] %v6688_v28  ;;  %v1269_v33 = vmul.f32 %v6676_v2, %v6676_v2  ;;  %3001 = vmatpush1.bf16.msra.mxu0 %v5431_v15  ;;  %v1272_v3 = vmul.f32 %v6688_v28, %v6688_v28  ;;  %v1085_v16 = vadd.f32 %v1084_v43, %v6676_v2 }
 0x183   :  { %9426 = vst [vmem:[#allocation69_spill] sm:$0xff] %v6692_v11  ;;  %1402 = vadd.xlane.f32.xlu1 %v1401_v39  ;;  %v1089_v0 = vadd.f32 %v1088_v24, %v6688_v28  ;;  %v1405_v27 = vadd.f32 %v1404_v45, %v1268_v25  ;;  %v6709_v22 = vadd.f32 %v6265_v31, %v6113_v37  ;;  %v5434_v39 = vld [vmem:[%s9102_s5 + $0xd0] ss:$8 sps:$4 sm:$0xff]  }
 0x184   :  { %v1273_v15 = vmul.f32 %v6692_v11, %v6692_v11  ;;  %v1093_v43 = vadd.f32 %v6649_v42, %v6645_v54  ;;  %1086 = vadd.xlane.f32.xlu0 %v1085_v16  ;;  %v1410_v45 = vadd.f32 %v1409_v26, %v1272_v3  ;;  %3002 = vmatprep.subr.bf16.mxu0 %v5436_v23  ;;  %v5439_v26 = vld [vmem:[%s9102_s5 + $0xe4] ss:$8 sps:$4 sm:$0xff]  }
 0x185   :  { %v1090_v24 = vadd.f32 %v1089_v0, %v6692_v11  ;;  %v1098_v25 = vadd.f32 %v6667_v52, %v6663_v32  ;;  %v932_v31 = vpop.f32.mrb[56].mxu1  ;;  %v6723_v5 = vadd.f32 %v6278_v36, %v6117_v38  ;;  %v1406_v17 = vadd.f32 %v1405_v27, %v1269_v33 }
 0x186   :  { %3003 = vmatpush1.bf16.msra.mxu0 %v5434_v39  ;;  %v6726_v28 = vadd.f32 %v932_v31, %v6313_v46  ;;  %v934_v2 = vpop.f32.mrb[57].mxu1  ;;  %v1414_v16 = vadd.f32 %v1275_v51, %v1274_v34  ;;  %v1419_v20 = vadd.f32 %v1279_v6, %v1278_v60  ;;  %v1282_v36 = vmul.f32 %v6709_v22, %v6709_v22  ;;  %v5437_v34 = vld [vmem:[%s9102_s5 + $0xe0] ss:$8 sps:$4 sm:$0xff]  }
 0x187   :  { %1091 = vadd.xlane.f32.xlu1 %v1090_v24  ;;  %v6732_v3 = vadd.f32 %v934_v2, %v6323_v40  ;;  %v936_v0 = vpop.f32.mrb[58].mxu1  ;;  %v6738_v23 = vadd.f32 %v6286_v48, %v6113_v37  ;;  %v1411_v39 = vadd.f32 %v1410_v45, %v1273_v15  ;;  %3004 = vmatprep.subr.bf16.mxu0 %v5439_v26  ;;  %v5442_v45 = vld [vmem:[%s9102_s5 + $0xf4] ss:$8 sps:$4 sm:$0xff]  }
 0x188   :  { %9427 = vst [vmem:[#allocation70_spill] sm:$0xff] %v6726_v28  ;;  %v1276_v51 = vmul.f32 %v6726_v28, %v6726_v28  ;;  %v6746_v60 = vadd.f32 %v936_v0, %v6313_v46  ;;  %v938_v2 = vpop.f32.mrb[59].mxu1  ;;  %1407 = vadd.xlane.f32.xlu0 %v1406_v17  ;;  %v1094_v6 = vadd.f32 %v1093_v43, %v6726_v28 }
 0x189   :  { %9428 = vst [vmem:[#allocation71_spill] sm:$0xff] %v6732_v3  ;;  %v1283_v37 = vmul.f32 %v6723_v5, %v6723_v5  ;;  %v6752_v48 = vadd.f32 %v938_v2, %v6323_v40  ;;  %v6756_v33 = vadd.f32 %v6302_v57, %v6117_v38  ;;  %v1277_v27 = vmul.f32 %v6732_v3, %v6732_v3  ;;  %v5440_v57 = vld [vmem:[%s9102_s5 + $0xf0] ss:$8 sps:$4 sm:$0xff]  }
 0x18a   :  { %9429 = vst [vmem:[#allocation72_spill] sm:$0xff] %v6746_v60  ;;  %3005 = vmatpush1.bf16.msra.mxu0 %v5437_v34  ;;  %v1280_v17 = vmul.f32 %v6746_v60, %v6746_v60  ;;  %v1095_v15 = vadd.f32 %v1094_v6, %v6732_v3  ;;  %v1099_v43 = vadd.f32 %v1098_v25, %v6746_v60 }
 0x18b   :  { %9430 = vst [vmem:[#allocation73_spill] sm:$0xff] %v6752_v48  ;;  %1412 = vadd.xlane.f32.xlu1 %v1411_v39  ;;  %v1415_v24 = vadd.f32 %v1414_v16, %v1276_v51  ;;  %v1103_v38 = vadd.f32 %v6723_v5, %v6709_v22  ;;  %v1281_v26 = vmul.f32 %v6752_v48, %v6752_v48 }
 0x18c   :  { %1096 = vadd.xlane.f32.xlu0 %v1095_v15  ;;  %v1100_v31 = vadd.f32 %v1099_v43, %v6752_v48  ;;  %v1420_v0 = vadd.f32 %v1419_v20, %v1280_v17  ;;  %3006 = vmatprep.subr.bf16.mxu0 %v5442_v45  ;;  %v1286_v25 = vmul.f32 %v6738_v23, %v6738_v23 }
 0x18d   :  { %v1287_v16 = vmul.f32 %v6756_v33, %v6756_v33  ;;  %v942_v39 = vpop.f32.mrb[60].mxu1  ;;  %v1416_v2 = vadd.f32 %v1415_v24, %v1277_v27  ;;  %v1424_v6 = vadd.f32 %v1283_v37, %v1282_v36  ;;  %v1108_v15 = vadd.f32 %v6756_v33, %v6738_v23 }
 0x18e   :  { %3007 = vmatpush1.bf16.msra.mxu0 %v5440_v57  ;;  %v6780_v34 = vadd.f32 %v942_v39, %v6313_v46  ;;  %v944_v51 = vpop.f32.mrb[61].mxu1  ;;  %v1421_v39 = vadd.f32 %v1420_v0, %v1281_v26  ;;  %v1290_v26 = vmul.f32 %v6122_v41, %v6122_v41 }
 0x18f   :  { %1101 = vadd.xlane.f32.xlu1 %v1100_v31  ;;  %v6785_v20 = vadd.f32 %v944_v51, %v6323_v40  ;;  %v946_v17 = vpop.f32.mrb[62].mxu1  ;;  %v1429_v27 = vadd.f32 %v1287_v16, %v1286_v25 }
 0x190   :  { %9431 = vst [vmem:[#allocation74_spill] sm:$0xff] %v6780_v34  ;;  %v1284_v43 = vmul.f32 %v6780_v34, %v6780_v34  ;;  %v6790_v45 = vadd.f32 %v946_v17, %v6313_v46  ;;  %v948_v57 = vpop.f32.mrb[63].mxu1  ;;  %1417 = vadd.xlane.f32.xlu0 %v1416_v2  ;;  %v1104_v31 = vadd.f32 %v1103_v38, %v6780_v34 }
 0x191   :  { %9432 = vst [vmem:[#allocation75_spill] sm:$0xff] %v6785_v20  ;;  %v6794_v36 = vadd.f32 %v948_v57, %v6323_v40  ;;  %v1285_v37 = vmul.f32 %v6785_v20, %v6785_v20  ;;  %v1291_v38 = vmul.f32 %v6127_v44, %v6127_v44  ;;  %v1294_v2 = vmul.f32 %v6132_v47, %v6132_v47 }
 0x192   :  { %9433 = vst [vmem:[#allocation76_spill] sm:$0xff] %v6790_v45  ;;  %v1288_v24 = vmul.f32 %v6790_v45, %v6790_v45  ;;  %v1105_v51 = vadd.f32 %v1104_v31, %v6785_v20  ;;  %v1109_v17 = vadd.f32 %v1108_v15, %v6790_v45  ;;  %v1425_v28 = vadd.f32 %v1424_v6, %v1284_v43 }
 0x193   :  { %9434 = vst [vmem:[#allocation77_spill] sm:$0xff] %v6794_v36  ;;  %1422 = vadd.xlane.f32.xlu1 %v1421_v39  ;;  %v1289_v25 = vmul.f32 %v6794_v36, %v6794_v36  ;;  %v1295_v15 = vmul.f32 %v6137_v50, %v6137_v50  ;;  %v1113_v43 = vadd.f32 %v6127_v44, %v6122_v41 }
 0x194   :  { %1106 = vadd.xlane.f32.xlu0 %v1105_v51  ;;  %v1110_v0 = vadd.f32 %v1109_v17, %v6794_v36  ;;  %v1430_v16 = vadd.f32 %v1429_v27, %v1288_v24  ;;  %v1426_v31 = vadd.f32 %v1425_v28, %v1285_v37  ;;  %v1118_v51 = vadd.f32 %v6137_v50, %v6132_v47 }
 0x195   :  { %v952_v6 = vpop.f32.mrb[64].mxu1  ;;  %v1434_v17 = vadd.f32 %v1291_v38, %v1290_v26 }
 0x196   :  { %v6816_v57 = vadd.f32 %v952_v6, %v6313_v46  ;;  %v954_v39 = vpop.f32.mrb[65].mxu1  ;;  %v1431_v6 = vadd.f32 %v1430_v16, %v1289_v25  ;;  %v1298_v25 = vmul.f32 %v6142_v53, %v6142_v53 }
 0x197   :  { %1111 = vadd.xlane.f32.xlu1 %v1110_v0  ;;  %v6821_v27 = vadd.f32 %v954_v39, %v6323_v40  ;;  %v956_v24 = vpop.f32.mrb[66].mxu1  ;;  %v1439_v39 = vadd.f32 %v1295_v15, %v1294_v2 }
 0x198   :  { %9435 = vst [vmem:[#allocation78_spill] sm:$0xff] %v6816_v57  ;;  %v1292_v34 = vmul.f32 %v6816_v57, %v6816_v57  ;;  %v6826_v45 = vadd.f32 %v956_v24, %v6313_v46  ;;  %v958_v20 = vpop.f32.mrb[67].mxu1  ;;  %1427 = vadd.xlane.f32.xlu0 %v1426_v31  ;;  %v1114_v0 = vadd.f32 %v1113_v43, %v6816_v57 }
 0x199   :  { %9436 = vst [vmem:[#allocation79_spill] sm:$0xff] %v6821_v27  ;;  %v6830_v28 = vadd.f32 %v958_v20, %v6323_v40  ;;  %v1293_v37 = vmul.f32 %v6821_v27, %v6821_v27  ;;  %v1299_v20 = vmul.f32 %v6147_v56, %v6147_v56  ;;  %v1302_v43 = vmul.f32 %v6152_v59, %v6152_v59 }
 0x19a   :  { %9437 = vst [vmem:[#allocation80_spill] sm:$0xff] %v6826_v45  ;;  %v1296_v26 = vmul.f32 %v6826_v45, %v6826_v45  ;;  %v1115_v38 = vadd.f32 %v1114_v0, %v6821_v27  ;;  %v1119_v24 = vadd.f32 %v1118_v51, %v6826_v45  ;;  %v1435_v36 = vadd.f32 %v1434_v17, %v1292_v34 }
 0x19b   :  { %9438 = vst [vmem:[#allocation81_spill] sm:$0xff] %v6830_v28  ;;  %1432 = vadd.xlane.f32.xlu1 %v1431_v6  ;;  %v1297_v2 = vmul.f32 %v6830_v28, %v6830_v28  ;;  %v1303_v31 = vmul.f32 %v6157_v62, %v6157_v62  ;;  %v1123_v51 = vadd.f32 %v6147_v56, %v6142_v53  ;;  %v9503_v56 = vld [vmem:[#allocation39_spill] sm:$0xff] }
 0x19c   :  { %1116 = vadd.xlane.f32.xlu0 %v1115_v38  ;;  %v1120_v16 = vadd.f32 %v1119_v24, %v6830_v28  ;;  %v1440_v15 = vadd.f32 %v1439_v39, %v1296_v26  ;;  %v1436_v0 = vadd.f32 %v1435_v36, %v1293_v37  ;;  %v1128_v38 = vadd.f32 %v6157_v62, %v6152_v59 }
 0x19d   :  { %v962_v34 = vpop.f32.mrb[68].mxu1  ;;  %v1444_v24 = vadd.f32 %v1299_v20, %v1298_v25 }
 0x19e   :  { %v6852_v17 = vadd.f32 %v962_v34, %v6313_v46  ;;  %v964_v6 = vpop.f32.mrb[69].mxu1  ;;  %v1441_v34 = vadd.f32 %v1440_v15, %v1297_v2  ;;  %v1306_v2 = vmul.f32 %v6162_v1, %v6162_v1 }
 0x19f   :  { %1121 = vadd.xlane.f32.xlu1 %v1120_v16  ;;  %v6857_v39 = vadd.f32 %v964_v6, %v6323_v40  ;;  %v966_v26 = vpop.f32.mrb[70].mxu1  ;;  %v1449_v6 = vadd.f32 %v1303_v31, %v1302_v43 }
 0x1a0   :  { %9439 = vst [vmem:[#allocation82_spill] sm:$0xff] %v6852_v17  ;;  %v1300_v57 = vmul.f32 %v6852_v17, %v6852_v17  ;;  %v6862_v45 = vadd.f32 %v966_v26, %v6313_v46  ;;  %v968_v27 = vpop.f32.mrb[71].mxu1  ;;  %1437 = vadd.xlane.f32.xlu0 %v1436_v0  ;;  %v1124_v16 = vadd.f32 %v1123_v51, %v6852_v17 }
 0x1a1   :  { %9440 = vst [vmem:[#allocation83_spill] sm:$0xff] %v6857_v39  ;;  %v6866_v36 = vadd.f32 %v968_v27, %v6323_v40  ;;  %v1301_v37 = vmul.f32 %v6857_v39, %v6857_v39  ;;  %v1307_v27 = vmul.f32 %v6167_v4, %v6167_v4  ;;  %v1310_v51 = vmul.f32 %v6172_v7, %v6172_v7 }
 0x1a2   :  { %9441 = vst [vmem:[#allocation84_spill] sm:$0xff] %v6862_v45  ;;  %v1304_v25 = vmul.f32 %v6862_v45, %v6862_v45  ;;  %v1125_v20 = vadd.f32 %v1124_v16, %v6857_v39  ;;  %v1129_v26 = vadd.f32 %v1128_v38, %v6862_v45  ;;  %v1445_v28 = vadd.f32 %v1444_v24, %v1300_v57 }
 0x1a3   :  { %9442 = vst [vmem:[#allocation85_spill] sm:$0xff] %v6866_v36  ;;  %1442 = vadd.xlane.f32.xlu1 %v1441_v34  ;;  %v1305_v43 = vmul.f32 %v6866_v36, %v6866_v36  ;;  %v1311_v0 = vmul.f32 %v6177_v10, %v6177_v10  ;;  %v1133_v38 = vadd.f32 %v6167_v4, %v6162_v1 }
 0x1a4   :  { %1126 = vadd.xlane.f32.xlu0 %v1125_v20  ;;  %v1130_v15 = vadd.f32 %v1129_v26, %v6866_v36  ;;  %v1450_v31 = vadd.f32 %v1449_v6, %v1304_v25  ;;  %v1446_v16 = vadd.f32 %v1445_v28, %v1301_v37  ;;  %v1138_v20 = vadd.f32 %v6177_v10, %v6172_v7 }
 0x1a5   :  { %v972_v57 = vpop.f32.mrb[72].mxu1  ;;  %v1454_v26 = vadd.f32 %v1307_v27, %v1306_v2 }
 0x1a6   :  { %v6888_v24 = vadd.f32 %v972_v57, %v6313_v46  ;;  %v974_v34 = vpop.f32.mrb[73].mxu1  ;;  %v1451_v57 = vadd.f32 %v1450_v31, %v1305_v43  ;;  %v9448_v31 = vld [vmem:[#allocation17_spill] sm:$0xff] }
 0x1a7   :  { %1131 = vadd.xlane.f32.xlu1 %v1130_v15  ;;  %v6893_v6 = vadd.f32 %v974_v34, %v6323_v40  ;;  %v976_v25 = vpop.f32.mrb[74].mxu1  ;;  %v1459_v34 = vadd.f32 %v1311_v0, %v1310_v51 }
 0x1a8   :  { %9443 = vst [vmem:[#allocation86_spill] sm:$0xff] %v6888_v24  ;;  %v1308_v17 = vmul.f32 %v6888_v24, %v6888_v24  ;;  %v6898_v45 = vadd.f32 %v976_v25, %v6313_v46  ;;  %v978_v39 = vpop.f32.mrb[75].mxu1  ;;  %1447 = vadd.xlane.f32.xlu0 %v1446_v16  ;;  %v1134_v15 = vadd.f32 %v1133_v38, %v6888_v24  ;;  %v9447_v16 = vld [vmem:[#allocation16_spill] sm:$0xff]  ;;  %v9449_v24 = vld [vmem:[#allocation18_spill] sm:$0xff] }
 0x1a9   :  { %9444 = vst [vmem:[#allocation87_spill] sm:$0xff] %v6893_v6  ;;  %v6902_v28 = vadd.f32 %v978_v39, %v6323_v40  ;;  %v1309_v37 = vmul.f32 %v6893_v6, %v6893_v6  ;;  %v1314_v43 = vmul.f32 %v9447_v16, %v9447_v16  ;;  %v1315_v39 = vmul.f32 %v9448_v31, %v9448_v31 }
 0x1aa   :  { %9445 = vst [vmem:[#allocation88_spill] sm:$0xff] %v6898_v45  ;;  %v1312_v2 = vmul.f32 %v6898_v45, %v6898_v45  ;;  %v1135_v27 = vadd.f32 %v1134_v15, %v6893_v6  ;;  %v1139_v25 = vadd.f32 %v1138_v20, %v6898_v45  ;;  %v1455_v36 = vadd.f32 %v1454_v26, %v1308_v17  ;;  %v9450_v15 = vld [vmem:[#allocation19_spill] sm:$0xff] }
 0x1ab   :  { %9446 = vst [vmem:[#allocation89_spill] sm:$0xff] %v6902_v28  ;;  %1452 = vadd.xlane.f32.xlu1 %v1451_v57  ;;  %v1313_v51 = vmul.f32 %v6902_v28, %v6902_v28  ;;  %v1318_v57 = vmul.f32 %v9449_v24, %v9449_v24  ;;  %v1319_v20 = vmul.f32 %v9450_v15, %v9450_v15 }
 0x1ac   :  { %1136 = vadd.xlane.f32.xlu0 %v1135_v27  ;;  %v1140_v38 = vadd.f32 %v1139_v25, %v6902_v28  ;;  %v1460_v0 = vadd.f32 %v1459_v34, %v1312_v2  ;;  %v1143_v26 = vadd.f32 %v9448_v31, %v9447_v16  ;;  %v1456_v25 = vadd.f32 %v1455_v36, %v1309_v37 }
 0x1ad   :  { %v982_v17 = vpop.f32.mrb[76].mxu1  ;;  %v1148_v6 = vadd.f32 %v9450_v15, %v9449_v24  ;;  %v1464_v28 = vadd.f32 %v1315_v39, %v1314_v43 }
 0x1ae   :  { %v6924_v45 = vadd.f32 %v982_v17, %v6313_v46  ;;  %v984_v27 = vpop.f32.mrb[77].mxu1  ;;  %v1461_v17 = vadd.f32 %v1460_v0, %v1313_v51  ;;  %v9456_v0 = vld [vmem:[#allocation21_spill] sm:$0xff] }
 0x1af   :  { %1141 = vadd.xlane.f32.xlu1 %v1140_v38  ;;  %v6929_v34 = vadd.f32 %v984_v27, %v6323_v40  ;;  %v986_v2 = vpop.f32.mrb[78].mxu1  ;;  %v1469_v27 = vadd.f32 %v1319_v20, %v1318_v57 }
 0x1b0   :  { %9451 = vst [vmem:[#allocation90_spill] sm:$0xff] %v6924_v45  ;;  %v1316_v60 = vmul.f32 %v6924_v45, %v6924_v45  ;;  %v6934_v3 = vadd.f32 %v986_v2, %v6313_v46  ;;  %v988_v48 = vpop.f32.mrb[79].mxu1  ;;  %1457 = vadd.xlane.f32.xlu0 %v1456_v25  ;;  %v1144_v38 = vadd.f32 %v1143_v26, %v6924_v45  ;;  %v9455_v25 = vld [vmem:[#allocation20_spill] sm:$0xff]  ;;  %v9457_v45 = vld [vmem:[#allocation22_spill] sm:$0xff] }
 0x1b1   :  { %9452 = vst [vmem:[#allocation91_spill] sm:$0xff] %v6929_v34  ;;  %v6938_v36 = vadd.f32 %v988_v48, %v6323_v40  ;;  %v1317_v37 = vmul.f32 %v6929_v34, %v6929_v34  ;;  %v1322_v51 = vmul.f32 %v9455_v25, %v9455_v25  ;;  %v1323_v48 = vmul.f32 %v9456_v0, %v9456_v0 }
 0x1b2   :  { %9453 = vst [vmem:[#allocation92_spill] sm:$0xff] %v6934_v3  ;;  %v1320_v43 = vmul.f32 %v6934_v3, %v6934_v3  ;;  %v1145_v39 = vadd.f32 %v1144_v38, %v6929_v34  ;;  %v1149_v2 = vadd.f32 %v1148_v6, %v6934_v3  ;;  %v1465_v11 = vadd.f32 %v1464_v28, %v1316_v60  ;;  %v9458_v38 = vld [vmem:[#allocation23_spill] sm:$0xff] }
 0x1b3   :  { %9454 = vst [vmem:[#allocation93_spill] sm:$0xff] %v6938_v36  ;;  %1462 = vadd.xlane.f32.xlu1 %v1461_v17  ;;  %v1321_v57 = vmul.f32 %v6938_v36, %v6938_v36  ;;  %v1326_v17 = vmul.f32 %v9457_v45, %v9457_v45  ;;  %v1327_v6 = vmul.f32 %v9458_v38, %v9458_v38 }
 0x1b4   :  { %1146 = vadd.xlane.f32.xlu0 %v1145_v39  ;;  %v1150_v26 = vadd.f32 %v1149_v2, %v6938_v36  ;;  %v1470_v20 = vadd.f32 %v1469_v27, %v1320_v43  ;;  %v1153_v28 = vadd.f32 %v9456_v0, %v9455_v25  ;;  %v1466_v2 = vadd.f32 %v1465_v11, %v1317_v37 }
 0x1b5   :  { %v992_v60 = vpop.f32.mrb[80].mxu1  ;;  %v1158_v34 = vadd.f32 %v9458_v38, %v9457_v45  ;;  %v1474_v36 = vadd.f32 %v1323_v48, %v1322_v51 }
 0x1b6   :  { %v6960_v3 = vadd.f32 %v992_v60, %v6313_v46  ;;  %v994_v39 = vpop.f32.mrb[81].mxu1  ;;  %v1471_v60 = vadd.f32 %v1470_v20, %v1321_v57  ;;  %v9464_v20 = vld [vmem:[#allocation25_spill] sm:$0xff] }
 0x1b7   :  { %1151 = vadd.xlane.f32.xlu1 %v1150_v26  ;;  %v6965_v27 = vadd.f32 %v994_v39, %v6323_v40  ;;  %v996_v43 = vpop.f32.mrb[82].mxu1  ;;  %v1479_v39 = vadd.f32 %v1327_v6, %v1326_v17 }
 0x1b8   :  { %9459 = vst [vmem:[#allocation94_spill] sm:$0xff] %v6960_v3  ;;  %v1324_v24 = vmul.f32 %v6960_v3, %v6960_v3  ;;  %v6970_v16 = vadd.f32 %v996_v43, %v6313_v46  ;;  %v998_v25 = vpop.f32.mrb[83].mxu1  ;;  %1467 = vadd.xlane.f32.xlu0 %v1466_v2  ;;  %v1154_v26 = vadd.f32 %v1153_v28, %v6960_v3  ;;  %v9463_v2 = vld [vmem:[#allocation24_spill] sm:$0xff]  ;;  %v9465_v3 = vld [vmem:[#allocation26_spill] sm:$0xff] }
 0x1b9   :  { %9460 = vst [vmem:[#allocation95_spill] sm:$0xff] %v6965_v27  ;;  %v6974_v11 = vadd.f32 %v998_v25, %v6323_v40  ;;  %v1325_v37 = vmul.f32 %v6965_v27, %v6965_v27  ;;  %v1330_v57 = vmul.f32 %v9463_v2, %v9463_v2  ;;  %v1331_v25 = vmul.f32 %v9464_v20, %v9464_v20 }
 0x1ba   :  { %9461 = vst [vmem:[#allocation96_spill] sm:$0xff] %v6970_v16  ;;  %v1328_v51 = vmul.f32 %v6970_v16, %v6970_v16  ;;  %v1155_v48 = vadd.f32 %v1154_v26, %v6965_v27  ;;  %v1159_v43 = vadd.f32 %v1158_v34, %v6970_v16  ;;  %v1475_v45 = vadd.f32 %v1474_v36, %v1324_v24  ;;  %v9466_v26 = vld [vmem:[#allocation27_spill] sm:$0xff] }
 0x1bb   :  { %9462 = vst [vmem:[#allocation97_spill] sm:$0xff] %v6974_v11  ;;  %1472 = vadd.xlane.f32.xlu1 %v1471_v60  ;;  %v1329_v17 = vmul.f32 %v6974_v11, %v6974_v11  ;;  %v1334_v60 = vmul.f32 %v9465_v3, %v9465_v3  ;;  %v1335_v34 = vmul.f32 %v9466_v26, %v9466_v26 }
 0x1bc   :  { %1156 = vadd.xlane.f32.xlu0 %v1155_v48  ;;  %v1160_v28 = vadd.f32 %v1159_v43, %v6974_v11  ;;  %v1480_v6 = vadd.f32 %v1479_v39, %v1328_v51  ;;  %v1163_v36 = vadd.f32 %v9464_v20, %v9463_v2  ;;  %v1476_v43 = vadd.f32 %v1475_v45, %v1325_v37 }
 0x1bd   :  { %v1002_v24 = vpop.f32.mrb[84].mxu1  ;;  %v1168_v27 = vadd.f32 %v9466_v26, %v9465_v3  ;;  %v1484_v11 = vadd.f32 %v1331_v25, %v1330_v57 }
 0x1be   :  { %v6996_v16 = vadd.f32 %v1002_v24, %v6313_v46  ;;  %v1004_v48 = vpop.f32.mrb[85].mxu1  ;;  %v1481_v24 = vadd.f32 %v1480_v6, %v1329_v17  ;;  %v9472_v6 = vld [vmem:[#allocation29_spill] sm:$0xff] }
 0x1bf   :  { %1161 = vadd.xlane.f32.xlu1 %v1160_v28  ;;  %v7001_v39 = vadd.f32 %v1004_v48, %v6323_v40  ;;  %v1006_v51 = vpop.f32.mrb[86].mxu1  ;;  %v1489_v48 = vadd.f32 %v1335_v34, %v1334_v60 }
 0x1c0   :  { %9467 = vst [vmem:[#allocation98_spill] sm:$0xff] %v6996_v16  ;;  %v1332_v38 = vmul.f32 %v6996_v16, %v6996_v16  ;;  %v7006_v0 = vadd.f32 %v1006_v51, %v6313_v46  ;;  %v1008_v2 = vpop.f32.mrb[87].mxu1  ;;  %1477 = vadd.xlane.f32.xlu0 %v1476_v43  ;;  %v1164_v28 = vadd.f32 %v1163_v36, %v6996_v16  ;;  %v9471_v43 = vld [vmem:[#allocation28_spill] sm:$0xff]  ;;  %v9473_v16 = vld [vmem:[#allocation30_spill] sm:$0xff] }
 0x1c1   :  { %9468 = vst [vmem:[#allocation99_spill] sm:$0xff] %v7001_v39  ;;  %v7010_v45 = vadd.f32 %v1008_v2, %v6323_v40  ;;  %v1333_v37 = vmul.f32 %v7001_v39, %v7001_v39  ;;  %v1338_v17 = vmul.f32 %v9471_v43, %v9471_v43  ;;  %v1339_v2 = vmul.f32 %v9472_v6, %v9472_v6 }
 0x1c2   :  { %9469 = vst [vmem:[#allocation100_spill] sm:$0xff] %v7006_v0  ;;  %v1336_v57 = vmul.f32 %v7006_v0, %v7006_v0  ;;  %v1165_v25 = vadd.f32 %v1164_v28, %v7001_v39  ;;  %v1169_v51 = vadd.f32 %v1168_v27, %v7006_v0  ;;  %v1485_v3 = vadd.f32 %v1484_v11, %v1332_v38  ;;  %v9474_v28 = vld [vmem:[#allocation31_spill] sm:$0xff] }
 0x1c3   :  { %9470 = vst [vmem:[#allocation101_spill] sm:$0xff] %v7010_v45  ;;  %1482 = vadd.xlane.f32.xlu1 %v1481_v24  ;;  %v1337_v60 = vmul.f32 %v7010_v45, %v7010_v45  ;;  %v1342_v24 = vmul.f32 %v9473_v16, %v9473_v16  ;;  %v1343_v27 = vmul.f32 %v9474_v28, %v9474_v28 }
 0x1c4   :  { %1166 = vadd.xlane.f32.xlu0 %v1165_v25  ;;  %v1170_v36 = vadd.f32 %v1169_v51, %v7010_v45  ;;  %v1490_v34 = vadd.f32 %v1489_v48, %v1336_v57  ;;  %v1173_v11 = vadd.f32 %v9472_v6, %v9471_v43  ;;  %v1486_v51 = vadd.f32 %v1485_v3, %v1333_v37 }
 0x1c5   :  { %v1012_v38 = vpop.f32.mrb[88].mxu1  ;;  %v1178_v39 = vadd.f32 %v9474_v28, %v9473_v16  ;;  %v1494_v45 = vadd.f32 %v1339_v2, %v1338_v17 }
 0x1c6   :  { %v7032_v0 = vadd.f32 %v1012_v38, %v6313_v46  ;;  %v1014_v25 = vpop.f32.mrb[89].mxu1  ;;  %v1491_v38 = vadd.f32 %v1490_v34, %v1337_v60  ;;  %v9480_v34 = vld [vmem:[#allocation37_spill] sm:$0xff] }
 0x1c7   :  { %1171 = vadd.xlane.f32.xlu1 %v1170_v36  ;;  %v7037_v48 = vadd.f32 %v1014_v25, %v6323_v40  ;;  %v1016_v57 = vpop.f32.mrb[90].mxu1  ;;  %v1499_v25 = vadd.f32 %v1343_v27, %v1342_v24 }
 0x1c8   :  { %9475 = vst [vmem:[#allocation102_spill] sm:$0xff] %v7032_v0  ;;  %v1340_v26 = vmul.f32 %v7032_v0, %v7032_v0  ;;  %v7042_v20 = vadd.f32 %v1016_v57, %v6313_v46  ;;  %v1018_v43 = vpop.f32.mrb[91].mxu1  ;;  %1487 = vadd.xlane.f32.xlu0 %v1486_v51  ;;  %v1174_v36 = vadd.f32 %v1173_v11, %v7032_v0  ;;  %v9479_v51 = vld [vmem:[#allocation34_spill] sm:$0xff] }
 0x1c9   :  { %9476 = vst [vmem:[#allocation103_spill] sm:$0xff] %v7037_v48  ;;  %v7046_v3 = vadd.f32 %v1018_v43, %v6323_v40  ;;  %v1341_v37 = vmul.f32 %v7037_v48, %v7037_v48  ;;  %v1346_v60 = vmul.f32 %v9479_v51, %v9479_v51  ;;  %v1347_v43 = vmul.f32 %v9480_v34, %v9480_v34  ;;  %v9481_v0 = vld [vmem:[#allocation38_spill] sm:$0xff] }
 0x1ca   :  { %9477 = vst [vmem:[#allocation104_spill] sm:$0xff] %v7042_v20  ;;  %v1344_v17 = vmul.f32 %v7042_v20, %v7042_v20  ;;  %v1175_v2 = vadd.f32 %v1174_v36, %v7037_v48  ;;  %v1179_v57 = vadd.f32 %v1178_v39, %v7042_v20  ;;  %v1495_v16 = vadd.f32 %v1494_v45, %v1340_v26  ;;  %v9482_v36 = vld [vmem:[#allocation41_spill] sm:$0xff] }
 0x1cb   :  { %9478 = vst [vmem:[#allocation105_spill] sm:$0xff] %v7046_v3  ;;  %1492 = vadd.xlane.f32.xlu1 %v1491_v38  ;;  %v1345_v24 = vmul.f32 %v7046_v3, %v7046_v3  ;;  %v1350_v38 = vmul.f32 %v9481_v0, %v9481_v0  ;;  %v1351_v39 = vmul.f32 %v9482_v36, %v9482_v36 }
 0x1cc   :  { %1176 = vadd.xlane.f32.xlu0 %v1175_v2  ;;  %v1180_v11 = vadd.f32 %v1179_v57, %v7046_v3  ;;  %v1500_v27 = vadd.f32 %v1499_v25, %v1344_v17  ;;  %v1183_v45 = vadd.f32 %v9480_v34, %v9479_v51  ;;  %v1496_v57 = vadd.f32 %v1495_v16, %v1341_v37 }
 0x1cd   :  { %v1022_v26 = vpop.f32.mrb[92].mxu1  ;;  %v1188_v48 = vadd.f32 %v9482_v36, %v9481_v0  ;;  %v1504_v3 = vadd.f32 %v1347_v43, %v1346_v60 }
 0x1ce   :  { %v7068_v20 = vadd.f32 %v1022_v26, %v6313_v46  ;;  %v1024_v2 = vpop.f32.mrb[93].mxu1  ;;  %v1501_v26 = vadd.f32 %v1500_v27, %v1345_v24 }
 0x1cf   :  { %1181 = vadd.xlane.f32.xlu1 %v1180_v11  ;;  %v7073_v25 = vadd.f32 %v1024_v2, %v6323_v40  ;;  %v1026_v17 = vpop.f32.mrb[94].mxu1  ;;  %v1509_v2 = vadd.f32 %v1351_v39, %v1350_v38  ;;  %v5445_v39 = vld [vmem:[%s9102_s5 + $0x104] ss:$8 sps:$4 sm:$0xff]  }
 0x1d0   :  { %9483 = vst [vmem:[#allocation106_spill] sm:$0xff] %v7068_v20  ;;  %v1348_v28 = vmul.f32 %v7068_v20, %v7068_v20  ;;  %v7078_v6 = vadd.f32 %v1026_v17, %v6313_v46  ;;  %v1028_v51 = vpop.f32.mrb[95].mxu1  ;;  %1497 = vadd.xlane.f32.xlu0 %v1496_v57  ;;  %v1184_v11 = vadd.f32 %v1183_v45, %v7068_v20 }
 0x1d1   :  { %9484 = vst [vmem:[#allocation107_spill] sm:$0xff] %v7073_v25  ;;  %v7082_v16 = vadd.f32 %v1028_v51, %v6323_v40  ;;  %v1349_v37 = vmul.f32 %v7073_v25, %v7073_v25  ;;  %3169 = vmatprep.subr.bf16.mxu0 %v5445_v39 }
 0x1d2   :  { %9485 = vst [vmem:[#allocation108_spill] sm:$0xff] %v7078_v6  ;;  %v1352_v60 = vmul.f32 %v7078_v6, %v7078_v6  ;;  %v1185_v43 = vadd.f32 %v1184_v11, %v7073_v25  ;;  %v1189_v46 = vadd.f32 %v1188_v48, %v7078_v6  ;;  %v1505_v17 = vadd.f32 %v1504_v3, %v1348_v28 }
 0x1d3   :  { %9486 = vst [vmem:[#allocation109_spill] sm:$0xff] %v7082_v16  ;;  %1502 = vadd.xlane.f32.xlu1 %v1501_v26  ;;  %v1353_v40 = vmul.f32 %v7082_v16, %v7082_v16 }
 0x1d4   :  { %1186 = vadd.xlane.f32.xlu0 %v1185_v43  ;;  %v1190_v24 = vadd.f32 %v1189_v46, %v7082_v16  ;;  %v1510_v51 = vadd.f32 %v1509_v2, %v1352_v60  ;;  %v1506_v27 = vadd.f32 %v1505_v17, %v1349_v37 }
 0x1d6   :  { %v1511_v38 = vadd.f32 %v1510_v51, %v1353_v40 }
 0x1d7   :  { %1191 = vadd.xlane.f32.xlu1 %v1190_v24 }
 0x1d8   :  { %1507 = vadd.xlane.f32.xlu0 %v1506_v27 }
 0x1db   :  { %1512 = vadd.xlane.f32.xlu1 %v1511_v38 }
 0x1e9   :  { %v1037_v45 = vpop.xlane.xlu0 %1036 }
 0x1ea   :  { %v7096_v48 = vmul.f32 0.001953125, %v1037_v45 }
 0x1eb   :  { %v1358_v28 = vpop.xlane.xlu1 %1357 }
 0x1ec   :  { %9487 = vst [vmem:[#allocation110_spill] sm:$0xff] %v7096_v48  ;;  %v1514_v3 = vmul.f32 0.001953125, %v1358_v28  ;;  %v1546_v57 = vmul.f32 %v7096_v48, %v7096_v48 }
 0x1ed   :  { %v1042_v26 = vpop.xlane.xlu0 %1041 }
 0x1ee   :  { %v1578_v11 = vsub.f32 %v1514_v3, %v1546_v57  ;;  %v7100_v2 = vmul.f32 0.001953125, %v1042_v26 }
 0x1ef   :  { %v1363_v37 = vpop.xlane.xlu1 %1362 }
 0x1f0   :  { %9488 = vst [vmem:[#allocation111_spill] sm:$0xff] %v7100_v2  ;;  %v1610_v60 = vmax.f32 %v1578_v11, 0.0  ;;  %v1515_v43 = vmul.f32 0.001953125, %v1363_v37  ;;  %v1547_v46 = vmul.f32 %v7100_v2, %v7100_v2 }
 0x1f1   :  { %v1047_v17 = vpop.xlane.xlu0 %1046 }
 0x1f2   :  { %v1642_v24 = vadd.f32 1e-05, %v1610_v60  ;;  %v1579_v40 = vsub.f32 %v1515_v43, %v1547_v46  ;;  %v7104_v51 = vmul.f32 0.001953125, %v1047_v17  ;;  %v1031_v43 = vld [vmem:[%s9103_s3] sm:$0xf] }
 0x1f3   :  { %v1052_v27 = vpop.xlane.xlu1 %1051 }
 0x1f4   :  { %9489 = vst [vmem:[#allocation112_spill] sm:$0xff] %v7104_v51  ;;  %5507 = vrsqrt.f32 %v1642_v24  ;;  %v1611_v38 = vmax.f32 %v1579_v40, 0.0  ;;  %v7106_v39 = vmul.f32 0.001953125, %v1052_v27  ;;  %v1548_v3 = vmul.f32 %v7104_v51, %v7104_v51 }
 0x1f5   :  { %v1368_v45 = vpop.xlane.xlu0 %1367 }
 0x1f6   :  { %9490 = vst [vmem:[#allocation113_spill] sm:$0xff] %v7106_v39  ;;  %v1643_v28 = vadd.f32 1e-05, %v1611_v38  ;;  %v1516_v57 = vmul.f32 0.001953125, %v1368_v45  ;;  %v1549_v37 = vmul.f32 %v7106_v39, %v7106_v39  ;;  %v9492_v38 = vld [vmem:[#allocation5_spill] sm:$0xff]  ;;  %v9493_v45 = vld [vmem:[#allocation4_spill] sm:$0xff] }
 0x1f7   :  { %v1373_v26 = vpop.xlane.xlu1 %1372  ;;  %v7118_v20 = vrot.slane %v1031_v43, %v9492_v38 }
 0x1f8   :  { %5509 = vrsqrt.f32 %v1643_v28  ;;  %v1580_v11 = vsub.f32 %v1516_v57, %v1548_v3  ;;  %v1517_v60 = vmul.f32 0.001953125, %v1373_v26  ;;  %v7121_v28 = vrot.slane %v1031_v43, %v9493_v45  ;;  %v1032_v26 = vld [vmem:[%s9104_s4] sm:$0xf] }
 0x1f9   :  { %v1057_v46 = vpop.xlane.xlu0 %1056 }
 0x1fa   :  { %v1612_v17 = vmax.f32 %v1580_v11, 0.0  ;;  %v1581_v24 = vsub.f32 %v1517_v60, %v1549_v37  ;;  %v7115_v40 = vmul.f32 0.001953125, %v1057_v46  ;;  %v9494_v11 = vld [vmem:[#allocation33_spill] sm:$0xff] }
 0x1fb   :  { %v7129_v37 = vrot.slane %v1031_v43, %v9494_v11  ;;  %v7143_v43 = vrot.slane %v1032_v26, %v9493_v45 }
 0x1fc   :  { %9491 = vst [vmem:[#allocation114_spill] sm:$0xff] %v7115_v40  ;;  %v1062_v27 = vpop.xlane.xlu1 %1061  ;;  %v1644_v3 = vadd.f32 1e-05, %v1612_v17  ;;  %v1613_v57 = vmax.f32 %v1581_v24, 0.0  ;;  %v1550_v16 = vmul.f32 %v7115_v40, %v7115_v40 }
 0x1fd   :  { %v7123_v6 = vmul.f32 0.001953125, %v1062_v27  ;;  %v1378_v25 = vpop.xlane.xlu0 %1377  ;;  %9495 = vst [vmem:[#allocation115_spill] sm:$0xff] %v7129_v37  ;;  %v7138_v27 = vrot.slane %v1032_v26, %v9492_v38 }
 0x1fe   :  { %v7131_v60 = vpop.eup %5507  ;;  %5511 = vrsqrt.f32 %v1644_v3  ;;  %v1645_v46 = vadd.f32 1e-05, %v1613_v57  ;;  %v1518_v0 = vmul.f32 0.001953125, %v1378_v25 }
 0x1ff   :  { %9496 = vst [vmem:[#allocation116_spill] sm:$0xff] %v7131_v60  ;;  %v1728_v24 = vmul.f32 %v7131_v60, %v7118_v20  ;;  %v1727_v36 = vmul.f32 %v7131_v60, %v7121_v28  ;;  %v1551_v57 = vmul.f32 %v7123_v6, %v7123_v6  ;;  %v7151_v38 = vmul.f32 %v7131_v60, %v7129_v37 }
 0x200   :  { %v1383_v17 = vpop.xlane.xlu1 %1382  ;;  %5513 = vrsqrt.f32 %v1645_v46  ;;  %v1582_v3 = vsub.f32 %v1518_v0, %v1550_v16  ;;  %v9500_v0 = vld [vmem:[#allocation36_spill] sm:$0xff] }
 0x201   :  { %v1519_v11 = vmul.f32 0.001953125, %v1383_v17  ;;  %v1067_v25 = vpop.xlane.xlu0 %1066  ;;  %v1984_v34 = vmul.f32 %v1728_v24, %v7096_v48  ;;  %v1983_v15 = vmul.f32 %v1727_v36, %v7096_v48  ;;  %9497 = vst [vmem:[#allocation117_spill] sm:$0xff] %v7151_v38  ;;  %v1856_v16 = vmul.f32 %v1728_v24, %v9500_v0 }
 0x202   :  { %v7153_v31 = vpop.eup %5509  ;;  %v1614_v7 = vmax.f32 %v1582_v3, 0.0  ;;  %v7155_v45 = vmul.f32 0.001953125, %v1067_v25  ;;  %v9502_v25 = vld [vmem:[#allocation40_spill] sm:$0xff] }
 0x203   :  { %9498 = vst [vmem:[#allocation118_spill] sm:$0xff] %v7153_v31  ;;  %v1583_v26 = vsub.f32 %v1519_v11, %v1551_v57  ;;  %v1732_v17 = vmul.f32 %v7153_v31, %v7118_v20  ;;  %v2133_v1 = vsub.f32 %v7138_v27, %v1984_v34  ;;  %v1731_v48 = vmul.f32 %v7153_v31, %v7121_v28  ;;  %v9501_v11 = vld [vmem:[#allocation35_spill] sm:$0xff] }
 0x204   :  { %9499 = vst [vmem:[#allocation119_spill] sm:$0xff] %v7155_v45  ;;  %v1072_v46 = vpop.xlane.xlu1 %1071  ;;  %v2132_v60 = vsub.f32 %v7143_v43, %v1983_v15  ;;  %v1646_v38 = vadd.f32 1e-05, %v1614_v7  ;;  %v1855_v3 = vmul.f32 %v1727_v36, %v9501_v11  ;;  %v1552_v24 = vmul.f32 %v7155_v45, %v7155_v45 }
 0x205   :  { %v1615_v10 = vmax.f32 %v1583_v26, 0.0  ;;  %v7164_v4 = vmul.f32 0.001953125, %v1072_v46  ;;  %v1388_v57 = vpop.xlane.xlu0 %1387  ;;  %v1860_v0 = vmul.f32 %v1732_v17, %v9502_v25  ;;  %v1988_v59 = vmul.f32 %v1732_v17, %v7100_v2 }
 0x206   :  { %v2261_v34 = vadd.f32 %v2133_v1, %v1856_v16  ;;  %5515 = vrsqrt.f32 %v1646_v38  ;;  %v1520_v62 = vmul.f32 0.001953125, %v1388_v57  ;;  %v1859_v15 = vmul.f32 %v1731_v48, %v9503_v56 }
 0x207   :  { %v1647_v53 = vadd.f32 1e-05, %v1615_v10  ;;  %v1553_v7 = vmul.f32 %v7164_v4, %v7164_v4  ;;  %v2137_v36 = vsub.f32 %v7138_v27, %v1988_v59  ;;  %v1987_v46 = vmul.f32 %v1731_v48, %v7100_v2 }
 0x208   :  { %v1393_v26 = vpop.xlane.xlu1 %1392  ;;  %v2260_v11 = vadd.f32 %v2132_v60, %v1855_v3  ;;  %v7176_v47 = vpop.eup %5511  ;;  %v1584_v25 = vsub.f32 %v1520_v62, %v1552_v24  ;;  %v2389_v1 = vmax.f32 %v2261_v34, 0.0  ;;  %v7183_v57 = vmul.f32 %v7153_v31, %v7129_v37  ;;  %v9508_v37 = vld [vmem:[#allocation43_spill] sm:$0xff] }
 0x209   :  { %9504 = vst [vmem:[#allocation36_spill] sm:$0xff] %v7176_v47  ;;  %5517 = vrsqrt.f32 %v1647_v53  ;;  %v1521_v17 = vmul.f32 0.001953125, %v1393_v26  ;;  %v1077_v38 = vpop.xlane.xlu0 %1076  ;;  %v2265_v10 = vadd.f32 %v2137_v36, %v1860_v0  ;;  %v2136_v16 = vsub.f32 %v7143_v43, %v1987_v46 }
 0x20a   :  { %v1736_v56 = vmul.f32 %v7176_v47, %v7118_v20  ;;  %9505 = vst [vmem:[#allocation35_spill] sm:$0xff] %v7183_v57  ;;  %v7185_v59 = vpop.eup %5513  ;;  %v1616_v48 = vmax.f32 %v1584_v25, 0.0  ;;  %v7187_v3 = vmul.f32 0.001953125, %v1077_v38  ;;  %v2388_v53 = vmax.f32 %v2260_v11, 0.0 }
 0x20b   :  { %9506 = vst [vmem:[#allocation40_spill] sm:$0xff] %v7185_v59  ;;  %v1585_v60 = vsub.f32 %v1521_v17, %v1553_v7  ;;  %v2393_v24 = vmax.f32 %v2265_v10, 0.0  ;;  %v2264_v34 = vadd.f32 %v2136_v16, %v1859_v15  ;;  %v1740_v0 = vmul.f32 %v7185_v59, %v7118_v20 }
 0x20c   :  { %9507 = vst [vmem:[#allocation39_spill] sm:$0xff] %v7187_v3  ;;  %v1082_v62 = vpop.xlane.xlu1 %1081  ;;  %v1735_v26 = vmul.f32 %v7176_v47, %v7121_v28  ;;  %v1648_v36 = vadd.f32 1e-05, %v1616_v48  ;;  %v1864_v57 = vmul.f32 %v1736_v56, %v9508_v37  ;;  %v1554_v7 = vmul.f32 %v7187_v3, %v7187_v3  ;;  %v5443_v48 = vld [vmem:[%s9102_s5 + $0x100] ss:$8 sps:$4 sm:$0xff]  }
 0x20d   :  { %v1617_v46 = vmax.f32 %v1585_v60, 0.0  ;;  %v7193_v31 = vmul.f32 0.001953125, %v1082_v62  ;;  %v1398_v25 = vpop.xlane.xlu0 %1397  ;;  %v2517_v11 = vpack.c.bf16 %v2393_v24, %v2389_v1  ;;  %v2392_v17 = vmax.f32 %v2264_v34, 0.0 }
 0x20e   :  { %v1992_v15 = vmul.f32 %v1736_v56, %v7104_v51  ;;  %5519 = vrsqrt.f32 %v1648_v36  ;;  %v1522_v10 = vmul.f32 0.001953125, %v1398_v25  ;;  %v1868_v16 = vmul.f32 %v1740_v0, %v6359_v63  ;;  %v5448_v56 = vld [vmem:[%s9102_s5 + $0x114] ss:$8 sps:$4 sm:$0xff]  }
 0x20f   :  { %v1649_v38 = vadd.f32 1e-05, %v1617_v46  ;;  %3008 = vmatprep.mubr.bf16.mxu0 %v2517_v11  ;;  %v2516_v37 = vpack.c.bf16 %v2392_v17, %v2388_v53  ;;  %v1996_v62 = vmul.f32 %v1740_v0, %v7106_v39  ;;  %v1739_v1 = vmul.f32 %v7185_v59, %v7121_v28  ;;  %v9509_v25 = vld [vmem:[#allocation42_spill] sm:$0xff] }
 0x210   :  { %v1403_v60 = vpop.xlane.xlu1 %1402  ;;  %v2141_v47 = vsub.f32 %v7138_v27, %v1992_v15  ;;  %v7210_v24 = vpop.eup %5515  ;;  %v1586_v63 = vsub.f32 %v1522_v10, %v1554_v7  ;;  %v1555_v34 = vmul.f32 %v7193_v31, %v7193_v31  ;;  %v1863_v11 = vmul.f32 %v1735_v26, %v9509_v25 }
 0x211   :  { %5521 = vrsqrt.f32 %v1649_v38  ;;  %v1523_v36 = vmul.f32 0.001953125, %v1403_v60  ;;  %3009 = vmatmul.mubr.bf16.vlgmr.msra.gmra.mrb[32].mxu0 %v2516_v37  ;;  %v1087_v53 = vpop.xlane.xlu0 %1086  ;;  %v2145_v0 = vsub.f32 %v7138_v27, %v1996_v62  ;;  %v1991_v17 = vmul.f32 %v1735_v26, %v7104_v51  ;;  %v5446_v38 = vld [vmem:[%s9102_s5 + $0x110] ss:$8 sps:$4 sm:$0xff]   ;;  %v5451_v62 = vld [vmem:[%s9102_s5 + $0x124] ss:$8 sps:$4 sm:$0xff]  }
 0x212   :  { %v2269_v46 = vadd.f32 %v2141_v47, %v1864_v57  ;;  %v1618_v59 = vmax.f32 %v1586_v63, 0.0  ;;  %v7219_v41 = vmul.f32 0.001953125, %v1087_v53  ;;  %v1995_v7 = vmul.f32 %v1739_v1, %v7106_v39  ;;  %3170 = vmatpush1.bf16.msra.mxu0 %v5443_v48  ;;  %v9511_v57 = vld [vmem:[#allocation46_spill] sm:$0xff] }
 0x213   :  { %v7217_v15 = vpop.eup %5517  ;;  %v1587_v2 = vsub.f32 %v1523_v36, %v1555_v34  ;;  %v2273_v60 = vadd.f32 %v2145_v0, %v1868_v16  ;;  %v1867_v37 = vmul.f32 %v1739_v1, %v9511_v57  ;;  %v2140_v26 = vsub.f32 %v7143_v43, %v1991_v17  ;;  %3171 = vmatprep.subr.bf16.mxu0 %v5448_v56  ;;  %v5454_v57 = vld [vmem:[%s9102_s5 + $0x134] ss:$8 sps:$4 sm:$0xff]  }
 0x214   :  { %9510 = vst [vmem:[#allocation43_spill] sm:$0xff] %v7217_v15  ;;  %v1092_v10 = vpop.xlane.xlu1 %1091  ;;  %v2397_v47 = vmax.f32 %v2269_v46, 0.0  ;;  %v1650_v63 = vadd.f32 1e-05, %v1618_v59  ;;  %v1744_v48 = vmul.f32 %v7210_v24, %v7118_v20  ;;  %v2144_v16 = vsub.f32 %v7143_v43, %v1995_v7 }
 0x215   :  { %v1619_v34 = vmax.f32 %v1587_v2, 0.0  ;;  %v7230_v36 = vmul.f32 0.001953125, %v1092_v10  ;;  %v1408_v53 = vpop.xlane.xlu0 %1407  ;;  %v2401_v25 = vmax.f32 %v2273_v60, 0.0  ;;  %v2268_v0 = vadd.f32 %v2140_v26, %v1863_v11  ;;  %v5449_v2 = vld [vmem:[%s9102_s5 + $0x120] ss:$8 sps:$4 sm:$0xff]  }
 0x216   :  { %v1748_v1 = vmul.f32 %v7217_v15, %v7118_v20  ;;  %5523 = vrsqrt.f32 %v1650_v63  ;;  %v1556_v46 = vmul.f32 %v7219_v41, %v7219_v41  ;;  %v1524_v59 = vmul.f32 0.001953125, %v1408_v53  ;;  %3172 = vmatpush1.bf16.msra.mxu0 %v5446_v38 }
 0x217   :  { %v1651_v56 = vadd.f32 1e-05, %v1619_v34  ;;  %v1557_v17 = vmul.f32 %v7230_v36, %v7230_v36  ;;  %v2521_v7 = vpack.c.bf16 %v2401_v25, %v2397_v47  ;;  %v2272_v11 = vadd.f32 %v2144_v16, %v1867_v37  ;;  %3173 = vmatprep.subr.bf16.mxu0 %v5451_v62 }
 0x218   :  { %v1413_v10 = vpop.xlane.xlu1 %1412  ;;  %v2396_v60 = vmax.f32 %v2268_v0, 0.0  ;;  %v7247_v26 = vpop.eup %5519  ;;  %v1588_v38 = vsub.f32 %v1524_v59, %v1556_v46  ;;  %v1872_v34 = vmul.f32 %v1744_v48, %v6408_v35  ;;  %v2000_v51 = vmul.f32 %v1744_v48, %v7115_v40  ;;  %v5452_v35 = vld [vmem:[%s9102_s5 + $0x130] ss:$8 sps:$4 sm:$0xff]  }
 0x219   :  { %9512 = vst [vmem:[#allocation42_spill] sm:$0xff] %v7247_v26  ;;  %5525 = vrsqrt.f32 %v1651_v56  ;;  %v1525_v63 = vmul.f32 0.001953125, %v1413_v10  ;;  %3018 = vmatprep.mubr.bf16.mxu0 %v2521_v7  ;;  %v2400_v53 = vmax.f32 %v2272_v11, 0.0  ;;  %v1097_v39 = vpop.xlane.xlu0 %1096  ;;  %v2004_v47 = vmul.f32 %v1748_v1, %v7123_v6 }
 0x21a   :  { %v1743_v37 = vmul.f32 %v7210_v24, %v7121_v28  ;;  %v1620_v25 = vmax.f32 %v1588_v38, 0.0  ;;  %v7256_v0 = vmul.f32 0.001953125, %v1097_v39  ;;  %v1747_v56 = vmul.f32 %v7217_v15, %v7121_v28  ;;  %3174 = vmatpush1.bf16.msra.mxu0 %v5449_v2  ;;  %v5457_v39 = vld [vmem:[%s9102_s5 + $0x144] ss:$8 sps:$4 sm:$0xff]  }
 0x21b   :  { %v7254_v62 = vpop.eup %5521  ;;  %v1589_v16 = vsub.f32 %v1525_v63, %v1557_v17  ;;  %v2520_v48 = vpack.c.bf16 %v2400_v53, %v2396_v60  ;;  %v1876_v59 = vmul.f32 %v1748_v1, %v6426_v30  ;;  %v2149_v10 = vsub.f32 %v7138_v27, %v2000_v51  ;;  %3175 = vmatprep.subr.bf16.mxu0 %v5454_v57 }
 0x21c   :  { %9513 = vst [vmem:[#allocation46_spill] sm:$0xff] %v7254_v62  ;;  %v1102_v46 = vpop.xlane.xlu1 %1101  ;;  %v2153_v7 = vsub.f32 %v7138_v27, %v2004_v47  ;;  %v1652_v17 = vadd.f32 1e-05, %v1620_v25  ;;  %v1871_v38 = vmul.f32 %v1743_v37, %v6404_v14  ;;  %v1558_v60 = vmul.f32 %v7256_v0, %v7256_v0  ;;  %v9514_v47 = vld [vmem:[#allocation51_spill] sm:$0xff] }
 0x21d   :  { %v1621_v11 = vmax.f32 %v1589_v16, 0.0  ;;  %v7269_v2 = vmul.f32 0.001953125, %v1102_v46  ;;  %3019 = vmatmul.mubr.bf16.gmra.mrb[36].mxu0 %v2520_v48  ;;  %v1418_v30 = vpop.xlane.xlu0 %1417  ;;  %v2277_v1 = vadd.f32 %v2149_v10, %v1872_v34  ;;  %v1999_v63 = vmul.f32 %v1743_v37, %v7115_v40  ;;  %v5455_v25 = vld [vmem:[%s9102_s5 + $0x140] ss:$8 sps:$4 sm:$0xff]   ;;  %v5460_v37 = vld [vmem:[%s9102_s5 + $0x154] ss:$8 sps:$4 sm:$0xff]  }
 0x21e   :  { %v2281_v51 = vadd.f32 %v2153_v7, %v1876_v59  ;;  %5527 = vrsqrt.f32 %v1652_v17  ;;  %v1526_v53 = vmul.f32 0.001953125, %v1418_v30  ;;  %v1875_v15 = vmul.f32 %v1747_v56, %v9514_v47  ;;  %3176 = vmatpush1.bf16.msra.mxu0 %v5452_v35  ;;  %v5458_v47 = vld [vmem:[%s9102_s5 + $0x150] ss:$8 sps:$4 sm:$0xff]  }
 0x21f   :  { %v1653_v57 = vadd.f32 1e-05, %v1621_v11  ;;  %v2405_v16 = vmax.f32 %v2277_v1, 0.0  ;;  %v2003_v46 = vmul.f32 %v1747_v56, %v7123_v6  ;;  %v2148_v34 = vsub.f32 %v7143_v43, %v1999_v63  ;;  %3177 = vmatprep.subr.bf16.mxu0 %v5457_v39 }
 0x220   :  { %v1423_v14 = vpop.xlane.xlu1 %1422  ;;  %v2409_v48 = vmax.f32 %v2281_v51, 0.0  ;;  %v7284_v59 = vpop.eup %5523  ;;  %v1590_v10 = vsub.f32 %v1526_v53, %v1558_v60  ;;  %v1559_v35 = vmul.f32 %v7269_v2, %v7269_v2  ;;  %v1752_v17 = vmul.f32 %v7247_v26, %v7118_v20 }
 0x221   :  { %v1527_v7 = vmul.f32 0.001953125, %v1423_v14  ;;  %v2152_v56 = vsub.f32 %v7143_v43, %v2003_v46  ;;  %v2276_v30 = vadd.f32 %v2148_v34, %v1871_v38  ;;  %v1107_v1 = vpop.xlane.xlu0 %1106  ;;  %v1756_v39 = vmul.f32 %v7254_v62, %v7118_v20 }
 0x222   :  { %v2525_v11 = vpack.c.bf16 %v2409_v48, %v2405_v16  ;;  %5529 = vrsqrt.f32 %v1653_v57  ;;  %v1622_v63 = vmax.f32 %v1590_v10, 0.0  ;;  %v7295_v53 = vmul.f32 0.001953125, %v1107_v1  ;;  %3178 = vmatpush1.bf16.msra.mxu0 %v5455_v25  ;;  %v5463_v57 = vld [vmem:[%s9102_s5 + $0x164] ss:$8 sps:$4 sm:$0xff]  }
 0x223   :  { %v7293_v51 = vpop.eup %5525  ;;  %v1591_v60 = vsub.f32 %v1527_v7, %v1559_v35  ;;  %v2280_v14 = vadd.f32 %v2152_v56, %v1875_v15  ;;  %v2404_v16 = vmax.f32 %v2276_v30, 0.0  ;;  %v1880_v48 = vmul.f32 %v1752_v17, %v6463_v55  ;;  %3179 = vmatprep.subr.bf16.mxu0 %v5460_v37 }
 0x224   :  { %3028 = vmatprep.mubr.bf16.mxu0 %v2525_v11  ;;  %v1112_v38 = vpop.xlane.xlu1 %1111  ;;  %v2008_v46 = vmul.f32 %v1752_v17, %v7155_v45  ;;  %v1654_v34 = vadd.f32 1e-05, %v1622_v63  ;;  %v1884_v35 = vmul.f32 %v1756_v39, %v6481_v58  ;;  %v2012_v15 = vmul.f32 %v1756_v39, %v7164_v4  ;;  %v5461_v58 = vld [vmem:[%s9102_s5 + $0x160] ss:$8 sps:$4 sm:$0xff]  }
 0x225   :  { %v1623_v10 = vmax.f32 %v1591_v60, 0.0  ;;  %v7305_v25 = vmul.f32 0.001953125, %v1112_v38  ;;  %v2408_v7 = vmax.f32 %v2280_v14, 0.0  ;;  %v1428_v11 = vpop.xlane.xlu0 %1427  ;;  %v1751_v55 = vmul.f32 %v7247_v26, %v7121_v28  ;;  %v5466_v38 = vld [vmem:[%s9102_s5 + $0x174] ss:$8 sps:$4 sm:$0xff]  }
 0x226   :  { %v2157_v56 = vsub.f32 %v7138_v27, %v2008_v46  ;;  %5531 = vrsqrt.f32 %v1654_v34  ;;  %v1560_v17 = vmul.f32 %v7295_v53, %v7295_v53  ;;  %v1528_v30 = vmul.f32 0.001953125, %v1428_v11  ;;  %3180 = vmatpush1.bf16.msra.mxu0 %v5458_v47 }
 0x227   :  { %v1655_v37 = vadd.f32 1e-05, %v1623_v10  ;;  %v2524_v1 = vpack.c.bf16 %v2408_v7, %v2404_v16  ;;  %v2161_v39 = vsub.f32 %v7138_v27, %v2012_v15  ;;  %v1755_v14 = vmul.f32 %v7254_v62, %v7121_v28  ;;  %3181 = vmatprep.subr.bf16.mxu0 %v5463_v57 }
 0x228   :  { %v1433_v63 = vpop.xlane.xlu1 %1432  ;;  %v2285_v60 = vadd.f32 %v2157_v56, %v1880_v48  ;;  %v7323_v46 = vpop.eup %5527  ;;  %v1592_v47 = vsub.f32 %v1528_v30, %v1560_v17  ;;  %v1561_v34 = vmul.f32 %v7305_v25, %v7305_v25  ;;  %v1879_v16 = vmul.f32 %v1751_v55, %v6459_v61  ;;  %v5464_v17 = vld [vmem:[%s9102_s5 + $0x170] ss:$8 sps:$4 sm:$0xff]  }
 0x229   :  { %v1529_v10 = vmul.f32 0.001953125, %v1433_v63  ;;  %3029 = vmatmul.mubr.bf16.gmra.mrb[40].mxu0 %v2524_v1  ;;  %v2289_v7 = vadd.f32 %v2161_v39, %v1884_v35  ;;  %v1883_v11 = vmul.f32 %v1755_v14, %v6477_v18  ;;  %v2007_v57 = vmul.f32 %v1751_v55, %v7155_v45  ;;  %v1117_v15 = vpop.xlane.xlu0 %1116  ;;  %v5469_v1 = vld [vmem:[%s9102_s5 + $0x184] ss:$8 sps:$4 sm:$0xff]  }
 0x22a   :  { %v2413_v48 = vmax.f32 %v2285_v60, 0.0  ;;  %v1624_v56 = vmax.f32 %v1592_v47, 0.0  ;;  %v2011_v26 = vmul.f32 %v1755_v14, %v7164_v4  ;;  %v7331_v40 = vmul.f32 0.001953125, %v1117_v15  ;;  %3182 = vmatpush1.bf16.msra.mxu0 %v5461_v58 }
 0x22b   :  { %v1593_v62 = vsub.f32 %v1529_v10, %v1561_v34  ;;  %v2417_v61 = vmax.f32 %v2289_v7, 0.0  ;;  %v2156_v35 = vsub.f32 %v7143_v43, %v2007_v57  ;;  %v1760_v18 = vmul.f32 %v7284_v59, %v7118_v20  ;;  %3183 = vmatprep.subr.bf16.mxu0 %v5466_v38 }
 0x22c   :  { %9515 = vst [vmem:[#allocation51_spill] sm:$0xff] %v7331_v40  ;;  %v1122_v30 = vpop.xlane.xlu1 %1121  ;;  %v1764_v55 = vmul.f32 %v7293_v51, %v7118_v20  ;;  %v7344_v58 = vpop.eup %5529  ;;  %v1656_v63 = vadd.f32 1e-05, %v1624_v56  ;;  %v2160_v60 = vsub.f32 %v7143_v43, %v2011_v26  ;;  %5533 = vrsqrt.f32 %v1655_v37 }
 0x22d   :  { %v1625_v39 = vmax.f32 %v1593_v62, 0.0  ;;  %v7347_v14 = vmul.f32 0.001953125, %v1122_v30  ;;  %v2529_v47 = vpack.c.bf16 %v2417_v61, %v2413_v48  ;;  %v2284_v34 = vadd.f32 %v2156_v35, %v1879_v16  ;;  %v1438_v7 = vpop.xlane.xlu0 %1437  ;;  %v5467_v62 = vld [vmem:[%s9102_s5 + $0x180] ss:$8 sps:$4 sm:$0xff]  }
 0x22e   :  { %v1562_v10 = vmul.f32 %v7331_v40, %v7331_v40  ;;  %5535 = vrsqrt.f32 %v1656_v63  ;;  %v2288_v38 = vadd.f32 %v2160_v60, %v1883_v11  ;;  %v1530_v57 = vmul.f32 0.001953125, %v1438_v7  ;;  %3184 = vmatpush1.bf16.msra.mxu0 %v5464_v17  ;;  %v5472_v11 = vld [vmem:[%s9102_s5 + $0x194] ss:$8 sps:$4 sm:$0xff]  }
 0x22f   :  { %v1888_v15 = vmul.f32 %v1760_v18, %v6521_v29  ;;  %v1657_v26 = vadd.f32 1e-05, %v1625_v39  ;;  %3038 = vmatprep.mubr.bf16.mxu0 %v2529_v47  ;;  %v2412_v56 = vmax.f32 %v2284_v34, 0.0  ;;  %v1563_v37 = vmul.f32 %v7347_v14, %v7347_v14  ;;  %3185 = vmatprep.subr.bf16.mxu0 %v5469_v1 }
 0x230   :  { %v1443_v16 = vpop.xlane.xlu1 %1442  ;;  %v2016_v48 = vmul.f32 %v1760_v18, %v7187_v3  ;;  %v7361_v29 = vpop.eup %5531  ;;  %v2416_v17 = vmax.f32 %v2288_v38, 0.0  ;;  %v1594_v61 = vsub.f32 %v1530_v57, %v1562_v10  ;;  %v1892_v30 = vmul.f32 %v1764_v55, %v6539_v13  ;;  %v5470_v13 = vld [vmem:[%s9102_s5 + $0x190] ss:$8 sps:$4 sm:$0xff]  }
 0x231   :  { %v1531_v35 = vmul.f32 0.001953125, %v1443_v16  ;;  %v2020_v63 = vmul.f32 %v1764_v55, %v7193_v31  ;;  %v1759_v60 = vmul.f32 %v7284_v59, %v7121_v28  ;;  %v1763_v18 = vmul.f32 %v7293_v51, %v7121_v28  ;;  %v1127_v1 = vpop.xlane.xlu0 %1126 }
 0x232   :  { %v2165_v39 = vsub.f32 %v7138_v27, %v2016_v48  ;;  %v2528_v47 = vpack.c.bf16 %v2416_v17, %v2412_v56  ;;  %v1626_v34 = vmax.f32 %v1594_v61, 0.0  ;;  %v7370_v45 = vmul.f32 0.001953125, %v1127_v1  ;;  %3186 = vmatpush1.bf16.msra.mxu0 %v5467_v62  ;;  %v5475_v56 = vld [vmem:[%s9102_s5 + $0x1a4] ss:$8 sps:$4 sm:$0xff]  }
 0x233   :  { %v1595_v7 = vsub.f32 %v1531_v35, %v1563_v37  ;;  %5537 = vrsqrt.f32 %v1657_v26  ;;  %v2169_v55 = vsub.f32 %v7138_v27, %v2020_v63  ;;  %v1887_v38 = vmul.f32 %v1759_v60, %v6517_v12  ;;  %3187 = vmatprep.subr.bf16.mxu0 %v5472_v11 }
 0x234   :  { %9516 = vst [vmem:[#allocation120_spill] sm:$0xff] %v7370_v45  ;;  %v2293_v10 = vadd.f32 %v2165_v39, %v1888_v15  ;;  %v1132_v57 = vpop.xlane.xlu1 %1131  ;;  %3039 = vmatmul.mubr.bf16.gmra.mrb[44].mxu0 %v2528_v47  ;;  %v1658_v37 = vadd.f32 1e-05, %v1626_v34  ;;  %v2015_v62 = vmul.f32 %v1759_v60, %v7187_v3  ;;  %v2019_v48 = vmul.f32 %v1763_v18, %v7193_v31  ;;  %v5473_v60 = vld [vmem:[%s9102_s5 + $0x1a0] ss:$8 sps:$4 sm:$0xff]  }
 0x235   :  { %v1627_v16 = vmax.f32 %v1595_v7, 0.0  ;;  %v2297_v17 = vadd.f32 %v2169_v55, %v1892_v30  ;;  %v1891_v61 = vmul.f32 %v1763_v18, %v6535_v9  ;;  %v7383_v15 = vmul.f32 0.001953125, %v1132_v57  ;;  %v1448_v12 = vpop.xlane.xlu0 %1447  ;;  %v5478_v34 = vld [vmem:[%s9102_s5 + $0x1b4] ss:$8 sps:$4 sm:$0xff]  }
 0x236   :  { %v2421_v26 = vmax.f32 %v2293_v10, 0.0  ;;  %v2164_v11 = vsub.f32 %v7143_v43, %v2015_v62  ;;  %v2168_v63 = vsub.f32 %v7143_v43, %v2019_v48  ;;  %v1564_v39 = vmul.f32 %v7370_v45, %v7370_v45  ;;  %3188 = vmatpush1.bf16.msra.mxu0 %v5470_v13  ;;  %v7392_v30 = vpop.eup %5533 }
 0x237   :  { %v1659_v35 = vadd.f32 1e-05, %v1627_v16  ;;  %5539 = vrsqrt.f32 %v1658_v37  ;;  %v2425_v9 = vmax.f32 %v2297_v17, 0.0  ;;  %v1532_v18 = vmul.f32 0.001953125, %v1448_v12  ;;  %3189 = vmatprep.subr.bf16.mxu0 %v5475_v56 }
 0x238   :  { %v1453_v1 = vpop.xlane.xlu1 %1452  ;;  %v1768_v47 = vmul.f32 %v7323_v46, %v7118_v20  ;;  %v7399_v7 = vpop.eup %5535  ;;  %v2292_v13 = vadd.f32 %v2164_v11, %v1887_v38  ;;  %v2296_v55 = vadd.f32 %v2168_v63, %v1891_v61  ;;  %v1565_v10 = vmul.f32 %v7383_v15, %v7383_v15  ;;  %v5476_v63 = vld [vmem:[%s9102_s5 + $0x1b0] ss:$8 sps:$4 sm:$0xff]  }
 0x239   :  { %v1533_v57 = vmul.f32 0.001953125, %v1453_v1  ;;  %5541 = vrsqrt.f32 %v1659_v35  ;;  %v2533_v37 = vpack.c.bf16 %v2425_v9, %v2421_v26  ;;  %v1596_v16 = vsub.f32 %v1532_v18, %v1564_v39  ;;  %v1137_v48 = vpop.xlane.xlu0 %1136 }
 0x23a   :  { %v1772_v62 = vmul.f32 %v7344_v58, %v7118_v20  ;;  %v2420_v56 = vmax.f32 %v2292_v13, 0.0  ;;  %v2424_v17 = vmax.f32 %v2296_v55, 0.0  ;;  %v2024_v3 = vmul.f32 %v1768_v47, %v7219_v41  ;;  %3190 = vmatpush1.bf16.msra.mxu0 %v5473_v60 }
 0x23b   :  { %v1597_v12 = vsub.f32 %v1533_v57, %v1565_v10  ;;  %3048 = vmatprep.mubr.bf16.mxu0 %v2533_v37  ;;  %v1628_v38 = vmax.f32 %v1596_v16, 0.0  ;;  %v1896_v61 = vmul.f32 %v1768_v47, %v6585_v19  ;;  %v1767_v26 = vmul.f32 %v7323_v46, %v7121_v28  ;;  %3191 = vmatprep.subr.bf16.mxu0 %v5478_v34  ;;  %v5481_v19 = vld [vmem:[%s9102_s5 + $0x1c4] ss:$8 sps:$4 sm:$0xff]  }
 0x23c   :  { %v2028_v11 = vmul.f32 %v1772_v62, %v7230_v36  ;;  %v1142_v35 = vpop.xlane.xlu1 %1141  ;;  %v2532_v39 = vpack.c.bf16 %v2424_v17, %v2420_v56  ;;  %v2173_v18 = vsub.f32 %v7138_v27, %v2024_v3  ;;  %v1771_v60 = vmul.f32 %v7344_v58, %v7121_v28 }
 0x23d   :  { %v1629_v9 = vmax.f32 %v1597_v12, 0.0  ;;  %v7419_v1 = vpop.eup %5537  ;;  %v1660_v47 = vadd.f32 1e-05, %v1628_v38  ;;  %v1900_v13 = vmul.f32 %v1772_v62, %v6603_v8  ;;  %v2023_v34 = vmul.f32 %v1767_v26, %v7219_v41  ;;  %v1458_v10 = vpop.xlane.xlu0 %1457  ;;  %v5479_v62 = vld [vmem:[%s9102_s5 + $0x1c0] ss:$8 sps:$4 sm:$0xff]  }
 0x23e   :  { %v2177_v55 = vsub.f32 %v7138_v27, %v2028_v11  ;;  %3049 = vmatmul.mubr.bf16.gmra.mrb[48].mxu0 %v2532_v39  ;;  %v2301_v3 = vadd.f32 %v2173_v18, %v1896_v61  ;;  %v1895_v37 = vmul.f32 %v1767_v26, %v6581_v49  ;;  %v2027_v16 = vmul.f32 %v1771_v60, %v7230_v36 }
 0x23f   :  { %v1661_v57 = vadd.f32 1e-05, %v1629_v9  ;;  %v1899_v17 = vmul.f32 %v1771_v60, %v6599_v21  ;;  %v2172_v12 = vsub.f32 %v7143_v43, %v2023_v34  ;;  %v7428_v38 = vmul.f32 0.001953125, %v1137_v48  ;;  %3192 = vmatpush1.bf16.msra.mxu0 %v5476_v63  ;;  %v5484_v21 = vld [vmem:[%s9102_s5 + $0x1d4] ss:$8 sps:$4 sm:$0xff]  }
 0x240   :  { %v2305_v56 = vadd.f32 %v2177_v55, %v1900_v13  ;;  %v1463_v8 = vpop.xlane.xlu1 %1462  ;;  %5543 = vrsqrt.f32 %v1660_v47  ;;  %v2429_v11 = vmax.f32 %v2301_v3, 0.0  ;;  %v2176_v61 = vsub.f32 %v7143_v43, %v2027_v16  ;;  %3193 = vmatprep.subr.bf16.mxu0 %v5481_v19 }
 0x241   :  { %v7434_v49 = vmul.f32 0.001953125, %v1142_v35  ;;  %v7439_v26 = vpop.eup %5539  ;;  %v2300_v39 = vadd.f32 %v2172_v12, %v1895_v37  ;;  %v1566_v63 = vmul.f32 %v7428_v38, %v7428_v38  ;;  %v1534_v9 = vmul.f32 0.001953125, %v1458_v10  ;;  %v1147_v18 = vpop.xlane.xlu0 %1146  ;;  %v5482_v10 = vld [vmem:[%s9102_s5 + $0x1d0] ss:$8 sps:$4 sm:$0xff]  }
 0x242   :  { %9517 = vst [vmem:[#allocation121_spill] sm:$0xff] %v7439_v26  ;;  %v2433_v48 = vmax.f32 %v2305_v56, 0.0  ;;  %v2304_v60 = vadd.f32 %v2176_v61, %v1899_v17  ;;  %v1535_v35 = vmul.f32 0.001953125, %v1463_v8  ;;  %v1776_v19 = vmul.f32 %v7361_v29, %v7118_v20 }
 0x243   :  { %v1567_v47 = vmul.f32 %v7434_v49, %v7434_v49  ;;  %v7447_v13 = vpop.eup %5541  ;;  %5545 = vrsqrt.f32 %v1661_v57  ;;  %v1598_v34 = vsub.f32 %v1534_v9, %v1566_v63  ;;  %v1780_v3 = vmul.f32 %v7392_v30, %v7118_v20  ;;  %3194 = vmatpush1.bf16.msra.mxu0 %v5479_v62  ;;  %v5487_v57 = vld [vmem:[%s9102_s5 + $0x1e4] ss:$8 sps:$4 sm:$0xff]  }
 0x244   :  { %9518 = vst [vmem:[#allocation122_spill] sm:$0xff] %v7447_v13  ;;  %v2537_v55 = vpack.c.bf16 %v2433_v48, %v2429_v11  ;;  %v1152_v37 = vpop.xlane.xlu1 %1151  ;;  %v2428_v16 = vmax.f32 %v2300_v39, 0.0  ;;  %v2432_v56 = vmax.f32 %v2304_v60, 0.0  ;;  %v2032_v12 = vmul.f32 %v1776_v19, %v7256_v0  ;;  %3195 = vmatprep.subr.bf16.mxu0 %v5484_v21 }
 0x245   :  { %v1599_v17 = vsub.f32 %v1535_v35, %v1567_v47  ;;  %v1630_v8 = vmax.f32 %v1598_v34, 0.0  ;;  %v1904_v11 = vmul.f32 %v1776_v19, %v6649_v42  ;;  %v2036_v62 = vmul.f32 %v1780_v3, %v7269_v2  ;;  %v1468_v48 = vpop.xlane.xlu0 %1467 }
 0x246   :  { %3058 = vmatprep.mubr.bf16.mxu0 %v2537_v55  ;;  %v1775_v61 = vmul.f32 %v7361_v29, %v7121_v28  ;;  %v2536_v39 = vpack.c.bf16 %v2432_v56, %v2428_v16  ;;  %v2181_v9 = vsub.f32 %v7138_v27, %v2032_v12  ;;  %v1779_v21 = vmul.f32 %v7392_v30, %v7121_v28  ;;  %v5485_v55 = vld [vmem:[%s9102_s5 + $0x1e0] ss:$8 sps:$4 sm:$0xff]  }
 0x247   :  { %v1631_v63 = vmax.f32 %v1599_v17, 0.0  ;;  %v1662_v60 = vadd.f32 1e-05, %v1630_v8  ;;  %v1908_v47 = vmul.f32 %v1780_v3, %v6667_v52  ;;  %v2185_v35 = vsub.f32 %v7138_v27, %v2036_v62  ;;  %3196 = vmatpush1.bf16.msra.mxu0 %v5482_v10  ;;  %v5490_v52 = vld [vmem:[%s9102_s5 + $0x1f4] ss:$8 sps:$4 sm:$0xff]  }
 0x248   :  { %v2031_v42 = vmul.f32 %v1775_v61, %v7256_v0  ;;  %v1473_v19 = vpop.xlane.xlu1 %1472  ;;  %3059 = vmatmul.mubr.bf16.gmra.mrb[52].mxu0 %v2536_v39  ;;  %v2309_v16 = vadd.f32 %v2181_v9, %v1904_v11  ;;  %v1903_v56 = vmul.f32 %v1775_v61, %v6645_v54  ;;  %v2035_v17 = vmul.f32 %v1779_v21, %v7269_v2 }
 0x249   :  { %v1663_v34 = vadd.f32 1e-05, %v1631_v63  ;;  %3197 = vmatprep.subr.bf16.mxu0 %v5487_v57  ;;  %v2313_v3 = vadd.f32 %v2185_v35, %v1908_v47  ;;  %v1907_v12 = vmul.f32 %v1779_v21, %v6663_v32  ;;  %v7478_v8 = vmul.f32 0.001953125, %v1147_v18  ;;  %v1157_v62 = vpop.xlane.xlu0 %1156  ;;  %v5488_v18 = vld [vmem:[%s9102_s5 + $0x1f0] ss:$8 sps:$4 sm:$0xff]  }
 0x24a   :  { %v2180_v10 = vsub.f32 %v7143_v43, %v2031_v42  ;;  %v7480_v39 = vpop.eup %5543  ;;  %5547 = vrsqrt.f32 %v1662_v60  ;;  %v2437_v11 = vmax.f32 %v2309_v16, 0.0  ;;  %v2184_v54 = vsub.f32 %v7143_v43, %v2035_v17 }
 0x24b   :  { %9519 = vst [vmem:[#allocation123_spill] sm:$0xff] %v7478_v8  ;;  %9520 = vst [vmem:[#allocation124_spill] sm:$0xff] %v7480_v39  ;;  %v7483_v61 = vmul.f32 0.001953125, %v1152_v37  ;;  %v2441_v57 = vmax.f32 %v2313_v3, 0.0  ;;  %v1568_v9 = vmul.f32 %v7478_v8, %v7478_v8  ;;  %v1536_v47 = vmul.f32 0.001953125, %v1468_v48  ;;  %3198 = vmatpush1.bf16.msra.mxu0 %v5485_v55 }
 0x24c   :  { %v2308_v63 = vadd.f32 %v2180_v10, %v1903_v56  ;;  %v1162_v32 = vpop.xlane.xlu1 %1161  ;;  %v2312_v21 = vadd.f32 %v2184_v54, %v1907_v12  ;;  %v1537_v35 = vmul.f32 0.001953125, %v1473_v19  ;;  %v1784_v37 = vmul.f32 %v7399_v7, %v7118_v20  ;;  %3199 = vmatprep.subr.bf16.mxu0 %v5490_v52 }
 0x24d   :  { %v1569_v60 = vmul.f32 %v7483_v61, %v7483_v61  ;;  %v7494_v42 = vpop.eup %5545  ;;  %5549 = vrsqrt.f32 %v1663_v34  ;;  %v2541_v16 = vpack.c.bf16 %v2441_v57, %v2437_v11  ;;  %v1600_v48 = vsub.f32 %v1536_v47, %v1568_v9  ;;  %v1478_v56 = vpop.xlane.xlu0 %1477 }
 0x24e   :  { %9521 = vst [vmem:[#allocation125_spill] sm:$0xff] %v7494_v42  ;;  %v1788_v55 = vmul.f32 %v7419_v1, %v7118_v20  ;;  %v2436_v17 = vmax.f32 %v2308_v63, 0.0  ;;  %v2440_v3 = vmax.f32 %v2312_v21, 0.0  ;;  %v2040_v10 = vmul.f32 %v1784_v37, %v7295_v53 }
 0x24f   :  { %v1601_v12 = vsub.f32 %v1537_v35, %v1569_v60  ;;  %3068 = vmatprep.mubr.bf16.mxu0 %v2541_v16  ;;  %v1632_v19 = vmax.f32 %v1600_v48, 0.0  ;;  %v1912_v54 = vmul.f32 %v1784_v37, %v6723_v5  ;;  %v1783_v34 = vmul.f32 %v7399_v7, %v7121_v28  ;;  %3200 = vmatpush1.bf16.msra.mxu0 %v5488_v18 }
 0x250   :  { %v2044_v52 = vmul.f32 %v1788_v55, %v7305_v25  ;;  %v1483_v11 = vpop.xlane.xlu1 %1482  ;;  %v2540_v57 = vpack.c.bf16 %v2440_v3, %v2436_v17  ;;  %v2189_v47 = vsub.f32 %v7138_v27, %v2040_v10  ;;  %v1787_v63 = vmul.f32 %v7419_v1, %v7121_v28 }
 0x251   :  { %v1633_v9 = vmax.f32 %v1601_v12, 0.0  ;;  %v1664_v21 = vadd.f32 1e-05, %v1632_v19  ;;  %v1916_v60 = vmul.f32 %v1788_v55, %v6756_v33  ;;  %v2039_v5 = vmul.f32 %v1783_v34, %v7295_v53  ;;  %v1167_v17 = vpop.xlane.xlu0 %1166 }
 0x252   :  { %v2193_v35 = vsub.f32 %v7138_v27, %v2044_v52  ;;  %3069 = vmatmul.mubr.bf16.gmra.mrb[56].mxu0 %v2540_v57  ;;  %v2317_v16 = vadd.f32 %v2189_v47, %v1912_v54  ;;  %v1911_v48 = vmul.f32 %v1783_v34, %v6709_v22  ;;  %v2043_v18 = vmul.f32 %v1787_v63, %v7305_v25 }
 0x253   :  { %v1665_v37 = vadd.f32 1e-05, %v1633_v9  ;;  %v1915_v12 = vmul.f32 %v1787_v63, %v6738_v23  ;;  %v2188_v10 = vsub.f32 %v7143_v43, %v2039_v5  ;;  %v7513_v19 = vmul.f32 0.001953125, %v1157_v62 }
 0x254   :  { %v2321_v3 = vadd.f32 %v2193_v35, %v1916_v60  ;;  %v1172_v33 = vpop.xlane.xlu1 %1171  ;;  %v7515_v55 = vpop.eup %5547  ;;  %5551 = vrsqrt.f32 %v1664_v21  ;;  %v2445_v52 = vmax.f32 %v2317_v16, 0.0  ;;  %v2192_v57 = vsub.f32 %v7143_v43, %v2043_v18 }
 0x255   :  { %9522 = vst [vmem:[#allocation126_spill] sm:$0xff] %v7513_v19  ;;  %9523 = vst [vmem:[#allocation127_spill] sm:$0xff] %v7515_v55  ;;  %v7518_v54 = vmul.f32 0.001953125, %v1162_v32  ;;  %v2316_v34 = vadd.f32 %v2188_v10, %v1911_v48  ;;  %v1570_v9 = vmul.f32 %v7513_v19, %v7513_v19  ;;  %v1538_v47 = vmul.f32 0.001953125, %v1478_v56 }
 0x256   :  { %v2449_v22 = vmax.f32 %v2321_v3, 0.0  ;;  %v2320_v23 = vadd.f32 %v2192_v57, %v1915_v12  ;;  %v1539_v63 = vmul.f32 0.001953125, %v1483_v11  ;;  %v1792_v60 = vmul.f32 %v7439_v26, %v7118_v20  ;;  %v1488_v3 = vpop.xlane.xlu0 %1487 }
 0x257   :  { %9524 = vst [vmem:[#allocation128_spill] sm:$0xff] %v7518_v54  ;;  %v1571_v62 = vmul.f32 %v7518_v54, %v7518_v54  ;;  %v7526_v21 = vpop.eup %5549  ;;  %5553 = vrsqrt.f32 %v1665_v37  ;;  %v1602_v32 = vsub.f32 %v1538_v47, %v1570_v9  ;;  %v1796_v5 = vmul.f32 %v7447_v13, %v7118_v20 }
 0x258   :  { %9525 = vst [vmem:[#allocation129_spill] sm:$0xff] %v7526_v21  ;;  %v2545_v35 = vpack.c.bf16 %v2449_v22, %v2445_v52  ;;  %v2444_v16 = vmax.f32 %v2316_v34, 0.0  ;;  %v2448_v48 = vmax.f32 %v2320_v23, 0.0  ;;  %v2048_v56 = vmul.f32 %v1792_v60, %v7331_v40  ;;  %v1493_v52 = vpop.xlane.xlu1 %1492 }
 0x259   :  { %v1603_v18 = vsub.f32 %v1539_v63, %v1571_v62  ;;  %v1634_v12 = vmax.f32 %v1602_v32, 0.0  ;;  %v1920_v11 = vmul.f32 %v1792_v60, %v6127_v44  ;;  %v2052_v10 = vmul.f32 %v1796_v5, %v7347_v14 }
 0x25a   :  { %3078 = vmatprep.mubr.bf16.mxu0 %v2545_v35  ;;  %v1791_v37 = vmul.f32 %v7439_v26, %v7121_v28  ;;  %v2544_v57 = vpack.c.bf16 %v2448_v48, %v2444_v16  ;;  %v2197_v9 = vsub.f32 %v7138_v27, %v2048_v56  ;;  %v1795_v34 = vmul.f32 %v7447_v13, %v7121_v28  ;;  %v9526_v35 = vld [vmem:[#allocation6_spill] sm:$0xff] }
 0x25b   :  { %v1635_v22 = vmax.f32 %v1603_v18, 0.0  ;;  %v1666_v47 = vadd.f32 1e-05, %v1634_v12  ;;  %v1924_v23 = vmul.f32 %v1796_v5, %v6137_v50  ;;  %v2201_v62 = vsub.f32 %v7138_v27, %v2052_v10  ;;  %v9527_v18 = vld [vmem:[#allocation7_spill] sm:$0xff] }
 0x25c   :  { %v2047_v44 = vmul.f32 %v1791_v37, %v7331_v40  ;;  %3079 = vmatmul.mubr.bf16.gmra.mrb[60].mxu0 %v2544_v57  ;;  %v2325_v60 = vadd.f32 %v2197_v9, %v1920_v11  ;;  %v1919_v32 = vmul.f32 %v1791_v37, %v9526_v35  ;;  %v2051_v16 = vmul.f32 %v1795_v34, %v7347_v14  ;;  %v1177_v11 = vpop.xlane.xlu0 %1176 }
 0x25d   :  { %v1667_v63 = vadd.f32 1e-05, %v1635_v22  ;;  %v2329_v48 = vadd.f32 %v2201_v62, %v1924_v23  ;;  %v1923_v56 = vmul.f32 %v1795_v34, %v9527_v18  ;;  %v7545_v13 = vmul.f32 0.001953125, %v1167_v17  ;;  %v1182_v34 = vpop.xlane.xlu1 %1181  ;;  %v9529_v18 = vld [vmem:[#allocation9_spill] sm:$0xff] }
 0x25e   :  { %v2196_v26 = vsub.f32 %v7143_v43, %v2047_v44  ;;  %v7547_v12 = vpop.eup %5551  ;;  %5555 = vrsqrt.f32 %v1666_v47  ;;  %v2453_v50 = vmax.f32 %v2325_v60, 0.0  ;;  %v2200_v5 = vsub.f32 %v7143_v43, %v2051_v16 }
 0x25f   :  { %9528 = vst [vmem:[#allocation6_spill] sm:$0xff] %v7545_v13  ;;  %v7550_v10 = vmul.f32 0.001953125, %v1172_v33  ;;  %v2457_v57 = vmax.f32 %v2329_v48, 0.0  ;;  %v1572_v22 = vmul.f32 %v7545_v13, %v7545_v13  ;;  %v1540_v9 = vmul.f32 0.001953125, %v1488_v3 }
 0x260   :  { %v2324_v37 = vadd.f32 %v2196_v26, %v1919_v32  ;;  %v2328_v23 = vadd.f32 %v2200_v5, %v1923_v56  ;;  %v1541_v62 = vmul.f32 0.001953125, %v1493_v52  ;;  %v1800_v47 = vmul.f32 %v7480_v39, %v7118_v20 }
 0x261   :  { %v1573_v17 = vmul.f32 %v7550_v10, %v7550_v10  ;;  %v7558_v44 = vpop.eup %5553  ;;  %5557 = vrsqrt.f32 %v1667_v63  ;;  %v2549_v33 = vpack.c.bf16 %v2457_v57, %v2453_v50  ;;  %v1604_v60 = vsub.f32 %v1540_v9, %v1572_v22  ;;  %v1498_v22 = vpop.xlane.xlu0 %1497 }
 0x262   :  { %v1804_v26 = vmul.f32 %v7494_v42, %v7118_v20  ;;  %v2452_v35 = vmax.f32 %v2324_v37, 0.0  ;;  %v2456_v32 = vmax.f32 %v2328_v23, 0.0  ;;  %v2056_v16 = vmul.f32 %v1800_v47, %v7370_v45  ;;  %v9530_v23 = vld [vmem:[#allocation11_spill] sm:$0xff] }
 0x263   :  { %v1605_v3 = vsub.f32 %v1541_v62, %v1573_v17  ;;  %3088 = vmatprep.mubr.bf16.mxu0 %v2549_v33  ;;  %v1636_v48 = vmax.f32 %v1604_v60, 0.0  ;;  %v1928_v52 = vmul.f32 %v1800_v47, %v9529_v18  ;;  %v1799_v5 = vmul.f32 %v7480_v39, %v7121_v28  ;;  %v1503_v33 = vpop.xlane.xlu1 %1502  ;;  %v9531_v39 = vld [vmem:[#allocation8_spill] sm:$0xff] }
 0x264   :  { %v2060_v56 = vmul.f32 %v1804_v26, %v7383_v15  ;;  %v2548_v63 = vpack.c.bf16 %v2456_v32, %v2452_v35  ;;  %v2205_v57 = vsub.f32 %v7138_v27, %v2056_v16  ;;  %v1803_v37 = vmul.f32 %v7494_v42, %v7121_v28  ;;  %v9532_v16 = vld [vmem:[#allocation10_spill] sm:$0xff] }
 0x265   :  { %v1637_v50 = vmax.f32 %v1605_v3, 0.0  ;;  %v1668_v9 = vadd.f32 1e-05, %v1636_v48  ;;  %v1932_v17 = vmul.f32 %v1804_v26, %v9530_v23  ;;  %v2055_v47 = vmul.f32 %v1799_v5, %v7370_v45 }
 0x266   :  { %v2209_v62 = vsub.f32 %v7138_v27, %v2060_v56  ;;  %3089 = vmatmul.mubr.bf16.gmra.mrb[64].mxu0 %v2548_v63  ;;  %v2333_v18 = vadd.f32 %v2205_v57, %v1928_v52  ;;  %v1927_v35 = vmul.f32 %v1799_v5, %v9531_v39  ;;  %v2059_v32 = vmul.f32 %v1803_v37, %v7383_v15 }
 0x267   :  { %v1669_v60 = vadd.f32 1e-05, %v1637_v50  ;;  %v1931_v40 = vmul.f32 %v1803_v37, %v9532_v16  ;;  %v2204_v42 = vsub.f32 %v7143_v43, %v2055_v47  ;;  %v7577_v48 = vmul.f32 0.001953125, %v1177_v11 }
 0x268   :  { %v2337_v3 = vadd.f32 %v2209_v62, %v1932_v17  ;;  %v7579_v26 = vpop.eup %5555  ;;  %5559 = vrsqrt.f32 %v1668_v9  ;;  %v2461_v56 = vmax.f32 %v2333_v18, 0.0  ;;  %v2208_v23 = vsub.f32 %v7143_v43, %v2059_v32  ;;  %v1187_v9 = vpop.xlane.xlu0 %1186 }
 0x269   :  { %9533 = vst [vmem:[#allocation7_spill] sm:$0xff] %v7577_v48  ;;  %9534 = vst [vmem:[#allocation9_spill] sm:$0xff] %v7579_v26  ;;  %v7582_v63 = vmul.f32 0.001953125, %v1182_v34  ;;  %v2332_v50 = vadd.f32 %v2204_v42, %v1927_v35  ;;  %v1574_v39 = vmul.f32 %v7577_v48, %v7577_v48  ;;  %v1542_v5 = vmul.f32 0.001953125, %v1498_v22  ;;  %v1192_v18 = vpop.xlane.xlu1 %1191 }
 0x26a   :  { %v2465_v52 = vmax.f32 %v2337_v3, 0.0  ;;  %v2336_v57 = vadd.f32 %v2208_v23, %v1931_v40  ;;  %v1543_v11 = vmul.f32 0.001953125, %v1503_v33  ;;  %v1808_v17 = vmul.f32 %v7515_v55, %v7118_v20  ;;  %v9536_v3 = vld [vmem:[#allocation13_spill] sm:$0xff] }
 0x26b   :  { %9535 = vst [vmem:[#allocation11_spill] sm:$0xff] %v7582_v63  ;;  %v1575_v37 = vmul.f32 %v7582_v63, %v7582_v63  ;;  %v7590_v62 = vpop.eup %5557  ;;  %5561 = vrsqrt.f32 %v1669_v60  ;;  %v1606_v47 = vsub.f32 %v1542_v5, %v1574_v39  ;;  %v1812_v42 = vmul.f32 %v7526_v21, %v7118_v20 }
 0x26c   :  { %v2553_v34 = vpack.c.bf16 %v2465_v52, %v2461_v56  ;;  %v2460_v35 = vmax.f32 %v2332_v50, 0.0  ;;  %v2464_v22 = vmax.f32 %v2336_v57, 0.0  ;;  %v2064_v32 = vmul.f32 %v1808_v17, %v7428_v38  ;;  %v9537_v57 = vld [vmem:[#allocation15_spill] sm:$0xff] }
 0x26d   :  { %v1607_v40 = vsub.f32 %v1543_v11, %v1575_v37  ;;  %v1638_v33 = vmax.f32 %v1606_v47, 0.0  ;;  %v1936_v16 = vmul.f32 %v1808_v17, %v9536_v3  ;;  %v2068_v23 = vmul.f32 %v1812_v42, %v7434_v49  ;;  %v9538_v3 = vld [vmem:[#allocation12_spill] sm:$0xff] }
 0x26e   :  { %3098 = vmatprep.mubr.bf16.mxu0 %v2553_v34  ;;  %v1807_v60 = vmul.f32 %v7515_v55, %v7121_v28  ;;  %v2552_v56 = vpack.c.bf16 %v2464_v22, %v2460_v35  ;;  %v2213_v39 = vsub.f32 %v7138_v27, %v2064_v32  ;;  %v1811_v50 = vmul.f32 %v7526_v21, %v7121_v28  ;;  %v1508_v22 = vpop.xlane.xlu0 %1507  ;;  %v9539_v32 = vld [vmem:[#allocation14_spill] sm:$0xff] }
 0x26f   :  { %v1639_v52 = vmax.f32 %v1607_v40, 0.0  ;;  %v1670_v5 = vadd.f32 1e-05, %v1638_v33  ;;  %v1940_v37 = vmul.f32 %v1812_v42, %v9537_v57  ;;  %v2217_v11 = vsub.f32 %v7138_v27, %v2068_v23  ;;  %v1513_v42 = vpop.xlane.xlu1 %1512 }
 0x270   :  { %v2063_v34 = vmul.f32 %v1807_v60, %v7428_v38  ;;  %3099 = vmatmul.mubr.bf16.gmra.mrb[68].mxu0 %v2552_v56  ;;  %v2341_v47 = vadd.f32 %v2213_v39, %v1936_v16  ;;  %v1935_v45 = vmul.f32 %v1807_v60, %v9538_v3  ;;  %v2067_v35 = vmul.f32 %v1811_v50, %v7434_v49 }
 0x271   :  { %v1671_v17 = vadd.f32 1e-05, %v1639_v52  ;;  %v2345_v40 = vadd.f32 %v2217_v11, %v1940_v37  ;;  %v1939_v55 = vmul.f32 %v1811_v50, %v9539_v32  ;;  %v7609_v33 = vmul.f32 0.001953125, %v1187_v9 }
 0x272   :  { %v2212_v21 = vsub.f32 %v7143_v43, %v2063_v34  ;;  %v7611_v57 = vpop.eup %5559  ;;  %5563 = vrsqrt.f32 %v1670_v5  ;;  %v2469_v23 = vmax.f32 %v2341_v47, 0.0  ;;  %v2216_v56 = vsub.f32 %v7143_v43, %v2067_v35 }
 0x273   :  { %9540 = vst [vmem:[#allocation8_spill] sm:$0xff] %v7609_v33  ;;  %9541 = vst [vmem:[#allocation10_spill] sm:$0xff] %v7611_v57  ;;  %v7614_v16 = vmul.f32 0.001953125, %v1192_v18  ;;  %v2473_v60 = vmax.f32 %v2345_v40, 0.0  ;;  %v1576_v39 = vmul.f32 %v7609_v33, %v7609_v33  ;;  %v1544_v37 = vmul.f32 0.001953125, %v1508_v22  ;;  %v9544_v40 = vld [vmem:[#allocation17_spill] sm:$0xff] }
 0x274   :  { %v2340_v52 = vadd.f32 %v2212_v21, %v1935_v45  ;;  %v2344_v50 = vadd.f32 %v2216_v56, %v1939_v55  ;;  %v1545_v11 = vmul.f32 0.001953125, %v1513_v42  ;;  %v1816_v34 = vmul.f32 %v7547_v12, %v7118_v20 }
 0x275   :  { %9542 = vst [vmem:[#allocation13_spill] sm:$0xff] %v7614_v16  ;;  %v1577_v9 = vmul.f32 %v7614_v16, %v7614_v16  ;;  %v7622_v5 = vpop.eup %5561  ;;  %5565 = vrsqrt.f32 %v1671_v17  ;;  %v2557_v47 = vpack.c.bf16 %v2473_v60, %v2469_v23  ;;  %v1608_v18 = vsub.f32 %v1544_v37, %v1576_v39  ;;  %v9545_v37 = vld [vmem:[#allocation19_spill] sm:$0xff] }
 0x276   :  { %9543 = vst [vmem:[#allocation15_spill] sm:$0xff] %v7622_v5  ;;  %v1820_v45 = vmul.f32 %v7558_v44, %v7118_v20  ;;  %v2468_v21 = vmax.f32 %v2340_v52, 0.0  ;;  %v2472_v3 = vmax.f32 %v2344_v50, 0.0  ;;  %v2072_v55 = vmul.f32 %v1816_v34, %v7478_v8 }
 0x277   :  { %v1609_v35 = vsub.f32 %v1545_v11, %v1577_v9  ;;  %3108 = vmatprep.mubr.bf16.mxu0 %v2557_v47  ;;  %v1640_v22 = vmax.f32 %v1608_v18, 0.0  ;;  %v1944_v32 = vmul.f32 %v1816_v34, %v9544_v40  ;;  %v1815_v56 = vmul.f32 %v7547_v12, %v7121_v28  ;;  %v9546_v18 = vld [vmem:[#allocation16_spill] sm:$0xff] }
 0x278   :  { %v2076_v42 = vmul.f32 %v1820_v45, %v7483_v61  ;;  %v2556_v17 = vpack.c.bf16 %v2472_v3, %v2468_v21  ;;  %v2221_v60 = vsub.f32 %v7138_v27, %v2072_v55  ;;  %v1819_v52 = vmul.f32 %v7558_v44, %v7121_v28 }
 0x279   :  { %v1641_v23 = vmax.f32 %v1609_v35, 0.0  ;;  %v1672_v39 = vadd.f32 1e-05, %v1640_v22  ;;  %v1948_v50 = vmul.f32 %v1820_v45, %v9545_v37  ;;  %v2071_v11 = vmul.f32 %v1815_v56, %v7478_v8  ;;  %v9548_v45 = vld [vmem:[#allocation18_spill] sm:$0xff] }
 0x27a   :  { %v2225_v9 = vsub.f32 %v7138_v27, %v2076_v42  ;;  %3109 = vmatmul.mubr.bf16.gmra.mrb[72].mxu0 %v2556_v17  ;;  %v2349_v47 = vadd.f32 %v2221_v60, %v1944_v32  ;;  %v1943_v40 = vmul.f32 %v1815_v56, %v9546_v18  ;;  %v2075_v21 = vmul.f32 %v1819_v52, %v7483_v61 }
 0x27b   :  { %v1673_v34 = vadd.f32 1e-05, %v1641_v23  ;;  %5567 = vrsqrt.f32 %v1672_v39  ;;  %v2220_v35 = vsub.f32 %v7143_v43, %v2071_v11  ;;  %v1824_v55 = vmul.f32 %v7579_v26, %v7118_v20 }
 0x27c   :  { %v2353_v3 = vadd.f32 %v2225_v9, %v1948_v50  ;;  %v7642_v22 = vpop.eup %5563  ;;  %v1947_v42 = vmul.f32 %v1819_v52, %v9548_v45  ;;  %v2224_v17 = vsub.f32 %v7143_v43, %v2075_v21  ;;  %v1828_v32 = vmul.f32 %v7590_v62, %v7118_v20  ;;  %v9549_v50 = vld [vmem:[#allocation21_spill] sm:$0xff]  ;;  %v9551_v21 = vld [vmem:[#allocation23_spill] sm:$0xff] }
 0x27d   :  { %9547 = vst [vmem:[#allocation12_spill] sm:$0xff] %v7642_v22  ;;  %5569 = vrsqrt.f32 %v1673_v34  ;;  %v2477_v56 = vmax.f32 %v2349_v47, 0.0  ;;  %v2348_v60 = vadd.f32 %v2220_v35, %v1943_v40  ;;  %v2080_v39 = vmul.f32 %v1824_v55, %v7513_v19 }
 0x27e   :  { %v2481_v23 = vmax.f32 %v2353_v3, 0.0  ;;  %v2352_v37 = vadd.f32 %v2224_v17, %v1947_v42  ;;  %v1952_v9 = vmul.f32 %v1824_v55, %v9549_v50  ;;  %v2084_v11 = vmul.f32 %v1828_v32, %v7518_v54  ;;  %v9552_v17 = vld [vmem:[#allocation20_spill] sm:$0xff] }
 0x27f   :  { %v1823_v34 = vmul.f32 %v7579_v26, %v7121_v28  ;;  %v7653_v18 = vpop.eup %5565  ;;  %v1956_v45 = vmul.f32 %v1828_v32, %v9551_v21  ;;  %v2229_v8 = vsub.f32 %v7138_v27, %v2080_v39  ;;  %v1827_v47 = vmul.f32 %v7590_v62, %v7121_v28 }
 0x280   :  { %9550 = vst [vmem:[#allocation14_spill] sm:$0xff] %v7653_v18  ;;  %v2561_v52 = vpack.c.bf16 %v2481_v23, %v2477_v56  ;;  %v2476_v40 = vmax.f32 %v2348_v60, 0.0  ;;  %v2480_v3 = vmax.f32 %v2352_v37, 0.0  ;;  %v2233_v35 = vsub.f32 %v7138_v27, %v2084_v11  ;;  %v9553_v11 = vld [vmem:[#allocation22_spill] sm:$0xff] }
 0x281   :  { %v2079_v55 = vmul.f32 %v1823_v34, %v7513_v19  ;;  %v2357_v42 = vadd.f32 %v2229_v8, %v1952_v9  ;;  %v1951_v50 = vmul.f32 %v1823_v34, %v9552_v17  ;;  %v2083_v26 = vmul.f32 %v1827_v47, %v7518_v54  ;;  %v9554_v17 = vld [vmem:[#allocation25_spill] sm:$0xff] }
 0x282   :  { %3118 = vmatprep.mubr.bf16.mxu0 %v2561_v52  ;;  %v1832_v32 = vmul.f32 %v7611_v57, %v7118_v20  ;;  %v2560_v56 = vpack.c.bf16 %v2480_v3, %v2476_v40  ;;  %v2361_v23 = vadd.f32 %v2233_v35, %v1956_v45  ;;  %v1836_v60 = vmul.f32 %v7622_v5, %v7118_v20 }
 0x283   :  { %v2228_v39 = vsub.f32 %v7143_v43, %v2079_v55  ;;  %v2485_v37 = vmax.f32 %v2357_v42, 0.0  ;;  %v1955_v21 = vmul.f32 %v1827_v47, %v9553_v11  ;;  %v2232_v52 = vsub.f32 %v7143_v43, %v2083_v26 }
 0x284   :  { %v2088_v8 = vmul.f32 %v1832_v32, %v7545_v13  ;;  %3119 = vmatmul.mubr.bf16.gmra.mrb[76].mxu0 %v2560_v56  ;;  %v2489_v9 = vmax.f32 %v2361_v23, 0.0  ;;  %v1960_v19 = vmul.f32 %v1832_v32, %v9554_v17  ;;  %v2092_v40 = vmul.f32 %v1836_v60, %v7550_v10  ;;  %v9557_v56 = vld [vmem:[#allocation27_spill] sm:$0xff] }
 0x285   :  { %v2356_v34 = vadd.f32 %v2228_v39, %v1951_v50  ;;  %v7673_v45 = vpop.eup %5567  ;;  %v2360_v3 = vadd.f32 %v2232_v52, %v1955_v21  ;;  %v1831_v55 = vmul.f32 %v7611_v57, %v7121_v28  ;;  %v1835_v26 = vmul.f32 %v7622_v5, %v7121_v28  ;;  %v9558_v52 = vld [vmem:[#allocation24_spill] sm:$0xff] }
 0x286   :  { %9555 = vst [vmem:[#allocation17_spill] sm:$0xff] %v7673_v45  ;;  %v2237_v35 = vsub.f32 %v7138_v27, %v2088_v8  ;;  %v2565_v42 = vpack.c.bf16 %v2489_v9, %v2485_v37  ;;  %v1964_v50 = vmul.f32 %v1836_v60, %v9557_v56  ;;  %v2241_v32 = vsub.f32 %v7138_v27, %v2092_v40  ;;  %v9559_v40 = vld [vmem:[#allocation26_spill] sm:$0xff] }
 0x287   :  { %v7680_v47 = vpop.eup %5569  ;;  %v1840_v23 = vmul.f32 %v7642_v22, %v7118_v20  ;;  %v2484_v39 = vmax.f32 %v2356_v34, 0.0  ;;  %v2488_v11 = vmax.f32 %v2360_v3, 0.0  ;;  %v1959_v8 = vmul.f32 %v1831_v55, %v9558_v52 }
 0x288   :  { %9556 = vst [vmem:[#allocation19_spill] sm:$0xff] %v7680_v47  ;;  %v2365_v21 = vadd.f32 %v2237_v35, %v1960_v19  ;;  %3128 = vmatprep.mubr.bf16.mxu0 %v2565_v42  ;;  %v2369_v17 = vadd.f32 %v2241_v32, %v1964_v50  ;;  %v2087_v57 = vmul.f32 %v1831_v55, %v7545_v13  ;;  %v9560_v35 = vld [vmem:[#allocation29_spill] sm:$0xff] }
 0x289   :  { %v2091_v5 = vmul.f32 %v1835_v26, %v7550_v10  ;;  %v1844_v37 = vmul.f32 %v7653_v18, %v7118_v20  ;;  %v2564_v60 = vpack.c.bf16 %v2488_v11, %v2484_v39  ;;  %v1963_v56 = vmul.f32 %v1835_v26, %v9559_v40  ;;  %v9562_v40 = vld [vmem:[#allocation28_spill] sm:$0xff] }
 0x28a   :  { %v2493_v9 = vmax.f32 %v2365_v21, 0.0  ;;  %v2096_v54 = vmul.f32 %v1840_v23, %v7577_v48  ;;  %v2497_v34 = vmax.f32 %v2369_v17, 0.0  ;;  %v2236_v19 = vsub.f32 %v7143_v43, %v2087_v57 }
 0x28b   :  { %v2240_v3 = vsub.f32 %v7143_v43, %v2091_v5  ;;  %v1968_v42 = vmul.f32 %v1840_v23, %v9560_v35  ;;  %v2100_v55 = vmul.f32 %v1844_v37, %v7582_v63  ;;  %v1839_v32 = vmul.f32 %v7642_v22, %v7121_v28  ;;  %v9561_v5 = vld [vmem:[#allocation31_spill] sm:$0xff] }
 0x28c   :  { %v2245_v50 = vsub.f32 %v7138_v27, %v2096_v54  ;;  %v1843_v39 = vmul.f32 %v7653_v18, %v7121_v28  ;;  %3129 = vmatmul.mubr.bf16.gmra.mrb[80].mxu0 %v2564_v60  ;;  %v2569_v26 = vpack.c.bf16 %v2497_v34, %v2493_v9  ;;  %v2364_v11 = vadd.f32 %v2236_v19, %v1959_v8 }
 0x28d   :  { %v2368_v21 = vadd.f32 %v2240_v3, %v1963_v56  ;;  %v1848_v57 = vmul.f32 %v7673_v45, %v7118_v20  ;;  %v1972_v52 = vmul.f32 %v1844_v37, %v9561_v5  ;;  %v2249_v23 = vsub.f32 %v7138_v27, %v2100_v55  ;;  %v9563_v56 = vld [vmem:[#allocation30_spill] sm:$0xff] }
 0x28e   :  { %v2373_v17 = vadd.f32 %v2245_v50, %v1968_v42  ;;  %v1967_v54 = vmul.f32 %v1839_v32, %v9562_v40  ;;  %3138 = vmatprep.mubr.bf16.mxu0 %v2569_v26  ;;  %v2492_v35 = vmax.f32 %v2364_v11, 0.0  ;;  %v2095_v13 = vmul.f32 %v1839_v32, %v7577_v48  ;;  %v9564_v26 = vld [vmem:[#allocation37_spill] sm:$0xff]  ;;  %v9583_v48 = vld [vmem:[#allocation47_spill] sm:$0xff] }
 0x28f   :  { %v2496_v22 = vmax.f32 %v2368_v21, 0.0  ;;  %v2099_v60 = vmul.f32 %v1843_v39, %v7582_v63  ;;  %v2377_v9 = vadd.f32 %v2249_v23, %v1972_v52  ;;  %v1971_v34 = vmul.f32 %v1843_v39, %v9563_v56 }
 0x290   :  { %v2501_v8 = vmax.f32 %v2373_v17, 0.0  ;;  %v1852_v19 = vmul.f32 %v7680_v47, %v7118_v20  ;;  %v2244_v3 = vsub.f32 %v7143_v43, %v2095_v13  ;;  %v2104_v55 = vmul.f32 %v1848_v57, %v7609_v33 }
 0x291   :  { %v2568_v37 = vpack.c.bf16 %v2496_v22, %v2492_v35  ;;  %v2248_v42 = vsub.f32 %v7143_v43, %v2099_v60  ;;  %v2505_v50 = vmax.f32 %v2377_v9, 0.0  ;;  %v1976_v11 = vmul.f32 %v1848_v57, %v9564_v26  ;;  %v9565_v22 = vld [vmem:[#allocation41_spill] sm:$0xff] }
 0x292   :  { %v2108_v32 = vmul.f32 %v1852_v19, %v7614_v16  ;;  %v1847_v21 = vmul.f32 %v7673_v45, %v7121_v28  ;;  %v2372_v5 = vadd.f32 %v2244_v3, %v1967_v54  ;;  %v2253_v52 = vsub.f32 %v7138_v27, %v2104_v55  ;;  %v9566_v54 = vld [vmem:[#allocation34_spill] sm:$0xff] }
 0x293   :  { %v2376_v39 = vadd.f32 %v2248_v42, %v1971_v34  ;;  %v1851_v20 = vmul.f32 %v7680_v47, %v7121_v28  ;;  %v2573_v13 = vpack.c.bf16 %v2505_v50, %v2501_v8  ;;  %v1980_v23 = vmul.f32 %v1852_v19, %v9565_v22  ;;  %v9567_v3 = vld [vmem:[#allocation38_spill] sm:$0xff]  ;;  %v9569_v19 = vld [vmem:[#allocation117_spill] sm:$0xff]  ;;  %v9571_v50 = vld [vmem:[#allocation35_spill] sm:$0xff] }
 0x294   :  { %v2257_v17 = vsub.f32 %v7138_v27, %v2108_v32  ;;  %v2103_v40 = vmul.f32 %v1847_v21, %v7609_v33  ;;  %3139 = vmatmul.mubr.bf16.gmra.mrb[84].mxu0 %v2568_v37  ;;  %v2381_v35 = vadd.f32 %v2253_v52, %v1976_v11  ;;  %v2500_v60 = vmax.f32 %v2372_v5, 0.0  ;;  %v9568_v8 = vld [vmem:[#allocation110_spill] sm:$0xff]  ;;  %v9570_v27 = vld [vmem:[#allocation111_spill] sm:$0xff]  ;;  %v9572_v5 = vld [vmem:[#allocation33_spill] sm:$0xff] }
 0x295   :  { %v2504_v57 = vmax.f32 %v2376_v39, 0.0  ;;  %3148 = vmatprep.mubr.bf16.mxu0 %v2573_v13  ;;  %v1975_v56 = vmul.f32 %v1847_v21, %v9566_v54  ;;  %v2107_v34 = vmul.f32 %v1851_v20, %v7614_v16  ;;  %v1979_v42 = vmul.f32 %v1851_v20, %v9567_v3  ;;  %v5643_v21 = vld [vmem:[%s9104_s4] sm:$0xf]  ;;  %v9573_v20 = vld [vmem:[#allocation48_spill] sm:$0xff]  ;;  %v9580_v16 = vld [vmem:[#allocation45_spill] sm:$0xff] }
 0x296   :  { %v2385_v9 = vadd.f32 %v2257_v17, %v1980_v23  ;;  %v2252_v28 = vsub.f32 %v7143_v43, %v2103_v40  ;;  %v1986_v55 = vmul.f32 %v9569_v19, %v9568_v8  ;;  %v1990_v26 = vmul.f32 %v9571_v50, %v9570_v27  ;;  %v5644_v22 = vld [vmem:[%s9103_s3] sm:$0xf]  ;;  %v9574_v23 = vld [vmem:[#allocation32_spill] sm:$0xff] }
 0x297   :  { %v2509_v37 = vmax.f32 %v2381_v35, 0.0  ;;  %v2256_v11 = vsub.f32 %v7143_v43, %v2107_v34  ;;  %v7738_v39 = vrot.slane %v5643_v21, %v9572_v5  ;;  %v2572_v52 = vpack.c.bf16 %v2504_v57, %v2500_v60  ;;  %v9575_v40 = vld [vmem:[#allocation115_spill] sm:$0xff]  ;;  %v9576_v43 = vld [vmem:[#allocation36_spill] sm:$0xff]  ;;  %v9579_v33 = vld [vmem:[#allocation118_spill] sm:$0xff] }
 0x298   :  { %v2513_v32 = vmax.f32 %v2385_v9, 0.0  ;;  %v1862_v13 = vmul.f32 %v9571_v50, %v9573_v20  ;;  %v7746_v17 = vrot.slane %v5644_v22, %v9574_v23  ;;  %v1738_v35 = vmul.f32 %v9576_v43, %v9575_v40  ;;  %v9577_v3 = vld [vmem:[#allocation40_spill] sm:$0xff] }
 0x299   :  { %v2384_v54 = vadd.f32 %v2256_v11, %v1979_v42  ;;  %v2135_v34 = vsub.f32 %v7738_v39, %v1986_v55  ;;  %v1742_v57 = vmul.f32 %v9577_v3, %v9575_v40  ;;  %v2380_v60 = vadd.f32 %v2252_v28, %v1975_v56  ;;  %v9578_v5 = vld [vmem:[#allocation116_spill] sm:$0xff] }
 0x29a   :  { %v2577_v9 = vpack.c.bf16 %v2513_v32, %v2509_v37  ;;  %v2139_v50 = vsub.f32 %v7738_v39, %v1990_v26  ;;  %v1729_v20 = vmul.f32 %v9578_v5, %v7746_v17  ;;  %v1733_v22 = vmul.f32 %v9579_v33, %v7746_v17  ;;  %v9581_v56 = vld [vmem:[#allocation112_spill] sm:$0xff]  ;;  %v9582_v5 = vld [vmem:[#allocation113_spill] sm:$0xff] }
 0x29b   :  { %v1858_v45 = vmul.f32 %v9569_v19, %v9580_v16  ;;  %v7761_v37 = vrot.slane %v5643_v21, %v9574_v23  ;;  %v2512_v42 = vmax.f32 %v2384_v54, 0.0  ;;  %v1994_v28 = vmul.f32 %v1738_v35, %v9581_v56 }
 0x29c   :  { %3149 = vmatmul.mubr.bf16.gmra.mrb[88].mxu0 %v2572_v52  ;;  %v2267_v55 = vadd.f32 %v2139_v50, %v1862_v13  ;;  %v1985_v32 = vmul.f32 %v1729_v20, %v9568_v8  ;;  %v1989_v11 = vmul.f32 %v1733_v22, %v9570_v27  ;;  %v1998_v47 = vmul.f32 %v1742_v57, %v9582_v5 }
 0x29d   :  { %3158 = vmatprep.mubr.bf16.mxu0 %v2577_v9  ;;  %v2263_v26 = vadd.f32 %v2135_v34, %v1858_v45  ;;  %v2508_v33 = vmax.f32 %v2380_v60, 0.0  ;;  %v1861_v63 = vmul.f32 %v1733_v22, %v9583_v48  ;;  %v1741_v52 = vmul.f32 %v9577_v3, %v7746_v17  ;;  %v9584_v9 = vld [vmem:[#allocation50_spill] sm:$0xff]  ;;  %v9585_v48 = vld [vmem:[#allocation53_spill] sm:$0xff] }
 0x29e   :  { %v2395_v16 = vmax.f32 %v2267_v55, 0.0  ;;  %v2138_v19 = vsub.f32 %v7761_v37, %v1989_v11  ;;  %v2147_v21 = vsub.f32 %v7738_v39, %v1998_v47  ;;  %v2134_v13 = vsub.f32 %v7761_v37, %v1985_v32  ;;  %v9586_v47 = vld [vmem:[#allocation44_spill] sm:$0xff]  ;;  %v9588_v11 = vld [vmem:[#allocation114_spill] sm:$0xff] }
 0x29f   :  { %v2576_v8 = vpack.c.bf16 %v2512_v42, %v2508_v33  ;;  %v2143_v45 = vsub.f32 %v7738_v39, %v1994_v28  ;;  %v1737_v27 = vmul.f32 %v9576_v43, %v7746_v17  ;;  %v2391_v23 = vmax.f32 %v2263_v26, 0.0  ;;  %v9587_v42 = vld [vmem:[#allocation43_spill] sm:$0xff] }
 0x2a0   :  { %v1866_v54 = vmul.f32 %v1738_v35, %v9584_v9  ;;  %v1870_v34 = vmul.f32 %v1742_v57, %v9585_v48  ;;  %v1746_v60 = vmul.f32 %v7210_v24, %v9575_v40  ;;  %v1857_v50 = vmul.f32 %v1729_v20, %v9586_v47 }
 0x2a1   :  { %v2266_v22 = vadd.f32 %v2138_v19, %v1861_v63  ;;  %v1997_v3 = vmul.f32 %v1741_v52, %v9582_v5  ;;  %v1750_v55 = vmul.f32 %v9587_v42, %v9575_v40  ;;  %v2519_v32 = vpack.c.bf16 %v2395_v16, %v2391_v23  ;;  %v9589_v19 = vld [vmem:[#allocation52_spill] sm:$0xff]  ;;  %v9590_v23 = vld [vmem:[#allocation57_spill] sm:$0xff] }
 0x2a2   :  { %v2275_v28 = vadd.f32 %v2147_v21, %v1870_v34  ;;  %v2262_v43 = vadd.f32 %v2134_v13, %v1857_v50  ;;  %v2271_v26 = vadd.f32 %v2143_v45, %v1866_v54  ;;  %v1993_v35 = vmul.f32 %v1737_v27, %v9581_v56  ;;  %v9591_v34 = vld [vmem:[#allocation42_spill] sm:$0xff] }
 0x2a3   :  { %v2006_v57 = vmul.f32 %v1750_v55, %v7123_v6  ;;  %v2002_v33 = vmul.f32 %v1746_v60, %v9588_v11  ;;  %v2394_v9 = vmax.f32 %v2266_v22, 0.0  ;;  %v2146_v63 = vsub.f32 %v7761_v37, %v1997_v3  ;;  %v9592_v50 = vld [vmem:[#allocation46_spill] sm:$0xff]  ;;  %v9593_v3 = vld [vmem:[#allocation49_spill] sm:$0xff] }
 0x2a4   :  { %3159 = vmatmul.mubr.bf16.gmra.mrb[92].mxu0 %v2576_v8  ;;  %v1749_v20 = vmul.f32 %v9587_v42, %v7746_v17  ;;  %v2403_v5 = vmax.f32 %v2275_v28, 0.0  ;;  %v1869_v16 = vmul.f32 %v1741_v52, %v9589_v19  ;;  %v2390_v8 = vmax.f32 %v2262_v43, 0.0 }
 0x2a5   :  { %3201 = vmatprep.mubr.bf16.mxu0 %v2519_v32  ;;  %v2155_v21 = vsub.f32 %v7738_v39, %v2006_v57  ;;  %v2399_v13 = vmax.f32 %v2271_v26, 0.0  ;;  %v2142_v56 = vsub.f32 %v7761_v37, %v1993_v35  ;;  %v1745_v45 = vmul.f32 %v7210_v24, %v7746_v17  ;;  %v9594_v26 = vld [vmem:[#allocation55_spill] sm:$0xff] }
 0x2a6   :  { %v1878_v54 = vmul.f32 %v1750_v55, %v9590_v23  ;;  %v2151_v48 = vsub.f32 %v7738_v39, %v2002_v33  ;;  %v1754_v47 = vmul.f32 %v9591_v34, %v9575_v40  ;;  %v1758_v22 = vmul.f32 %v9592_v50, %v9575_v40  ;;  %v9595_v23 = vld [vmem:[#allocation119_spill] sm:$0xff] }
 0x2a7   :  { %v2518_v52 = vpack.c.bf16 %v2394_v9, %v2390_v8  ;;  %v1865_v42 = vmul.f32 %v1737_v27, %v9593_v3  ;;  %v2274_v32 = vadd.f32 %v2146_v63, %v1869_v16  ;;  %v2005_v28 = vmul.f32 %v1749_v20, %v7123_v6 }
 0x2a8   :  { %v2523_v43 = vpack.c.bf16 %v2403_v5, %v2399_v13  ;;  %v1874_v35 = vmul.f32 %v1746_v60, %v9594_v26  ;;  %v2283_v24 = vadd.f32 %v2155_v21, %v1878_v54  ;;  %v2014_v55 = vmul.f32 %v1758_v22, %v7164_v4  ;;  %v9596_v21 = vld [vmem:[#allocation56_spill] sm:$0xff]  ;;  %v9597_v54 = vld [vmem:[#allocation61_spill] sm:$0xff]  ;;  %v9599_v26 = vld [vmem:[#allocation59_spill] sm:$0xff] }
 0x2a9   :  { %v2270_v57 = vadd.f32 %v2142_v56, %v1865_v42  ;;  %v2001_v33 = vmul.f32 %v1745_v45, %v9588_v11  ;;  %v2010_v18 = vmul.f32 %v1754_v47, %v9595_v23  ;;  %v2402_v9 = vmax.f32 %v2274_v32, 0.0  ;;  %v9598_v42 = vld [vmem:[#allocation54_spill] sm:$0xff] }
 0x2aa   :  { %v2279_v19 = vadd.f32 %v2151_v48, %v1874_v35  ;;  %v2154_v27 = vsub.f32 %v7761_v37, %v2005_v28  ;;  %v1757_v6 = vmul.f32 %v9592_v50, %v7746_v17  ;;  %v2411_v63 = vmax.f32 %v2283_v24, 0.0 }
 0x2ab   :  { %v2163_v60 = vsub.f32 %v7738_v39, %v2014_v55  ;;  %v1766_v5 = vmul.f32 %v7293_v51, %v9575_v40  ;;  %v2398_v16 = vmax.f32 %v2270_v57, 0.0  ;;  %v1877_v8 = vmul.f32 %v1749_v20, %v9596_v21  ;;  %v9600_v57 = vld [vmem:[#allocation39_spill] sm:$0xff] }
 0x2ac   :  { %3202 = vmatmul.mubr.bf16.vlgmr.msra.gmra.mrb[32].mxu0 %v2518_v52  ;;  %v2150_v11 = vsub.f32 %v7761_v37, %v2001_v33  ;;  %v1753_v13 = vmul.f32 %v9591_v34, %v7746_v17  ;;  %v2407_v56 = vmax.f32 %v2279_v19, 0.0  ;;  %v1886_v48 = vmul.f32 %v1758_v22, %v9597_v54 }
 0x2ad   :  { %3211 = vmatprep.mubr.bf16.mxu0 %v2523_v43  ;;  %v2159_v52 = vsub.f32 %v7738_v39, %v2010_v18  ;;  %v1762_v50 = vmul.f32 %v7284_v59, %v9575_v40  ;;  %v2522_v3 = vpack.c.bf16 %v2402_v9, %v2398_v16  ;;  %v1873_v32 = vmul.f32 %v1745_v45, %v9598_v42 }
 0x2ae   :  { %v2282_v28 = vadd.f32 %v2154_v27, %v1877_v8  ;;  %v2013_v43 = vmul.f32 %v1757_v6, %v7164_v4  ;;  %v2527_v20 = vpack.c.bf16 %v2411_v63, %v2407_v56  ;;  %v1882_v35 = vmul.f32 %v1754_v47, %v9599_v26 }
 0x2af   :  { %v2291_v24 = vadd.f32 %v2163_v60, %v1886_v48  ;;  %v2022_v34 = vmul.f32 %v1766_v5, %v7193_v31  ;;  %v2278_v55 = vadd.f32 %v2150_v11, %v1873_v32  ;;  %v2009_v22 = vmul.f32 %v1753_v13, %v9595_v23  ;;  %v9601_v60 = vld [vmem:[#allocation60_spill] sm:$0xff]  ;;  %v9602_v11 = vld [vmem:[#allocation65_spill] sm:$0xff] }
 0x2b0   :  { %v2287_v18 = vadd.f32 %v2159_v52, %v1882_v35  ;;  %v2018_v33 = vmul.f32 %v1762_v50, %v9600_v57  ;;  %v2410_v19 = vmax.f32 %v2282_v28, 0.0  ;;  %v2162_v45 = vsub.f32 %v7761_v37, %v2013_v43  ;;  %v9603_v52 = vld [vmem:[#allocation58_spill] sm:$0xff]  ;;  %v9604_v28 = vld [vmem:[#allocation63_spill] sm:$0xff] }
 0x2b1   :  { %v1765_v4 = vmul.f32 %v7293_v51, %v7746_v17  ;;  %v2419_v9 = vmax.f32 %v2291_v24, 0.0  ;;  %v2171_v47 = vsub.f32 %v7738_v39, %v2022_v34  ;;  %v1774_v27 = vmul.f32 %v7344_v58, %v9575_v40 }
 0x2b2   :  { %v2406_v63 = vmax.f32 %v2278_v55, 0.0  ;;  %v1885_v16 = vmul.f32 %v1757_v6, %v9601_v60  ;;  %v2158_v23 = vsub.f32 %v7761_v37, %v2009_v22  ;;  %v1761_v21 = vmul.f32 %v7284_v59, %v7746_v17 }
 0x2b3   :  { %v2415_v8 = vmax.f32 %v2287_v18, 0.0  ;;  %v1894_v56 = vmul.f32 %v1766_v5, %v9602_v11  ;;  %v2167_v54 = vsub.f32 %v7738_v39, %v2018_v33  ;;  %v1770_v51 = vmul.f32 %v7323_v46, %v9575_v40  ;;  %v9605_v33 = vld [vmem:[#allocation64_spill] sm:$0xff] }
 0x2b4   :  { %3212 = vmatmul.mubr.bf16.gmra.mrb[36].mxu0 %v2522_v3  ;;  %v2526_v48 = vpack.c.bf16 %v2410_v19, %v2406_v63  ;;  %v1881_v3 = vmul.f32 %v1753_v13, %v9603_v52  ;;  %v2290_v42 = vadd.f32 %v2162_v45, %v1885_v16  ;;  %v2021_v32 = vmul.f32 %v1765_v4, %v7193_v31 }
 0x2b5   :  { %3221 = vmatprep.mubr.bf16.mxu0 %v2527_v20  ;;  %v2531_v6 = vpack.c.bf16 %v2419_v9, %v2415_v8  ;;  %v1890_v43 = vmul.f32 %v1762_v50, %v9604_v28  ;;  %v2299_v20 = vadd.f32 %v2171_v47, %v1894_v56  ;;  %v2030_v59 = vmul.f32 %v1774_v27, %v7230_v36  ;;  %v9606_v47 = vld [vmem:[#allocation69_spill] sm:$0xff] }
 0x2b6   :  { %v2286_v26 = vadd.f32 %v2158_v23, %v1881_v3  ;;  %v2017_v5 = vmul.f32 %v1761_v21, %v9600_v57  ;;  %v2026_v24 = vmul.f32 %v1770_v51, %v7219_v41  ;;  %v2418_v34 = vmax.f32 %v2290_v42, 0.0  ;;  %v9607_v23 = vld [vmem:[#allocation62_spill] sm:$0xff] }
 0x2b7   :  { %v2295_v35 = vadd.f32 %v2167_v54, %v1890_v43  ;;  %v2170_v13 = vsub.f32 %v7761_v37, %v2021_v32  ;;  %v1773_v31 = vmul.f32 %v7344_v58, %v7746_v17  ;;  %v2427_v55 = vmax.f32 %v2299_v20, 0.0  ;;  %v9608_v54 = vld [vmem:[#allocation67_spill] sm:$0xff] }
 0x2b8   :  { %v2179_v50 = vsub.f32 %v7738_v39, %v2030_v59  ;;  %v1782_v22 = vmul.f32 %v7392_v30, %v9575_v40  ;;  %v2414_v18 = vmax.f32 %v2286_v26, 0.0  ;;  %v1893_v19 = vmul.f32 %v1765_v4, %v9605_v33  ;;  %v9609_v59 = vld [vmem:[#allocation68_spill] sm:$0xff] }
 0x2b9   :  { %v2166_v57 = vsub.f32 %v7761_v37, %v2017_v5  ;;  %v1769_v45 = vmul.f32 %v7323_v46, %v7746_v17  ;;  %v2423_v9 = vmax.f32 %v2295_v35, 0.0  ;;  %v1902_v63 = vmul.f32 %v1774_v27, %v9606_v47 }
 0x2ba   :  { %v2175_v60 = vsub.f32 %v7738_v39, %v2026_v24  ;;  %v1778_v58 = vmul.f32 %v7361_v29, %v9575_v40  ;;  %v2530_v16 = vpack.c.bf16 %v2418_v34, %v2414_v18  ;;  %v1889_v8 = vmul.f32 %v1761_v21, %v9607_v23  ;;  %v9610_v24 = vld [vmem:[#allocation73_spill] sm:$0xff] }
 0x2bb   :  { %v2298_v11 = vadd.f32 %v2170_v13, %v1893_v19  ;;  %v2029_v56 = vmul.f32 %v1773_v31, %v7230_v36  ;;  %v2535_v4 = vpack.c.bf16 %v2427_v55, %v2423_v9  ;;  %v2307_v52 = vadd.f32 %v2179_v50, %v1902_v63  ;;  %v9611_v50 = vld [vmem:[#allocation66_spill] sm:$0xff] }
 0x2bc   :  { %3222 = vmatmul.mubr.bf16.gmra.mrb[40].mxu0 %v2526_v48  ;;  %v1898_v48 = vmul.f32 %v1770_v51, %v9608_v54  ;;  %v2038_v46 = vmul.f32 %v1782_v22, %v7269_v2  ;;  %v2294_v3 = vadd.f32 %v2166_v57, %v1889_v8  ;;  %v2025_v27 = vmul.f32 %v1769_v45, %v7219_v41  ;;  %v9612_v57 = vld [vmem:[#allocation71_spill] sm:$0xff]  ;;  %v9614_v54 = vld [vmem:[#allocation72_spill] sm:$0xff] }
 0x2bd   :  { %3231 = vmatprep.mubr.bf16.mxu0 %v2531_v6  ;;  %v2034_v32 = vmul.f32 %v1778_v58, %v7256_v0  ;;  %v2426_v6 = vmax.f32 %v2298_v11, 0.0  ;;  %v2178_v21 = vsub.f32 %v7761_v37, %v2029_v56  ;;  %v1781_v36 = vmul.f32 %v7392_v30, %v7746_v17  ;;  %v9613_v11 = vld [vmem:[#allocation122_spill] sm:$0xff] }
 0x2be   :  { %v2303_v42 = vadd.f32 %v2175_v60, %v1898_v48  ;;  %v2435_v28 = vmax.f32 %v2307_v52, 0.0  ;;  %v2187_v51 = vsub.f32 %v7738_v39, %v2038_v46  ;;  %v1790_v43 = vmul.f32 %v7419_v1, %v9575_v40 }
 0x2bf   :  { %v2422_v20 = vmax.f32 %v2294_v3, 0.0  ;;  %v1901_v26 = vmul.f32 %v1773_v31, %v9609_v59  ;;  %v2174_v41 = vsub.f32 %v7761_v37, %v2025_v27  ;;  %v1777_v5 = vmul.f32 %v7361_v29, %v7746_v17  ;;  %v9615_v3 = vld [vmem:[#allocation77_spill] sm:$0xff]  ;;  %v9618_v59 = vld [vmem:[#allocation75_spill] sm:$0xff] }
 0x2c0   :  { %v2431_v35 = vmax.f32 %v2303_v42, 0.0  ;;  %v1910_v34 = vmul.f32 %v1782_v22, %v9610_v24  ;;  %v2183_v13 = vsub.f32 %v7738_v39, %v2034_v32  ;;  %v1786_v30 = vmul.f32 %v7399_v7, %v9575_v40 }
 0x2c1   :  { %v2534_v55 = vpack.c.bf16 %v2426_v6, %v2422_v20  ;;  %v1897_v18 = vmul.f32 %v1769_v45, %v9611_v50  ;;  %v2306_v33 = vadd.f32 %v2178_v21, %v1901_v26  ;;  %v2037_v19 = vmul.f32 %v1781_v36, %v7269_v2  ;;  %v9617_v21 = vld [vmem:[#allocation70_spill] sm:$0xff] }
 0x2c2   :  { %v2539_v31 = vpack.c.bf16 %v2435_v28, %v2431_v35  ;;  %v1906_v9 = vmul.f32 %v1778_v58, %v9612_v57  ;;  %v2315_v47 = vadd.f32 %v2187_v51, %v1910_v34  ;;  %v2046_v29 = vmul.f32 %v1790_v43, %v7305_v25  ;;  %v9619_v34 = vld [vmem:[#allocation51_spill] sm:$0xff] }
 0x2c3   :  { %v2302_v63 = vadd.f32 %v2174_v41, %v1897_v18  ;;  %v2033_v22 = vmul.f32 %v1777_v5, %v7256_v0  ;;  %v2434_v23 = vmax.f32 %v2306_v33, 0.0  ;;  %v2186_v45 = vsub.f32 %v7761_v37, %v2037_v19  ;;  %v9620_v18 = vld [vmem:[#allocation125_spill] sm:$0xff] }
 0x2c4   :  { %3232 = vmatmul.mubr.bf16.gmra.mrb[44].mxu0 %v2530_v16  ;;  %v2311_v60 = vadd.f32 %v2183_v13, %v1906_v9  ;;  %v2042_v16 = vmul.f32 %v1786_v30, %v7295_v53  ;;  %v1789_v2 = vmul.f32 %v7419_v1, %v7746_v17  ;;  %v2443_v8 = vmax.f32 %v2315_v47, 0.0  ;;  %v9616_v1 = vld [vmem:[#allocation121_spill] sm:$0xff] }
 0x2c5   :  { %3241 = vmatprep.mubr.bf16.mxu0 %v2535_v4  ;;  %v2195_v58 = vsub.f32 %v7738_v39, %v2046_v29  ;;  %v1798_v56 = vmul.f32 %v9613_v11, %v9575_v40  ;;  %v2430_v4 = vmax.f32 %v2302_v63, 0.0  ;;  %v1909_v48 = vmul.f32 %v1781_v36, %v9614_v54  ;;  %v9622_v29 = vld [vmem:[#allocation81_spill] sm:$0xff] }
 0x2c6   :  { %v2182_v0 = vsub.f32 %v7761_v37, %v2033_v22  ;;  %v1785_v52 = vmul.f32 %v7399_v7, %v7746_v17  ;;  %v2439_v46 = vmax.f32 %v2311_v60, 0.0  ;;  %v1918_v27 = vmul.f32 %v1790_v43, %v9615_v3  ;;  %v9623_v60 = vld [vmem:[#allocation124_spill] sm:$0xff] }
 0x2c7   :  { %v2191_v42 = vsub.f32 %v7738_v39, %v2042_v16  ;;  %v1794_v32 = vmul.f32 %v9616_v1, %v9575_v40  ;;  %v2538_v6 = vpack.c.bf16 %v2434_v23, %v2430_v4  ;;  %v1905_v28 = vmul.f32 %v1777_v5, %v9617_v21  ;;  %v9625_v4 = vld [vmem:[#allocation79_spill] sm:$0xff]  ;;  %v9627_v21 = vld [vmem:[#allocation129_spill] sm:$0xff] }
 0x2c8   :  { %v2314_v51 = vadd.f32 %v2186_v45, %v1909_v48  ;;  %v2045_v20 = vmul.f32 %v1789_v2, %v7305_v25  ;;  %v2543_v36 = vpack.c.bf16 %v2443_v8, %v2439_v46  ;;  %v1914_v26 = vmul.f32 %v1786_v30, %v9618_v59  ;;  %v9624_v45 = vld [vmem:[#allocation74_spill] sm:$0xff] }
 0x2c9   :  { %v2323_v41 = vadd.f32 %v2195_v58, %v1918_v27  ;;  %v2054_v7 = vmul.f32 %v1798_v56, %v7347_v14  ;;  %v2310_v35 = vadd.f32 %v2182_v0, %v1905_v28  ;;  %v2041_v43 = vmul.f32 %v1785_v52, %v7295_v53  ;;  %v9626_v27 = vld [vmem:[#allocation120_spill] sm:$0xff] }
 0x2ca   :  { %v2319_v24 = vadd.f32 %v2191_v42, %v1914_v26  ;;  %v2050_v13 = vmul.f32 %v1794_v32, %v9619_v34  ;;  %v2194_v5 = vsub.f32 %v7761_v37, %v2045_v20  ;;  %v1797_v25 = vmul.f32 %v9613_v11, %v7746_v17  ;;  %v9628_v20 = vld [vmem:[#allocation80_spill] sm:$0xff] }
 0x2cb   :  { %v2451_v50 = vmax.f32 %v2323_v41, 0.0  ;;  %v2203_v30 = vsub.f32 %v7738_v39, %v2054_v7  ;;  %v1806_v33 = vmul.f32 %v9620_v18, %v9575_v40  ;;  %v2438_v19 = vmax.f32 %v2310_v35, 0.0  ;;  %v9629_v7 = vld [vmem:[#allocation85_spill] sm:$0xff] }
 0x2cc   :  { %3242 = vmatmul.mubr.bf16.gmra.mrb[48].mxu0 %v2534_v55  ;;  %v2442_v55 = vmax.f32 %v2314_v51, 0.0  ;;  %v2190_v53 = vsub.f32 %v7761_v37, %v2041_v43  ;;  %v1793_v9 = vmul.f32 %v9616_v1, %v7746_v17  ;;  %v2447_v47 = vmax.f32 %v2319_v24, 0.0  ;;  %v9630_v24 = vld [vmem:[#allocation127_spill] sm:$0xff] }
 0x2cd   :  { %3251 = vmatprep.mubr.bf16.mxu0 %v2539_v31  ;;  %v9621_v31 = vld [vmem:[#allocation76_spill] sm:$0xff]  ;;  %v1926_v63 = vmul.f32 %v1798_v56, %v9622_v29  ;;  %v2199_v22 = vsub.f32 %v7738_v39, %v2050_v13  ;;  %v1802_v16 = vmul.f32 %v9623_v60, %v9575_v40  ;;  %v1913_v8 = vmul.f32 %v1785_v52, %v9624_v45 }
 0x2ce   :  { %v1917_v57 = vmul.f32 %v1789_v2, %v9621_v31  ;;  %v2542_v23 = vpack.c.bf16 %v2442_v55, %v2438_v19  ;;  %v2053_v11 = vmul.f32 %v1797_v25, %v7347_v14  ;;  %v2547_v2 = vpack.c.bf16 %v2451_v50, %v2447_v47  ;;  %v9631_v55 = vld [vmem:[#allocation78_spill] sm:$0xff]  ;;  %v9633_v45 = vld [vmem:[#allocation84_spill] sm:$0xff] }
 0x2cf   :  { %v1922_v54 = vmul.f32 %v1794_v32, %v9625_v4  ;;  %v2331_v48 = vadd.f32 %v2203_v30, %v1926_v63  ;;  %v2062_v0 = vmul.f32 %v1806_v33, %v7383_v15  ;;  %v2318_v46 = vadd.f32 %v2190_v53, %v1913_v8  ;;  %v9634_v4 = vld [vmem:[#allocation89_spill] sm:$0xff] }
 0x2d0   :  { %v2322_v58 = vadd.f32 %v2194_v5, %v1917_v57  ;;  %v2049_v56 = vmul.f32 %v1793_v9, %v9619_v34  ;;  %v2058_v42 = vmul.f32 %v1802_v16, %v9626_v27  ;;  %v2202_v52 = vsub.f32 %v7761_v37, %v2053_v11 }
 0x2d1   :  { %v2327_v3 = vadd.f32 %v2199_v22, %v1922_v54  ;;  %v1805_v14 = vmul.f32 %v9620_v18, %v7746_v17  ;;  %v2211_v32 = vsub.f32 %v7738_v39, %v2062_v0  ;;  %v1814_v28 = vmul.f32 %v9627_v21, %v9575_v40  ;;  %v9632_v18 = vld [vmem:[#allocation83_spill] sm:$0xff] }
 0x2d2   :  { %v2450_v1 = vmax.f32 %v2322_v58, 0.0  ;;  %v2446_v51 = vmax.f32 %v2318_v46, 0.0  ;;  %v2198_v59 = vsub.f32 %v7761_v37, %v2049_v56  ;;  %v1801_v26 = vmul.f32 %v9623_v60, %v7746_v17  ;;  %v9635_v56 = vld [vmem:[#allocation82_spill] sm:$0xff] }
 0x2d3   :  { %v2455_v41 = vmax.f32 %v2327_v3, 0.0  ;;  %v1934_v35 = vmul.f32 %v1806_v33, %v9629_v7  ;;  %v2207_v43 = vsub.f32 %v7738_v39, %v2058_v42  ;;  %v1810_v34 = vmul.f32 %v9630_v24, %v9575_v40 }
 0x2d4   :  { %3252 = vmatmul.mubr.bf16.gmra.mrb[52].mxu0 %v2538_v6  ;;  %v2459_v6 = vmax.f32 %v2331_v48, 0.0  ;;  %v2546_v13 = vpack.c.bf16 %v2450_v1, %v2446_v51  ;;  %v1921_v5 = vmul.f32 %v1793_v9, %v9631_v55  ;;  %v2061_v30 = vmul.f32 %v1805_v14, %v7383_v15 }
 0x2d5   :  { %3261 = vmatprep.mubr.bf16.mxu0 %v2543_v36  ;;  %v1925_v36 = vmul.f32 %v1797_v25, %v9628_v20  ;;  %v1930_v19 = vmul.f32 %v1802_v16, %v9632_v18  ;;  %v2339_v31 = vadd.f32 %v2211_v32, %v1934_v35  ;;  %v2070_v57 = vmul.f32 %v1814_v28, %v7434_v49  ;;  %v9637_v20 = vld [vmem:[#allocation123_spill] sm:$0xff] }
 0x2d6   :  { %v2551_v25 = vpack.c.bf16 %v2459_v6, %v2455_v41  ;;  %v2326_v53 = vadd.f32 %v2198_v59, %v1921_v5  ;;  %v2057_v33 = vmul.f32 %v1801_v26, %v9626_v27  ;;  %v2066_v29 = vmul.f32 %v1810_v34, %v7428_v38  ;;  %v9639_v5 = vld [vmem:[#allocation93_spill] sm:$0xff] }
 0x2d7   :  { %v2330_v50 = vadd.f32 %v2202_v52, %v1925_v36  ;;  %v2335_v47 = vadd.f32 %v2207_v43, %v1930_v19  ;;  %v2210_v9 = vsub.f32 %v7761_v37, %v2061_v30  ;;  %v1813_v15 = vmul.f32 %v9627_v21, %v7746_v17  ;;  %v9636_v52 = vld [vmem:[#allocation87_spill] sm:$0xff]  ;;  %v9641_v19 = vld [vmem:[#allocation86_spill] sm:$0xff] }
 0x2d8   :  { %v2467_v22 = vmax.f32 %v2339_v31, 0.0  ;;  %v2219_v60 = vsub.f32 %v7738_v39, %v2070_v57  ;;  %v1822_v16 = vmul.f32 %v7558_v44, %v9575_v40  ;;  %v1933_v8 = vmul.f32 %v1805_v14, %v9633_v45 }
 0x2d9   :  { %v2458_v63 = vmax.f32 %v2330_v50, 0.0  ;;  %v2206_v58 = vsub.f32 %v7761_v37, %v2057_v33  ;;  %v1809_v11 = vmul.f32 %v9630_v24, %v7746_v17  ;;  %v1942_v54 = vmul.f32 %v1814_v28, %v9634_v4  ;;  %v9638_v24 = vld [vmem:[#allocation88_spill] sm:$0xff] }
 0x2da   :  { %v2215_v48 = vsub.f32 %v7738_v39, %v2066_v29  ;;  %v1818_v0 = vmul.f32 %v7547_v12, %v9575_v40  ;;  %v1929_v3 = vmul.f32 %v1801_v26, %v9635_v56  ;;  %v2338_v27 = vadd.f32 %v2210_v9, %v1933_v8  ;;  %v9643_v9 = vld [vmem:[#allocation128_spill] sm:$0xff] }
 0x2db   :  { %v2069_v42 = vmul.f32 %v1813_v15, %v7434_v49  ;;  %v1938_v14 = vmul.f32 %v1810_v34, %v9636_v52  ;;  %v2347_v6 = vadd.f32 %v2219_v60, %v1942_v54  ;;  %v2078_v32 = vmul.f32 %v1822_v16, %v7483_v61 }
 0x2dc   :  { %3262 = vmatmul.mubr.bf16.gmra.mrb[56].mxu0 %v2542_v23  ;;  %v2454_v23 = vmax.f32 %v2326_v53, 0.0  ;;  %v2334_v21 = vadd.f32 %v2206_v58, %v1929_v3  ;;  %v2065_v28 = vmul.f32 %v1809_v11, %v7428_v38  ;;  %v2074_v36 = vmul.f32 %v1818_v0, %v9637_v20 }
 0x2dd   :  { %3271 = vmatprep.mubr.bf16.mxu0 %v2547_v2  ;;  %v2463_v2 = vmax.f32 %v2335_v47, 0.0  ;;  %v2343_v51 = vadd.f32 %v2215_v48, %v1938_v14  ;;  %v2466_v59 = vmax.f32 %v2338_v27, 0.0  ;;  %v2218_v26 = vsub.f32 %v7761_v37, %v2069_v42  ;;  %v9642_v47 = vld [vmem:[#allocation91_spill] sm:$0xff]  ;;  %v9646_v48 = vld [vmem:[#allocation92_spill] sm:$0xff]  ;;  %v9647_v27 = vld [vmem:[#allocation97_spill] sm:$0xff] }
 0x2de   :  { %v2550_v46 = vpack.c.bf16 %v2458_v63, %v2454_v23  ;;  %v1821_v49 = vmul.f32 %v7558_v44, %v7746_v17  ;;  %v2475_v41 = vmax.f32 %v2347_v6, 0.0  ;;  %v2227_v7 = vsub.f32 %v7738_v39, %v2078_v32  ;;  %v9640_v44 = vld [vmem:[#allocation9_spill] sm:$0xff]  ;;  %v9649_v6 = vld [vmem:[#allocation90_spill] sm:$0xff] }
 0x2df   :  { %v2555_v1 = vpack.c.bf16 %v2467_v22, %v2463_v2  ;;  %v1830_v35 = vmul.f32 %v7590_v62, %v9575_v40  ;;  %v2462_v43 = vmax.f32 %v2334_v21, 0.0  ;;  %v1941_v34 = vmul.f32 %v1813_v15, %v9638_v24  ;;  %v9645_v2 = vld [vmem:[#allocation15_spill] sm:$0xff] }
 0x2e0   :  { %v2214_v38 = vsub.f32 %v7761_v37, %v2065_v28  ;;  %v2471_v55 = vmax.f32 %v2343_v51, 0.0  ;;  %v1950_v50 = vmul.f32 %v1822_v16, %v9639_v5  ;;  %v2223_v30 = vsub.f32 %v7738_v39, %v2074_v36  ;;  %v9644_v16 = vld [vmem:[#allocation126_spill] sm:$0xff] }
 0x2e1   :  { %v2554_v18 = vpack.c.bf16 %v2466_v59, %v2462_v43  ;;  %v1937_v31 = vmul.f32 %v1809_v11, %v9641_v19  ;;  %v2346_v57 = vadd.f32 %v2218_v26, %v1941_v34  ;;  %v2077_v53 = vmul.f32 %v1821_v49, %v7483_v61  ;;  %v9652_v5 = vld [vmem:[#allocation14_spill] sm:$0xff] }
 0x2e2   :  { %v2559_v33 = vpack.c.bf16 %v2475_v41, %v2471_v55  ;;  %v1946_v29 = vmul.f32 %v1818_v0, %v9642_v47  ;;  %v2355_v63 = vadd.f32 %v2227_v7, %v1950_v50  ;;  %v1829_v61 = vmul.f32 %v7590_v62, %v7746_v17  ;;  %v9648_v62 = vld [vmem:[#allocation10_spill] sm:$0xff]  ;;  %v9655_v47 = vld [vmem:[#allocation12_spill] sm:$0xff] }
 0x2e3   :  { %v2342_v15 = vadd.f32 %v2214_v38, %v1937_v31  ;;  %v2474_v45 = vmax.f32 %v2346_v57, 0.0  ;;  %v2226_v8 = vsub.f32 %v7761_v37, %v2077_v53  ;;  %v1838_v4 = vmul.f32 %v9645_v2, %v9575_v40  ;;  %v9654_v57 = vld [vmem:[#allocation101_spill] sm:$0xff] }
 0x2e4   :  { %3272 = vmatmul.mubr.bf16.gmra.mrb[60].mxu0 %v2546_v13  ;;  %v1817_v13 = vmul.f32 %v7547_v12, %v7746_v17  ;;  %v2086_v12 = vmul.f32 %v1830_v35, %v9643_v9  ;;  %v2351_v60 = vadd.f32 %v2223_v30, %v1946_v29  ;;  %v2483_v58 = vmax.f32 %v2355_v63, 0.0 }
 0x2e5   :  { %3281 = vmatprep.mubr.bf16.mxu0 %v2551_v25  ;;  %v1826_v25 = vmul.f32 %v9640_v44, %v9575_v40  ;;  %v2470_v54 = vmax.f32 %v2342_v15, 0.0  ;;  %v1949_v0 = vmul.f32 %v1821_v49, %v9646_v48  ;;  %v1825_v56 = vmul.f32 %v9640_v44, %v7746_v17  ;;  %v9653_v44 = vld [vmem:[#allocation96_spill] sm:$0xff] }
 0x2e6   :  { %v2073_v22 = vmul.f32 %v1817_v13, %v9637_v20  ;;  %v2235_v11 = vsub.f32 %v7738_v39, %v2086_v12  ;;  %v2479_v3 = vmax.f32 %v2351_v60, 0.0  ;;  %v1958_v42 = vmul.f32 %v1830_v35, %v9647_v27  ;;  %v9650_v20 = vld [vmem:[#allocation95_spill] sm:$0xff]  ;;  %v9651_v35 = vld [vmem:[#allocation6_spill] sm:$0xff] }
 0x2e7   :  { %v2082_v23 = vmul.f32 %v1826_v25, %v9644_v16  ;;  %v1834_v52 = vmul.f32 %v9648_v62, %v9575_v40  ;;  %v2558_v14 = vpack.c.bf16 %v2474_v45, %v2470_v54  ;;  %v1945_v32 = vmul.f32 %v1817_v13, %v9649_v6 }
 0x2e8   :  { %v2354_v21 = vadd.f32 %v2226_v8, %v1949_v0  ;;  %v2085_v28 = vmul.f32 %v1829_v61, %v9643_v9  ;;  %v2563_v51 = vpack.c.bf16 %v2483_v58, %v2479_v3  ;;  %v1954_v36 = vmul.f32 %v1826_v25, %v9650_v20  ;;  %v9656_v9 = vld [vmem:[#allocation94_spill] sm:$0xff]  ;;  %v9658_v8 = vld [vmem:[#allocation11_spill] sm:$0xff] }
 0x2e9   :  { %v2363_v59 = vadd.f32 %v2235_v11, %v1958_v42  ;;  %v2094_v26 = vmul.f32 %v1838_v4, %v7550_v10  ;;  %v2081_v41 = vmul.f32 %v1825_v56, %v9644_v16  ;;  %v2090_v43 = vmul.f32 %v1834_v52, %v9651_v35  ;;  %v9657_v16 = vld [vmem:[#allocation99_spill] sm:$0xff] }
 0x2ea   :  { %v2482_v24 = vmax.f32 %v2354_v21, 0.0  ;;  %v2234_v34 = vsub.f32 %v7761_v37, %v2085_v28  ;;  %v1837_v38 = vmul.f32 %v9645_v2, %v7746_v17  ;;  %v1846_v50 = vmul.f32 %v9652_v5, %v9575_v40  ;;  %v9660_v3 = vld [vmem:[#allocation19_spill] sm:$0xff] }
 0x2eb   :  { %v2491_v13 = vmax.f32 %v2363_v59, 0.0  ;;  %v2243_v55 = vsub.f32 %v7738_v39, %v2094_v26  ;;  %v1957_v25 = vmul.f32 %v1829_v61, %v9653_v44  ;;  %v1833_v19 = vmul.f32 %v9648_v62, %v7746_v17  ;;  %v9664_v59 = vld [vmem:[#allocation98_spill] sm:$0xff] }
 0x2ec   :  { %3282 = vmatmul.mubr.bf16.gmra.mrb[64].mxu0 %v2550_v46  ;;  %v2222_v46 = vsub.f32 %v7761_v37, %v2073_v22  ;;  %v1966_v53 = vmul.f32 %v1838_v4, %v9654_v57  ;;  %v1842_v29 = vmul.f32 %v9655_v47, %v9575_v40  ;;  %v1953_v12 = vmul.f32 %v1825_v56, %v9656_v9  ;;  %v9659_v4 = vld [vmem:[#allocation7_spill] sm:$0xff]  ;;  %v9668_v57 = vld [vmem:[#allocation104_spill] sm:$0xff] }
 0x2ed   :  { %3291 = vmatprep.mubr.bf16.mxu0 %v2555_v1  ;;  %v2231_v1 = vsub.f32 %v7738_v39, %v2082_v23  ;;  %v2362_v15 = vadd.f32 %v2234_v34, %v1957_v25  ;;  %v2093_v22 = vmul.f32 %v1837_v38, %v7550_v10  ;;  %v1962_v23 = vmul.f32 %v1834_v52, %v9657_v16  ;;  %v9666_v34 = vld [vmem:[#allocation13_spill] sm:$0xff] }
 0x2ee   :  { %v2350_v49 = vadd.f32 %v2222_v46, %v1945_v32  ;;  %v2371_v45 = vadd.f32 %v2243_v55, %v1966_v53  ;;  %v2102_v61 = vmul.f32 %v1846_v50, %v9658_v8  ;;  %v2089_v11 = vmul.f32 %v1833_v19, %v9651_v35  ;;  %v9662_v32 = vld [vmem:[#allocation105_spill] sm:$0xff]  ;;  %v9665_v35 = vld [vmem:[#allocation103_spill] sm:$0xff] }
 0x2ef   :  { %v2359_v7 = vadd.f32 %v2231_v1, %v1954_v36  ;;  %v2098_v54 = vmul.f32 %v1842_v29, %v9659_v4  ;;  %v2490_v48 = vmax.f32 %v2362_v15, 0.0  ;;  %v2242_v0 = vsub.f32 %v7761_v37, %v2093_v22  ;;  %v9661_v1 = vld [vmem:[#allocation100_spill] sm:$0xff]  ;;  %v9670_v22 = vld [vmem:[#allocation102_spill] sm:$0xff] }
 0x2f0   :  { %v2478_v30 = vmax.f32 %v2350_v49, 0.0  ;;  %v1845_v10 = vmul.f32 %v9652_v5, %v7746_v17  ;;  %v2499_v46 = vmax.f32 %v2371_v45, 0.0  ;;  %v2251_v56 = vsub.f32 %v7738_v39, %v2102_v61 }
 0x2f1   :  { %v2487_v31 = vmax.f32 %v2359_v7, 0.0  ;;  %v1854_v27 = vmul.f32 %v9660_v3, %v9575_v40  ;;  %v1965_v62 = vmul.f32 %v1837_v38, %v9661_v1  ;;  %v2238_v52 = vsub.f32 %v7761_v37, %v2089_v11 }
 0x2f2   :  { %v2562_v63 = vpack.c.bf16 %v2482_v24, %v2478_v30  ;;  %v1974_v21 = vmul.f32 %v1846_v50, %v9662_v32  ;;  %v2247_v28 = vsub.f32 %v7738_v39, %v2098_v54  ;;  %v1961_v26 = vmul.f32 %v1833_v19, %v9664_v59  ;;  %v9667_v50 = vld [vmem:[#allocation8_spill] sm:$0xff]  ;;  %v5492_v59 = vld [vmem:[%s9106_s9] sm:$0xff]  }
 0x2f3   :  { %v2567_v60 = vpack.c.bf16 %v2491_v13, %v2487_v31  ;;  %v2370_v49 = vadd.f32 %v2242_v0, %v1965_v62  ;;  %v2110_v38 = vmul.f32 %v1854_v27, %v9666_v34  ;;  %v1853_v25 = vmul.f32 %v9660_v3, %v7746_v17  ;;  %v9672_v0 = vld [vmem:[#allocation108_spill] sm:$0xff] }
 0x2f4   :  { %3292 = vmatmul.mubr.bf16.gmra.mrb[68].mxu0 %v2554_v18  ;;  %v2230_v18 = vsub.f32 %v7761_v37, %v2081_v41  ;;  %v2101_v41 = vmul.f32 %v1845_v10, %v9658_v8  ;;  %v2379_v24 = vadd.f32 %v2251_v56, %v1974_v21  ;;  %v2366_v13 = vadd.f32 %v2238_v52, %v1961_v26  ;;  %v9671_v8 = vld [vmem:[#allocation107_spill] sm:$0xff] }
 0x2f5   :  { %3301 = vmatprep.mubr.bf16.mxu0 %v2559_v33  ;;  %v2239_v33 = vsub.f32 %v7738_v39, %v2090_v43  ;;  %v1970_v43 = vmul.f32 %v1842_v29, %v9665_v35  ;;  %v2498_v30 = vmax.f32 %v2370_v49, 0.0  ;;  %v2259_v19 = vsub.f32 %v7738_v39, %v2110_v38  ;;  %v2644_v21 = vld [vmem:[%s9105_s6] sm:$0x3] }
 0x2f6   :  { %v2358_v58 = vadd.f32 %v2230_v18, %v1953_v12  ;;  %v2250_v44 = vsub.f32 %v7761_v37, %v2101_v41  ;;  %v2507_v18 = vmax.f32 %v2379_v24, 0.0  ;;  %v2494_v31 = vmax.f32 %v2366_v13, 0.0 }
 0x2f7   :  { %v2367_v2 = vadd.f32 %v2239_v33, %v1962_v23  ;;  %v2375_v5 = vadd.f32 %v2247_v28, %v1970_v43  ;;  %v1973_v53 = vmul.f32 %v1845_v10, %v9668_v57  ;;  %v2109_v23 = vmul.f32 %v1853_v25, %v9666_v34  ;;  %v9674_v28 = vld [vmem:[#allocation4_spill] sm:$0xff] }
 0x2f8   :  { %v2486_v42 = vmax.f32 %v2358_v58, 0.0  ;;  %v2570_v15 = vpack.c.bf16 %v2498_v30, %v2494_v31  ;;  %v1981_v10 = vmul.f32 %v1853_v25, %v9672_v0 }
 0x2f9   :  { %v2495_v6 = vmax.f32 %v2367_v2, 0.0  ;;  %v2503_v29 = vmax.f32 %v2375_v5, 0.0  ;;  %v2378_v16 = vadd.f32 %v2250_v44, %v1973_v53  ;;  %v2258_v54 = vsub.f32 %v7761_v37, %v2109_v23  ;;  %v5493_v5 = vld [vmem:[%s9106_s9 + $0x48] sm:$0xff]  }
 0x2fa   :  { %v2566_v36 = vpack.c.bf16 %v2490_v48, %v2486_v42 }
 0x2fb   :  { %v2571_v7 = vpack.c.bf16 %v2499_v46, %v2495_v6  ;;  %v2575_v45 = vpack.c.bf16 %v2507_v18, %v2503_v29  ;;  %v2386_v1 = vadd.f32 %v2258_v54, %v1981_v10 }
 0x2fc   :  { %3302 = vmatmul.mubr.bf16.gmra.mrb[72].mxu0 %v2558_v14  ;;  %v1841_v14 = vmul.f32 %v9655_v47, %v7746_v17 }
 0x2fd   :  { %3311 = vmatprep.mubr.bf16.mxu0 %v2563_v51  ;;  %v9663_v51 = vld [vmem:[#allocation17_spill] sm:$0xff] }
 0x2fe   :  { %v1850_v20 = vmul.f32 %v9663_v51, %v9575_v40  ;;  %v2097_v55 = vmul.f32 %v1841_v14, %v9659_v4  ;;  %v1849_v47 = vmul.f32 %v9663_v51, %v7746_v17  ;;  %v2506_v4 = vmax.f32 %v2378_v16, 0.0 }
 0x2ff   :  { %v8069_v51 = vrot.slane %v2644_v21, %v9674_v28 }
 0x300   :  { %v2106_v40 = vmul.f32 %v1850_v20, %v9667_v50  ;;  %v2246_v33 = vsub.f32 %v7761_v37, %v2097_v55  ;;  %v1978_v61 = vmul.f32 %v1850_v20, %v9671_v8  ;;  %v2105_v2 = vmul.f32 %v1849_v47, %v9667_v50  ;;  %v5494_v50 = vld [vmem:[%s9106_s9 + $0x8] sm:$0xff]  }
 0x302   :  { %v2255_v12 = vsub.f32 %v7738_v39, %v2106_v40  ;;  %v2254_v46 = vsub.f32 %v7761_v37, %v2105_v2  ;;  %v9675_v37 = vld [vmem:[#allocation5_spill] sm:$0xff] }
 0x303   :  { %v8072_v20 = vrot.slane %v2644_v21, %v9675_v37 }
 0x304   :  { %3312 = vmatmul.mubr.bf16.gmra.mrb[76].mxu0 %v2562_v63  ;;  %v9669_v63 = vld [vmem:[#allocation109_spill] sm:$0xff]  ;;  %v2383_v17 = vadd.f32 %v2255_v12, %v1978_v61 }
 0x305   :  { %3321 = vmatprep.mubr.bf16.mxu0 %v2567_v60  ;;  %v1982_v9 = vmul.f32 %v1854_v27, %v9669_v63  ;;  %v1969_v60 = vmul.f32 %v1841_v14, %v9670_v22  ;;  %v9673_v27 = vld [vmem:[#allocation106_spill] sm:$0xff]  ;;  %v2514_v14 = vmax.f32 %v2386_v1, 0.0 }
 0x306   :  { %v2511_v56 = vmax.f32 %v2383_v17, 0.0  ;;  %v1977_v42 = vmul.f32 %v1849_v47, %v9673_v27 }
 0x307   :  { %v2387_v58 = vadd.f32 %v2259_v19, %v1982_v9  ;;  %v2374_v11 = vadd.f32 %v2246_v33, %v1969_v60 }
 0x308   :  { %v2382_v52 = vadd.f32 %v2254_v46, %v1977_v42 }
 0x309   :  { %v2515_v39 = vmax.f32 %v2387_v58, 0.0  ;;  %v2502_v48 = vmax.f32 %v2374_v11, 0.0 }
 0x30a   :  { %v2510_v6 = vmax.f32 %v2382_v52, 0.0 }
 0x30b   :  { %v2574_v3 = vpack.c.bf16 %v2506_v4, %v2502_v48  ;;  %v2579_v62 = vpack.c.bf16 %v2515_v39, %v2511_v56 }
 0x30c   :  { %3322 = vmatmul.mubr.bf16.gmra.mrb[80].mxu0 %v2566_v36  ;;  %v2578_v32 = vpack.c.bf16 %v2514_v14, %v2510_v6  ;;  %v5491_v36 = vld [vmem:[%s9106_s9 + $0x40] sm:$0xff]  }
 0x30d   :  { %3331 = vmatprep.mubr.bf16.mxu0 %v2571_v7  ;;  %4950 = vmatprep.subr.bf16.mxu1 %v5491_v36 }
 0x30e   :  { %4951 = vmatpush3.bf16.msra.mxu1 %v5492_v59 }
 0x30f   :  { %4952 = vmatprep.subr.bf16.mxu1 %v5493_v5 }
 0x312   :  { %4953 = vmatpush3.bf16.msra.mxu1 %v5494_v50 }
 0x314   :  { %3332 = vmatmul.mubr.bf16.gmra.mrb[84].mxu0 %v2570_v15 }
 0x315   :  { %3341 = vmatprep.mubr.bf16.mxu0 %v2575_v45 }
 0x31c   :  { %3342 = vmatmul.mubr.bf16.gmra.mrb[88].mxu0 %v2574_v3 }
 0x31d   :  { %3351 = vmatprep.mubr.bf16.mxu0 %v2579_v62 }
 0x324   :  { %3352 = vmatmul.mubr.bf16.gmra.mrb[92].mxu0 %v2578_v32 }
 0x37f   :  { %v3203_v26 = vpop.f32.mrb[32].mxu0 }
 0x380   :  { %v8081_v49 = vadd.f32 %v3203_v26, %v8069_v51  ;;  %v3205_v41 = vpop.f32.mrb[33].mxu0 }
 0x381   :  { %v8084_v7 = vadd.f32 %v3205_v41, %v8072_v20  ;;  %v3207_v35 = vpop.f32.mrb[34].mxu0 }
 0x382   :  { %v8087_v43 = vadd.f32 %v3207_v35, %v8069_v51  ;;  %v3209_v24 = vpop.f32.mrb[35].mxu0  ;;  %v3493_v13 = vmul.f32 %v8081_v49, %v8081_v49 }
 0x383   :  { %v8090_v34 = vadd.f32 %v3209_v24, %v8072_v20  ;;  %v3364_v38 = vadd.f32 %v8084_v7, %v8081_v49  ;;  %v3494_v55 = vmul.f32 %v8084_v7, %v8084_v7 }
 0x384   :  { %v3495_v30 = vmul.f32 %v8087_v43, %v8087_v43 }
 0x385   :  { %3365 = vadd.xlane.f32.xlu0 %v3364_v38  ;;  %v3367_v40 = vadd.f32 %v8090_v34, %v8087_v43  ;;  %v3496_v44 = vmul.f32 %v8090_v34, %v8090_v34  ;;  %v3557_v18 = vadd.f32 %v3494_v55, %v3493_v13 }
 0x387   :  { %v3213_v25 = vpop.f32.mrb[36].mxu0  ;;  %3368 = vadd.xlane.f32.xlu1 %v3367_v40  ;;  %v3560_v33 = vadd.f32 %v3496_v44, %v3495_v30 }
 0x388   :  { %v8111_v19 = vadd.f32 %v3213_v25, %v8069_v51  ;;  %v3215_v31 = vpop.f32.mrb[37].mxu0 }
 0x389   :  { %v8114_v57 = vadd.f32 %v3215_v31, %v8072_v20  ;;  %v3217_v53 = vpop.f32.mrb[38].mxu0  ;;  %3558 = vadd.xlane.f32.xlu0 %v3557_v18 }
 0x38a   :  { %v8117_v47 = vadd.f32 %v3217_v53, %v8069_v51  ;;  %v3219_v29 = vpop.f32.mrb[39].mxu0  ;;  %v3497_v12 = vmul.f32 %v8111_v19, %v8111_v19 }
 0x38b   :  { %v8120_v63 = vadd.f32 %v3219_v29, %v8072_v20  ;;  %3561 = vadd.xlane.f32.xlu1 %v3560_v33  ;;  %v3370_v9 = vadd.f32 %v8114_v57, %v8111_v19  ;;  %v3498_v15 = vmul.f32 %v8114_v57, %v8114_v57 }
 0x38c   :  { %v3499_v60 = vmul.f32 %v8117_v47, %v8117_v47 }
 0x38d   :  { %3371 = vadd.xlane.f32.xlu0 %v3370_v9  ;;  %v3373_v22 = vadd.f32 %v8120_v63, %v8117_v47  ;;  %v3500_v16 = vmul.f32 %v8120_v63, %v8120_v63  ;;  %v3563_v45 = vadd.f32 %v3498_v15, %v3497_v12 }
 0x38f   :  { %v3223_v23 = vpop.f32.mrb[40].mxu0  ;;  %3374 = vadd.xlane.f32.xlu1 %v3373_v22  ;;  %v3566_v2 = vadd.f32 %v3500_v16, %v3499_v60 }
 0x390   :  { %v8135_v8 = vadd.f32 %v3223_v23, %v8069_v51  ;;  %v3225_v61 = vpop.f32.mrb[41].mxu0 }
 0x391   :  { %v8138_v58 = vadd.f32 %v3225_v61, %v8072_v20  ;;  %v3227_v11 = vpop.f32.mrb[42].mxu0  ;;  %3564 = vadd.xlane.f32.xlu0 %v3563_v45 }
 0x392   :  { %v8141_v17 = vadd.f32 %v3227_v11, %v8069_v51  ;;  %v3229_v4 = vpop.f32.mrb[43].mxu0  ;;  %v3501_v48 = vmul.f32 %v8135_v8, %v8135_v8 }
 0x393   :  { %v8144_v54 = vadd.f32 %v3229_v4, %v8072_v20  ;;  %3567 = vadd.xlane.f32.xlu1 %v3566_v2  ;;  %v3376_v39 = vadd.f32 %v8138_v58, %v8135_v8  ;;  %v3502_v0 = vmul.f32 %v8138_v58, %v8138_v58 }
 0x394   :  { %v3503_v46 = vmul.f32 %v8141_v17, %v8141_v17 }
 0x395   :  { %3377 = vadd.xlane.f32.xlu0 %v3376_v39  ;;  %v3379_v10 = vadd.f32 %v8144_v54, %v8141_v17  ;;  %v3504_v56 = vmul.f32 %v8144_v54, %v8144_v54  ;;  %v3569_v27 = vadd.f32 %v3502_v0, %v3501_v48 }
 0x397   :  { %v3233_v3 = vpop.f32.mrb[44].mxu0  ;;  %3380 = vadd.xlane.f32.xlu1 %v3379_v10  ;;  %v3572_v14 = vadd.f32 %v3504_v56, %v3503_v46 }
 0x398   :  { %v8159_v42 = vadd.f32 %v3233_v3, %v8069_v51  ;;  %v3235_v1 = vpop.f32.mrb[45].mxu0  ;;  %v5495_v3 = vld [vmem:[%s9106_s9 + $0x50] sm:$0xff]  }
 0x399   :  { %v8162_v62 = vadd.f32 %v3235_v1, %v8072_v20  ;;  %v3237_v52 = vpop.f32.mrb[46].mxu0  ;;  %3570 = vadd.xlane.f32.xlu0 %v3569_v27  ;;  %v5496_v27 = vld [vmem:[%s9106_s9 + $0x10] sm:$0xff]   ;;  %v5497_v1 = vld [vmem:[%s9106_s9 + $0x58] sm:$0xff]   ;;  %4954 = vmatprep.subr.bf16.mxu1 %v5495_v3 }
 0x39a   :  { %v8165_v6 = vadd.f32 %v3237_v52, %v8069_v51  ;;  %v3239_v32 = vpop.f32.mrb[47].mxu0  ;;  %v3505_v59 = vmul.f32 %v8159_v42, %v8159_v42  ;;  %4955 = vmatpush3.bf16.msra.mxu1 %v5496_v27 }
 0x39b   :  { %v8168_v21 = vadd.f32 %v3239_v32, %v8072_v20  ;;  %3573 = vadd.xlane.f32.xlu1 %v3572_v14  ;;  %v3382_v36 = vadd.f32 %v8162_v62, %v8159_v42  ;;  %v3506_v26 = vmul.f32 %v8162_v62, %v8162_v62  ;;  %4956 = vmatprep.subr.bf16.mxu1 %v5497_v1 }
 0x39c   :  { %v3507_v35 = vmul.f32 %v8165_v6, %v8165_v6 }
 0x39d   :  { %3383 = vadd.xlane.f32.xlu0 %v3382_v36  ;;  %v3385_v41 = vadd.f32 %v8168_v21, %v8165_v6  ;;  %v3508_v24 = vmul.f32 %v8168_v21, %v8168_v21  ;;  %v3575_v13 = vadd.f32 %v3506_v26, %v3505_v59 }
 0x39f   :  { %v3243_v38 = vpop.f32.mrb[48].mxu0  ;;  %3386 = vadd.xlane.f32.xlu1 %v3385_v41  ;;  %v3578_v30 = vadd.f32 %v3508_v24, %v3507_v35  ;;  %v5498_v35 = vld [vmem:[%s9106_s9 + $0x18] sm:$0xff]  }
 0x3a0   :  { %v8183_v55 = vadd.f32 %v3243_v38, %v8069_v51  ;;  %v3245_v5 = vpop.f32.mrb[49].mxu0  ;;  %4957 = vmatpush3.bf16.msra.mxu1 %v5498_v35 }
 0x3a1   :  { %v8186_v50 = vadd.f32 %v3245_v5, %v8072_v20  ;;  %v3247_v40 = vpop.f32.mrb[50].mxu0  ;;  %3576 = vadd.xlane.f32.xlu0 %v3575_v13  ;;  %v5499_v13 = vld [vmem:[%s9106_s9 + $0x60] sm:$0xff]  }
 0x3a2   :  { %v8189_v44 = vadd.f32 %v3247_v40, %v8069_v51  ;;  %v3249_v25 = vpop.f32.mrb[51].mxu0  ;;  %v3509_v53 = vmul.f32 %v8183_v55, %v8183_v55  ;;  %4958 = vmatprep.subr.bf16.mxu1 %v5499_v13 }
 0x3a3   :  { %v8192_v18 = vadd.f32 %v3249_v25, %v8072_v20  ;;  %3579 = vadd.xlane.f32.xlu1 %v3578_v30  ;;  %v3388_v31 = vadd.f32 %v8186_v50, %v8183_v55  ;;  %v3510_v33 = vmul.f32 %v8186_v50, %v8186_v50 }
 0x3a4   :  { %v3511_v9 = vmul.f32 %v8189_v44, %v8189_v44 }
 0x3a5   :  { %3389 = vadd.xlane.f32.xlu0 %v3388_v31  ;;  %v3391_v29 = vadd.f32 %v8192_v18, %v8189_v44  ;;  %v3512_v12 = vmul.f32 %v8192_v18, %v8192_v18  ;;  %v3581_v22 = vadd.f32 %v3510_v33, %v3509_v53 }
 0x3a7   :  { %v3253_v15 = vpop.f32.mrb[52].mxu0  ;;  %3392 = vadd.xlane.f32.xlu1 %v3391_v29  ;;  %v3584_v61 = vadd.f32 %v3512_v12, %v3511_v9  ;;  %v5500_v29 = vld [vmem:[%s9106_s9 + $0x20] sm:$0xff]   ;;  %v5501_v9 = vld [vmem:[%s9106_s9 + $0x68] sm:$0xff]  }
 0x3a8   :  { %v8207_v60 = vadd.f32 %v3253_v15, %v8069_v51  ;;  %v3255_v16 = vpop.f32.mrb[53].mxu0  ;;  %4959 = vmatpush3.bf16.msra.mxu1 %v5500_v29 }
 0x3a9   :  { %v8210_v23 = vadd.f32 %v3255_v16, %v8072_v20  ;;  %v3257_v45 = vpop.f32.mrb[54].mxu0  ;;  %3582 = vadd.xlane.f32.xlu0 %v3581_v22  ;;  %4960 = vmatprep.subr.bf16.mxu1 %v5501_v9 }
 0x3aa   :  { %v8213_v11 = vadd.f32 %v3257_v45, %v8069_v51  ;;  %v3259_v2 = vpop.f32.mrb[55].mxu0  ;;  %v3513_v48 = vmul.f32 %v8207_v60, %v8207_v60 }
 0x3ab   :  { %v8216_v4 = vadd.f32 %v3259_v2, %v8072_v20  ;;  %3585 = vadd.xlane.f32.xlu1 %v3584_v61  ;;  %v3394_v39 = vadd.f32 %v8210_v23, %v8207_v60  ;;  %v3514_v0 = vmul.f32 %v8210_v23, %v8210_v23 }
 0x3ac   :  { %v3515_v46 = vmul.f32 %v8213_v11, %v8213_v11 }
 0x3ad   :  { %3395 = vadd.xlane.f32.xlu0 %v3394_v39  ;;  %v3397_v10 = vadd.f32 %v8216_v4, %v8213_v11  ;;  %v3516_v56 = vmul.f32 %v8216_v4, %v8216_v4  ;;  %v3587_v14 = vadd.f32 %v3514_v0, %v3513_v48  ;;  %v5502_v39 = vld [vmem:[%s9106_s9 + $0x28] sm:$0xff]  }
 0x3ae   :  { %4961 = vmatpush3.bf16.msra.mxu1 %v5502_v39 }
 0x3af   :  { %v3263_v52 = vpop.f32.mrb[56].mxu0  ;;  %3398 = vadd.xlane.f32.xlu1 %v3397_v10  ;;  %v3590_v41 = vadd.f32 %v3516_v56, %v3515_v46  ;;  %v5503_v10 = vld [vmem:[%s9106_s9 + $0x70] sm:$0xff]  }
 0x3b0   :  { %v8240_v32 = vadd.f32 %v3263_v52, %v8069_v51  ;;  %v3265_v36 = vpop.f32.mrb[57].mxu0  ;;  %4962 = vmatprep.subr.bf16.mxu1 %v5503_v10 }
 0x3b1   :  { %v8243_v59 = vadd.f32 %v3265_v36, %v8072_v20  ;;  %v3267_v26 = vpop.f32.mrb[58].mxu0  ;;  %3588 = vadd.xlane.f32.xlu0 %v3587_v14  ;;  %v5504_v36 = vld [vmem:[%s9106_s9 + $0x30] sm:$0xff]  }
 0x3b2   :  { %v8249_v24 = vadd.f32 %v3267_v26, %v8069_v51  ;;  %v3269_v38 = vpop.f32.mrb[59].mxu0  ;;  %v3517_v30 = vmul.f32 %v8240_v32, %v8240_v32  ;;  %v5505_v26 = vld [vmem:[%s9106_s9 + $0x78] sm:$0xff]   ;;  %4963 = vmatpush3.bf16.msra.mxu1 %v5504_v36 }
 0x3b3   :  { %v8255_v5 = vadd.f32 %v3269_v38, %v8072_v20  ;;  %3591 = vadd.xlane.f32.xlu1 %v3590_v41  ;;  %v3400_v40 = vadd.f32 %v8243_v59, %v8240_v32  ;;  %v3518_v25 = vmul.f32 %v8243_v59, %v8243_v59  ;;  %4964 = vmatprep.subr.bf16.mxu1 %v5505_v26 }
 0x3b4   :  { %v3519_v53 = vmul.f32 %v8249_v24, %v8249_v24 }
 0x3b5   :  { %3401 = vadd.xlane.f32.xlu0 %v3400_v40  ;;  %v3403_v31 = vadd.f32 %v8255_v5, %v8249_v24  ;;  %v3520_v33 = vmul.f32 %v8255_v5, %v8255_v5  ;;  %v3593_v15 = vadd.f32 %v3518_v25, %v3517_v30 }
 0x3b7   :  { %v3273_v12 = vpop.f32.mrb[60].mxu0  ;;  %3404 = vadd.xlane.f32.xlu1 %v3403_v31  ;;  %v3596_v2 = vadd.f32 %v3520_v33, %v3519_v53  ;;  %v5506_v31 = vld [vmem:[%s9106_s9 + $0x38] sm:$0xff]  }
 0x3b8   :  { %v8276_v22 = vadd.f32 %v3273_v12, %v8069_v51  ;;  %v3275_v16 = vpop.f32.mrb[61].mxu0  ;;  %4965 = vmatpush3.bf16.msra.mxu1 %v5506_v31 }
 0x3b9   :  { %v8279_v45 = vadd.f32 %v3275_v16, %v8072_v20  ;;  %v3277_v61 = vpop.f32.mrb[62].mxu0  ;;  %3594 = vadd.xlane.f32.xlu0 %v3593_v15 }
 0x3ba   :  { %9676 = vst [vmem:[#allocation16_spill] sm:$0xff] %v8276_v22  ;;  %v8285_v48 = vadd.f32 %v3277_v61, %v8069_v51  ;;  %v3279_v0 = vpop.f32.mrb[63].mxu0  ;;  %v3521_v3 = vmul.f32 %v8276_v22, %v8276_v22 }
 0x3bb   :  { %9677 = vst [vmem:[#allocation18_spill] sm:$0xff] %v8279_v45  ;;  %v8291_v46 = vadd.f32 %v3279_v0, %v8072_v20  ;;  %3597 = vadd.xlane.f32.xlu1 %v3596_v2  ;;  %v3406_v56 = vadd.f32 %v8279_v45, %v8276_v22  ;;  %v3522_v27 = vmul.f32 %v8279_v45, %v8279_v45 }
 0x3bc   :  { %9678 = vst [vmem:[#allocation21_spill] sm:$0xff] %v8285_v48  ;;  %v3523_v52 = vmul.f32 %v8285_v48, %v8285_v48 }
 0x3bd   :  { %9679 = vst [vmem:[#allocation23_spill] sm:$0xff] %v8291_v46  ;;  %3407 = vadd.xlane.f32.xlu0 %v3406_v56  ;;  %v3409_v1 = vadd.f32 %v8291_v46, %v8285_v48  ;;  %v3524_v14 = vmul.f32 %v8291_v46, %v8291_v46  ;;  %v3599_v35 = vadd.f32 %v3522_v27, %v3521_v3 }
 0x3bf   :  { %v3283_v41 = vpop.f32.mrb[64].mxu0  ;;  %3410 = vadd.xlane.f32.xlu1 %v3409_v1  ;;  %v3602_v25 = vadd.f32 %v3524_v14, %v3523_v52 }
 0x3c0   :  { %v8312_v38 = vadd.f32 %v3283_v41, %v8069_v51  ;;  %v3285_v13 = vpop.f32.mrb[65].mxu0 }
 0x3c1   :  { %v8315_v40 = vadd.f32 %v3285_v13, %v8072_v20  ;;  %v3287_v30 = vpop.f32.mrb[66].mxu0  ;;  %3600 = vadd.xlane.f32.xlu0 %v3599_v35 }
 0x3c2   :  { %9680 = vst [vmem:[#allocation20_spill] sm:$0xff] %v8312_v38  ;;  %v8321_v53 = vadd.f32 %v3287_v30, %v8069_v51  ;;  %v3289_v33 = vpop.f32.mrb[67].mxu0  ;;  %v3525_v29 = vmul.f32 %v8312_v38, %v8312_v38 }
 0x3c3   :  { %9681 = vst [vmem:[#allocation22_spill] sm:$0xff] %v8315_v40  ;;  %v3526_v9 = vmul.f32 %v8315_v40, %v8315_v40  ;;  %v8328_v12 = vadd.f32 %v3289_v33, %v8072_v20  ;;  %3603 = vadd.xlane.f32.xlu1 %v3602_v25  ;;  %v3412_v15 = vadd.f32 %v8315_v40, %v8312_v38 }
 0x3c4   :  { %9682 = vst [vmem:[#allocation25_spill] sm:$0xff] %v8321_v53  ;;  %v3527_v16 = vmul.f32 %v8321_v53, %v8321_v53 }
 0x3c5   :  { %9683 = vst [vmem:[#allocation27_spill] sm:$0xff] %v8328_v12  ;;  %v3528_v61 = vmul.f32 %v8328_v12, %v8328_v12  ;;  %3413 = vadd.xlane.f32.xlu0 %v3412_v15  ;;  %v3415_v2 = vadd.f32 %v8328_v12, %v8321_v53  ;;  %v3605_v0 = vadd.f32 %v3526_v9, %v3525_v29 }
 0x3c7   :  { %v3293_v39 = vpop.f32.mrb[68].mxu0  ;;  %3416 = vadd.xlane.f32.xlu1 %v3415_v2  ;;  %v3608_v1 = vadd.f32 %v3528_v61, %v3527_v16 }
 0x3c8   :  { %v8339_v10 = vadd.f32 %v3293_v39, %v8069_v51  ;;  %v3295_v56 = vpop.f32.mrb[69].mxu0 }
 0x3c9   :  { %v8342_v3 = vadd.f32 %v3295_v56, %v8072_v20  ;;  %v3297_v27 = vpop.f32.mrb[70].mxu0  ;;  %3606 = vadd.xlane.f32.xlu0 %v3605_v0 }
 0x3ca   :  { %9684 = vst [vmem:[#allocation24_spill] sm:$0xff] %v8339_v10  ;;  %v8345_v52 = vadd.f32 %v3297_v27, %v8069_v51  ;;  %v3299_v14 = vpop.f32.mrb[71].mxu0  ;;  %v3529_v36 = vmul.f32 %v8339_v10, %v8339_v10 }
 0x3cb   :  { %9685 = vst [vmem:[#allocation26_spill] sm:$0xff] %v8342_v3  ;;  %v3530_v26 = vmul.f32 %v8342_v3, %v8342_v3  ;;  %v8352_v41 = vadd.f32 %v3299_v14, %v8072_v20  ;;  %3609 = vadd.xlane.f32.xlu1 %v3608_v1  ;;  %v3418_v35 = vadd.f32 %v8342_v3, %v8339_v10 }
 0x3cc   :  { %9686 = vst [vmem:[#allocation29_spill] sm:$0xff] %v8345_v52  ;;  %v3531_v13 = vmul.f32 %v8345_v52, %v8345_v52 }
 0x3cd   :  { %9687 = vst [vmem:[#allocation31_spill] sm:$0xff] %v8352_v41  ;;  %v3532_v30 = vmul.f32 %v8352_v41, %v8352_v41  ;;  %3419 = vadd.xlane.f32.xlu0 %v3418_v35  ;;  %v3421_v25 = vadd.f32 %v8352_v41, %v8345_v52  ;;  %v3611_v33 = vadd.f32 %v3530_v26, %v3529_v36 }
 0x3cf   :  { %v3303_v31 = vpop.f32.mrb[72].mxu0  ;;  %3422 = vadd.xlane.f32.xlu1 %v3421_v25  ;;  %v3614_v61 = vadd.f32 %v3532_v30, %v3531_v13 }
 0x3d0   :  { %v8363_v29 = vadd.f32 %v3303_v31, %v8069_v51  ;;  %v3305_v9 = vpop.f32.mrb[73].mxu0 }
 0x3d1   :  { %v8366_v15 = vadd.f32 %v3305_v9, %v8072_v20  ;;  %v3307_v16 = vpop.f32.mrb[74].mxu0  ;;  %3612 = vadd.xlane.f32.xlu0 %v3611_v33 }
 0x3d2   :  { %9688 = vst [vmem:[#allocation28_spill] sm:$0xff] %v8363_v29  ;;  %v8369_v2 = vadd.f32 %v3307_v16, %v8069_v51  ;;  %v3309_v39 = vpop.f32.mrb[75].mxu0  ;;  %v3533_v0 = vmul.f32 %v8363_v29, %v8363_v29 }
 0x3d3   :  { %9689 = vst [vmem:[#allocation30_spill] sm:$0xff] %v8366_v15  ;;  %v3534_v56 = vmul.f32 %v8366_v15, %v8366_v15  ;;  %v8376_v27 = vadd.f32 %v3309_v39, %v8072_v20  ;;  %3615 = vadd.xlane.f32.xlu1 %v3614_v61  ;;  %v3424_v1 = vadd.f32 %v8366_v15, %v8363_v29 }
 0x3d4   :  { %9690 = vst [vmem:[#allocation37_spill] sm:$0xff] %v8369_v2  ;;  %v3535_v14 = vmul.f32 %v8369_v2, %v8369_v2 }
 0x3d5   :  { %9691 = vst [vmem:[#allocation41_spill] sm:$0xff] %v8376_v27  ;;  %v3536_v36 = vmul.f32 %v8376_v27, %v8376_v27  ;;  %3425 = vadd.xlane.f32.xlu0 %v3424_v1  ;;  %v3427_v26 = vadd.f32 %v8376_v27, %v8369_v2  ;;  %v3617_v13 = vadd.f32 %v3534_v56, %v3533_v0 }
 0x3d7   :  { %v3313_v35 = vpop.f32.mrb[76].mxu0  ;;  %3428 = vadd.xlane.f32.xlu1 %v3427_v26  ;;  %v3620_v9 = vadd.f32 %v3536_v36, %v3535_v14 }
 0x3d8   :  { %v8387_v30 = vadd.f32 %v3313_v35, %v8069_v51  ;;  %v3315_v25 = vpop.f32.mrb[77].mxu0 }
 0x3d9   :  { %v8390_v31 = vadd.f32 %v3315_v25, %v8072_v20  ;;  %v3317_v33 = vpop.f32.mrb[78].mxu0  ;;  %3618 = vadd.xlane.f32.xlu0 %v3617_v13 }
 0x3da   :  { %9692 = vst [vmem:[#allocation34_spill] sm:$0xff] %v8387_v30  ;;  %v8393_v16 = vadd.f32 %v3317_v33, %v8069_v51  ;;  %v3319_v61 = vpop.f32.mrb[79].mxu0  ;;  %v3537_v39 = vmul.f32 %v8387_v30, %v8387_v30 }
 0x3db   :  { %9693 = vst [vmem:[#allocation38_spill] sm:$0xff] %v8390_v31  ;;  %v3538_v0 = vmul.f32 %v8390_v31, %v8390_v31  ;;  %v8400_v56 = vadd.f32 %v3319_v61, %v8072_v20  ;;  %3621 = vadd.xlane.f32.xlu1 %v3620_v9  ;;  %v3430_v1 = vadd.f32 %v8390_v31, %v8387_v30 }
 0x3dc   :  { %9694 = vst [vmem:[#allocation110_spill] sm:$0xff] %v8393_v16  ;;  %v3539_v14 = vmul.f32 %v8393_v16, %v8393_v16 }
 0x3dd   :  { %9695 = vst [vmem:[#allocation117_spill] sm:$0xff] %v8400_v56  ;;  %v3540_v36 = vmul.f32 %v8400_v56, %v8400_v56  ;;  %3431 = vadd.xlane.f32.xlu0 %v3430_v1  ;;  %v3433_v26 = vadd.f32 %v8400_v56, %v8393_v16  ;;  %v3623_v13 = vadd.f32 %v3538_v0, %v3537_v39 }
 0x3df   :  { %v3323_v35 = vpop.f32.mrb[80].mxu0  ;;  %3434 = vadd.xlane.f32.xlu1 %v3433_v26  ;;  %v3626_v30 = vadd.f32 %v3540_v36, %v3539_v14 }
 0x3e0   :  { %v8411_v25 = vadd.f32 %v3323_v35, %v8069_v51  ;;  %v3325_v33 = vpop.f32.mrb[81].mxu0 }
 0x3e1   :  { %v8414_v9 = vadd.f32 %v3325_v33, %v8072_v20  ;;  %v3327_v61 = vpop.f32.mrb[82].mxu0  ;;  %3624 = vadd.xlane.f32.xlu0 %v3623_v13 }
 0x3e2   :  { %9696 = vst [vmem:[#allocation111_spill] sm:$0xff] %v8411_v25  ;;  %v8417_v31 = vadd.f32 %v3327_v61, %v8069_v51  ;;  %v3329_v1 = vpop.f32.mrb[83].mxu0  ;;  %v3541_v16 = vmul.f32 %v8411_v25, %v8411_v25 }
 0x3e3   :  { %9697 = vst [vmem:[#allocation35_spill] sm:$0xff] %v8414_v9  ;;  %v3542_v39 = vmul.f32 %v8414_v9, %v8414_v9  ;;  %v8424_v0 = vadd.f32 %v3329_v1, %v8072_v20  ;;  %3627 = vadd.xlane.f32.xlu1 %v3626_v30  ;;  %v3436_v26 = vadd.f32 %v8414_v9, %v8411_v25 }
 0x3e4   :  { %9698 = vst [vmem:[#allocation33_spill] sm:$0xff] %v8417_v31  ;;  %v3543_v14 = vmul.f32 %v8417_v31, %v8417_v31 }
 0x3e5   :  { %9699 = vst [vmem:[#allocation48_spill] sm:$0xff] %v8424_v0  ;;  %v3544_v36 = vmul.f32 %v8424_v0, %v8424_v0  ;;  %3437 = vadd.xlane.f32.xlu0 %v3436_v26  ;;  %v3439_v35 = vadd.f32 %v8424_v0, %v8417_v31  ;;  %v3629_v33 = vadd.f32 %v3542_v39, %v3541_v16 }
 0x3e7   :  { %v3333_v13 = vpop.f32.mrb[84].mxu0  ;;  %3440 = vadd.xlane.f32.xlu1 %v3439_v35  ;;  %v3632_v9 = vadd.f32 %v3544_v36, %v3543_v14 }
 0x3e8   :  { %v8435_v61 = vadd.f32 %v3333_v13, %v8069_v51  ;;  %v3335_v30 = vpop.f32.mrb[85].mxu0 }
 0x3e9   :  { %v8438_v1 = vadd.f32 %v3335_v30, %v8072_v20  ;;  %v3337_v25 = vpop.f32.mrb[86].mxu0  ;;  %3630 = vadd.xlane.f32.xlu0 %v3629_v33 }
 0x3ea   :  { %9700 = vst [vmem:[#allocation32_spill] sm:$0xff] %v8435_v61  ;;  %v8441_v56 = vadd.f32 %v3337_v25, %v8069_v51  ;;  %v3339_v26 = vpop.f32.mrb[87].mxu0  ;;  %v3545_v31 = vmul.f32 %v8435_v61, %v8435_v61 }
 0x3eb   :  { %9701 = vst [vmem:[#allocation115_spill] sm:$0xff] %v8438_v1  ;;  %v3546_v16 = vmul.f32 %v8438_v1, %v8438_v1  ;;  %v8448_v39 = vadd.f32 %v3339_v26, %v8072_v20  ;;  %3633 = vadd.xlane.f32.xlu1 %v3632_v9  ;;  %v3442_v35 = vadd.f32 %v8438_v1, %v8435_v61 }
 0x3ec   :  { %9702 = vst [vmem:[#allocation36_spill] sm:$0xff] %v8441_v56  ;;  %v3547_v14 = vmul.f32 %v8441_v56, %v8441_v56 }
 0x3ed   :  { %9703 = vst [vmem:[#allocation40_spill] sm:$0xff] %v8448_v39  ;;  %v3548_v25 = vmul.f32 %v8448_v39, %v8448_v39  ;;  %3443 = vadd.xlane.f32.xlu0 %v3442_v35  ;;  %v3445_v36 = vadd.f32 %v8448_v39, %v8441_v56  ;;  %v3635_v33 = vadd.f32 %v3546_v16, %v3545_v31 }
 0x3ef   :  { %v3343_v13 = vpop.f32.mrb[88].mxu0  ;;  %3446 = vadd.xlane.f32.xlu1 %v3445_v36  ;;  %v3638_v1 = vadd.f32 %v3548_v25, %v3547_v14 }
 0x3f0   :  { %v8459_v30 = vadd.f32 %v3343_v13, %v8069_v51  ;;  %v3345_v9 = vpop.f32.mrb[89].mxu0 }
 0x3f1   :  { %v8462_v26 = vadd.f32 %v3345_v9, %v8072_v20  ;;  %v3347_v61 = vpop.f32.mrb[90].mxu0  ;;  %3636 = vadd.xlane.f32.xlu0 %v3635_v33 }
 0x3f2   :  { %9704 = vst [vmem:[#allocation116_spill] sm:$0xff] %v8459_v30  ;;  %v8465_v0 = vadd.f32 %v3347_v61, %v8069_v51  ;;  %v3349_v35 = vpop.f32.mrb[91].mxu0  ;;  %v3549_v56 = vmul.f32 %v8459_v30, %v8459_v30 }
 0x3f3   :  { %9705 = vst [vmem:[#allocation118_spill] sm:$0xff] %v8462_v26  ;;  %v3550_v31 = vmul.f32 %v8462_v26, %v8462_v26  ;;  %v8472_v16 = vadd.f32 %v3349_v35, %v8072_v20  ;;  %3639 = vadd.xlane.f32.xlu1 %v3638_v1  ;;  %v3448_v36 = vadd.f32 %v8462_v26, %v8459_v30 }
 0x3f4   :  { %9706 = vst [vmem:[#allocation45_spill] sm:$0xff] %v8465_v0  ;;  %v3551_v14 = vmul.f32 %v8465_v0, %v8465_v0 }
 0x3f5   :  { %9707 = vst [vmem:[#allocation112_spill] sm:$0xff] %v8472_v16  ;;  %v3552_v61 = vmul.f32 %v8472_v16, %v8472_v16  ;;  %3449 = vadd.xlane.f32.xlu0 %v3448_v36  ;;  %v3451_v25 = vadd.f32 %v8472_v16, %v8465_v0  ;;  %v3641_v33 = vadd.f32 %v3550_v31, %v3549_v56 }
 0x3f7   :  { %v3353_v13 = vpop.f32.mrb[92].mxu0  ;;  %3452 = vadd.xlane.f32.xlu1 %v3451_v25  ;;  %v3644_v26 = vadd.f32 %v3552_v61, %v3551_v14 }
 0x3f8   :  { %v8483_v9 = vadd.f32 %v3353_v13, %v8069_v51  ;;  %v3355_v1 = vpop.f32.mrb[93].mxu0 }
 0x3f9   :  { %v8486_v35 = vadd.f32 %v3355_v1, %v8072_v20  ;;  %v3357_v30 = vpop.f32.mrb[94].mxu0  ;;  %3642 = vadd.xlane.f32.xlu0 %v3641_v33 }
 0x3fa   :  { %9708 = vst [vmem:[#allocation113_spill] sm:$0xff] %v8483_v9  ;;  %v8489_v39 = vadd.f32 %v3357_v30, %v8069_v51  ;;  %v3359_v36 = vpop.f32.mrb[95].mxu0  ;;  %v3553_v0 = vmul.f32 %v8483_v9, %v8483_v9 }
 0x3fb   :  { %9709 = vst [vmem:[#allocation47_spill] sm:$0xff] %v8486_v35  ;;  %v3554_v56 = vmul.f32 %v8486_v35, %v8486_v35  ;;  %v8496_v31 = vadd.f32 %v3359_v36, %v8072_v20  ;;  %3645 = vadd.xlane.f32.xlu1 %v3644_v26  ;;  %v3454_v25 = vadd.f32 %v8486_v35, %v8483_v9 }
 0x3fc   :  { %9710 = vst [vmem:[#allocation50_spill] sm:$0xff] %v8489_v39  ;;  %v3555_v14 = vmul.f32 %v8489_v39, %v8489_v39 }
 0x3fd   :  { %9711 = vst [vmem:[#allocation53_spill] sm:$0xff] %v8496_v31  ;;  %v3556_v51 = vmul.f32 %v8496_v31, %v8496_v31  ;;  %3455 = vadd.xlane.f32.xlu0 %v3454_v25  ;;  %v3457_v30 = vadd.f32 %v8496_v31, %v8489_v39  ;;  %v3647_v61 = vadd.f32 %v3554_v56, %v3553_v0 }
 0x3ff   :  { %3458 = vadd.xlane.f32.xlu1 %v3457_v30  ;;  %v3650_v13 = vadd.f32 %v3556_v51, %v3555_v14 }
 0x401   :  { %3648 = vadd.xlane.f32.xlu0 %v3647_v61 }
 0x403   :  { %3651 = vadd.xlane.f32.xlu1 %v3650_v13 }
 0x412   :  { %v3366_v20 = vpop.xlane.xlu0 %3365 }
 0x413   :  { %v8506_v26 = vmul.f32 0.00390625, %v3366_v20 }
 0x414   :  { %v3369_v33 = vpop.xlane.xlu1 %3368 }
 0x415   :  { %v8508_v1 = vmul.f32 0.00390625, %v3369_v33  ;;  %v3685_v9 = vmul.f32 %v8506_v26, %v8506_v26 }
 0x416   :  { %v3559_v36 = vpop.xlane.xlu0 %3558 }
 0x417   :  { %v3653_v35 = vmul.f32 0.00390625, %v3559_v36  ;;  %v3686_v30 = vmul.f32 %v8508_v1, %v8508_v1 }
 0x418   :  { %v3562_v25 = vpop.xlane.xlu1 %3561 }
 0x419   :  { %v3717_v16 = vsub.f32 %v3653_v35, %v3685_v9  ;;  %v3654_v0 = vmul.f32 0.00390625, %v3562_v25 }
 0x41a   :  { %v3372_v56 = vpop.xlane.xlu0 %3371 }
 0x41b   :  { %v3749_v14 = vmax.f32 %v3717_v16, 0.0  ;;  %v3718_v51 = vsub.f32 %v3654_v0, %v3686_v30  ;;  %v8514_v61 = vmul.f32 0.00390625, %v3372_v56  ;;  %v3362_v56 = vld [vmem:[%s9107_s7] sm:$0x3] }
 0x41c   :  { %v3375_v13 = vpop.xlane.xlu1 %3374 }
 0x41d   :  { %v3781_v20 = vadd.f32 1e-05, %v3749_v14  ;;  %v3750_v33 = vmax.f32 %v3718_v51, 0.0  ;;  %v8516_v39 = vmul.f32 0.00390625, %v3375_v13  ;;  %v3687_v9 = vmul.f32 %v8514_v61, %v8514_v61 }
 0x41e   :  { %v3565_v31 = vpop.xlane.xlu0 %3564 }
 0x41f   :  { %5571 = vrsqrt.f32 %v3781_v20  ;;  %v3782_v2 = vadd.f32 1e-05, %v3750_v33  ;;  %v3655_v35 = vmul.f32 0.00390625, %v3565_v31  ;;  %v3688_v16 = vmul.f32 %v8516_v39, %v8516_v39 }
 0x420   :  { %v3568_v36 = vpop.xlane.xlu1 %3567 }
 0x421   :  { %5573 = vrsqrt.f32 %v3782_v2  ;;  %v3719_v25 = vsub.f32 %v3655_v35, %v3687_v9  ;;  %v3656_v30 = vmul.f32 0.00390625, %v3568_v36  ;;  %v8530_v2 = vrot.slane %v3362_v56, %v9674_v28 }
 0x422   :  { %v3378_v0 = vpop.xlane.xlu0 %3377  ;;  %v8533_v35 = vrot.slane %v3362_v56, %v9675_v37 }
 0x423   :  { %v3751_v14 = vmax.f32 %v3719_v25, 0.0  ;;  %v3720_v51 = vsub.f32 %v3656_v30, %v3688_v16  ;;  %v8525_v13 = vmul.f32 0.00390625, %v3378_v0  ;;  %v3363_v30 = vld [vmem:[%s9108_s8] sm:$0x3] }
 0x424   :  { %v3381_v20 = vpop.xlane.xlu1 %3380  ;;  %v8545_v15 = vrot.slane %v3363_v30, %v9674_v28 }
 0x425   :  { %v3783_v33 = vadd.f32 1e-05, %v3751_v14  ;;  %v3752_v29 = vmax.f32 %v3720_v51, 0.0  ;;  %v8527_v31 = vmul.f32 0.00390625, %v3381_v20  ;;  %v3689_v25 = vmul.f32 %v8525_v13, %v8525_v13 }
 0x426   :  { %v3571_v9 = vpop.xlane.xlu0 %3570 }
 0x427   :  { %5575 = vrsqrt.f32 %v3783_v33  ;;  %v3784_v36 = vadd.f32 1e-05, %v3752_v29  ;;  %v3657_v16 = vmul.f32 0.00390625, %v3571_v9  ;;  %v3690_v20 = vmul.f32 %v8527_v31, %v8527_v31 }
 0x428   :  { %v3574_v0 = vpop.xlane.xlu1 %3573 }
 0x429   :  { %v5572_v14 = vpop.eup %5571  ;;  %5577 = vrsqrt.f32 %v3784_v36  ;;  %v3721_v51 = vsub.f32 %v3657_v16, %v3689_v25  ;;  %v3658_v27 = vmul.f32 0.00390625, %v3574_v0  ;;  %v8550_v36 = vrot.slane %v3363_v30, %v9675_v37 }
 0x42a   :  { %v3856_v56 = vmul.f32 %v5572_v14, %v8530_v2  ;;  %v3384_v33 = vpop.xlane.xlu0 %3383  ;;  %v3857_v29 = vmul.f32 %v5572_v14, %v8533_v35 }
 0x42b   :  { %v5574_v9 = vpop.eup %5573  ;;  %v3753_v52 = vmax.f32 %v3721_v51, 0.0  ;;  %v3722_v10 = vsub.f32 %v3658_v27, %v3690_v20  ;;  %v8547_v41 = vmul.f32 0.00390625, %v3384_v33 }
 0x42c   :  { %v3984_v25 = vmul.f32 %v3856_v56, %v8506_v26  ;;  %v3858_v16 = vmul.f32 %v5574_v9, %v8530_v2  ;;  %v3387_v0 = vpop.xlane.xlu1 %3386  ;;  %v3859_v3 = vmul.f32 %v5574_v9, %v8533_v35  ;;  %v3921_v14 = vmul.f32 %v8084_v7, %v3857_v29 }
 0x42d   :  { %v3785_v53 = vadd.f32 1e-05, %v3753_v52  ;;  %v3754_v28 = vmax.f32 %v3722_v10, 0.0  ;;  %v8556_v38 = vmul.f32 0.00390625, %v3387_v0  ;;  %v3691_v27 = vmul.f32 %v8547_v41, %v8547_v41 }
 0x42e   :  { %v3986_v51 = vmul.f32 %v3858_v16, %v8508_v1  ;;  %v3577_v37 = vpop.xlane.xlu0 %3576  ;;  %v3923_v30 = vmul.f32 %v8090_v34, %v3859_v3  ;;  %v3985_v20 = vmul.f32 %v3857_v29, %v8506_v26  ;;  %v3987_v33 = vmul.f32 %v3859_v3, %v8508_v1 }
 0x42f   :  { %5579 = vrsqrt.f32 %v3785_v53  ;;  %v3786_v9 = vadd.f32 1e-05, %v3754_v28  ;;  %v3659_v12 = vmul.f32 0.00390625, %v3577_v37  ;;  %v3692_v7 = vmul.f32 %v8556_v38, %v8556_v38 }
 0x430   :  { %v3580_v10 = vpop.xlane.xlu1 %3579  ;;  %v4060_v52 = vsub.f32 %v8550_v36, %v3985_v20  ;;  %v4062_v0 = vsub.f32 %v8550_v36, %v3987_v33  ;;  %v3920_v40 = vmul.f32 %v8081_v49, %v3856_v56  ;;  %v3922_v48 = vmul.f32 %v8087_v43, %v3858_v16 }
 0x431   :  { %v5576_v34 = vpop.eup %5575  ;;  %5581 = vrsqrt.f32 %v3786_v9  ;;  %v3723_v26 = vsub.f32 %v3659_v12, %v3691_v27  ;;  %v3660_v29 = vmul.f32 0.00390625, %v3580_v10  ;;  %v4059_v53 = vsub.f32 %v8545_v15, %v3984_v25 }
 0x432   :  { %v3390_v28 = vpop.xlane.xlu0 %3389  ;;  %v4124_v3 = vadd.f32 %v4060_v52, %v3921_v14  ;;  %v4126_v1 = vadd.f32 %v4062_v0, %v3923_v30  ;;  %v4061_v37 = vsub.f32 %v8545_v15, %v3986_v51  ;;  %v3861_v22 = vmul.f32 %v5576_v34, %v8533_v35 }
 0x433   :  { %v5578_v20 = vpop.eup %5577  ;;  %v3755_v46 = vmax.f32 %v3723_v26, 0.0  ;;  %v3724_v33 = vsub.f32 %v3660_v29, %v3692_v7  ;;  %v8573_v45 = vmul.f32 0.00390625, %v3390_v28  ;;  %v4123_v49 = vadd.f32 %v4059_v53, %v3920_v40 }
 0x434   :  { %v3393_v43 = vpop.xlane.xlu1 %3392  ;;  %v4188_v56 = vmax.f32 %v4124_v3, 0.0  ;;  %v4190_v16 = vmax.f32 %v4126_v1, 0.0  ;;  %v4125_v12 = vadd.f32 %v4061_v37, %v3922_v48  ;;  %v3863_v27 = vmul.f32 %v5578_v20, %v8533_v35 }
 0x435   :  { %v3787_v25 = vadd.f32 1e-05, %v3755_v46  ;;  %v3756_v9 = vmax.f32 %v3724_v33, 0.0  ;;  %v8576_v14 = vmul.f32 0.00390625, %v3393_v43  ;;  %v3693_v51 = vmul.f32 %v8573_v45, %v8573_v45 }
 0x436   :  { %v3583_v30 = vpop.xlane.xlu0 %3582  ;;  %v4252_v10 = vpack.c.bf16 %v4190_v16, %v4188_v56  ;;  %v4187_v52 = vmax.f32 %v4123_v49, 0.0  ;;  %v4189_v7 = vmax.f32 %v4125_v12, 0.0  ;;  %v3925_v0 = vmul.f32 %v8114_v57, %v3861_v22 }
 0x437   :  { %5583 = vrsqrt.f32 %v3787_v25  ;;  %v3788_v40 = vadd.f32 1e-05, %v3756_v9  ;;  %v3661_v26 = vmul.f32 0.00390625, %v3583_v30  ;;  %v3694_v48 = vmul.f32 %v8576_v14, %v8576_v14 }
 0x438   :  { %v3586_v29 = vpop.xlane.xlu1 %3585  ;;  %4450 = vmatprep.mubr.bf16.mxu1 %v4252_v10  ;;  %v4251_v46 = vpack.c.bf16 %v4189_v7, %v4187_v52  ;;  %v3927_v53 = vmul.f32 %v8120_v63, %v3863_v27  ;;  %v3989_v28 = vmul.f32 %v3861_v22, %v8514_v61  ;;  %v3991_v3 = vmul.f32 %v3863_v27, %v8516_v39 }
 0x439   :  { %v5580_v1 = vpop.eup %5579  ;;  %5585 = vrsqrt.f32 %v3788_v40  ;;  %v3725_v37 = vsub.f32 %v3661_v26, %v3693_v51  ;;  %v3662_v33 = vmul.f32 0.00390625, %v3586_v29  ;;  %v3860_v57 = vmul.f32 %v5576_v34, %v8530_v2 }
 0x43a   :  { %4451 = vmatmul.mubr.bf16.vlgmr.msra.gmra.mrb[96].mxu1 %v4251_v46  ;;  %v3396_v49 = vpop.xlane.xlu0 %3395  ;;  %v4064_v43 = vsub.f32 %v8550_v36, %v3989_v28  ;;  %v4066_v56 = vsub.f32 %v8550_v36, %v3991_v3  ;;  %v3862_v16 = vmul.f32 %v5578_v20, %v8530_v2  ;;  %v3865_v63 = vmul.f32 %v5580_v1, %v8533_v35 }
 0x43b   :  { %v5582_v12 = vpop.eup %5581  ;;  %v3757_v22 = vmax.f32 %v3725_v37, 0.0  ;;  %v3726_v25 = vsub.f32 %v3662_v33, %v3694_v48  ;;  %v8591_v27 = vmul.f32 0.00390625, %v3396_v49  ;;  %v3924_v9 = vmul.f32 %v8111_v19, %v3860_v57 }
 0x43c   :  { %v3399_v51 = vpop.xlane.xlu1 %3398  ;;  %v4128_v30 = vadd.f32 %v4064_v43, %v3925_v0  ;;  %v4130_v34 = vadd.f32 %v4066_v56, %v3927_v53  ;;  %v3926_v10 = vmul.f32 %v8117_v47, %v3862_v16  ;;  %v3988_v52 = vmul.f32 %v3860_v57, %v8514_v61 }
 0x43d   :  { %v3789_v7 = vadd.f32 1e-05, %v3757_v22  ;;  %v3758_v40 = vmax.f32 %v3726_v25, 0.0  ;;  %v8596_v26 = vmul.f32 0.00390625, %v3399_v51  ;;  %v3695_v20 = vmul.f32 %v8591_v27, %v8591_v27 }
 0x43e   :  { %v3589_v29 = vpop.xlane.xlu0 %3588  ;;  %v4192_v48 = vmax.f32 %v4128_v30, 0.0  ;;  %v4194_v46 = vmax.f32 %v4130_v34, 0.0  ;;  %v3990_v28 = vmul.f32 %v3862_v16, %v8516_v39  ;;  %v4063_v19 = vsub.f32 %v8545_v15, %v3988_v52 }
 0x43f   :  { %5587 = vrsqrt.f32 %v3789_v7  ;;  %v3790_v0 = vadd.f32 1e-05, %v3758_v40  ;;  %v3663_v53 = vmul.f32 0.00390625, %v3589_v29  ;;  %v3696_v47 = vmul.f32 %v8596_v26, %v8596_v26 }
 0x440   :  { %v3592_v61 = vpop.xlane.xlu1 %3591  ;;  %v4254_v3 = vpack.c.bf16 %v4194_v46, %v4192_v48  ;;  %v4065_v37 = vsub.f32 %v8545_v15, %v3990_v28  ;;  %v4127_v33 = vadd.f32 %v4063_v19, %v3924_v9  ;;  %v3867_v57 = vmul.f32 %v5582_v12, %v8533_v35 }
 0x441   :  { %v8606_v49 = vpop.eup %5583  ;;  %5589 = vrsqrt.f32 %v3790_v0  ;;  %v3727_v43 = vsub.f32 %v3663_v53, %v3695_v20  ;;  %v3664_v39 = vmul.f32 0.00390625, %v3592_v61  ;;  %v3929_v56 = vmul.f32 %v8138_v58, %v3865_v63 }
 0x442   :  { %4458 = vmatprep.mubr.bf16.mxu1 %v4254_v3  ;;  %v4129_v16 = vadd.f32 %v4065_v37, %v3926_v10  ;;  %v4191_v22 = vmax.f32 %v4127_v33, 0.0  ;;  %v3402_v25 = vpop.xlane.xlu0 %3401  ;;  %v3931_v51 = vmul.f32 %v8144_v54, %v3867_v57  ;;  %v3993_v30 = vmul.f32 %v3865_v63, %v8525_v13 }
 0x443   :  { %v8611_v34 = vpop.eup %5585  ;;  %v3759_v9 = vmax.f32 %v3727_v43, 0.0  ;;  %v3728_v52 = vsub.f32 %v3664_v39, %v3696_v47  ;;  %v8613_v7 = vmul.f32 0.00390625, %v3402_v25  ;;  %v3995_v40 = vmul.f32 %v3867_v57, %v8527_v31 }
 0x444   :  { %v4193_v20 = vmax.f32 %v4129_v16, 0.0  ;;  %v3405_v29 = vpop.xlane.xlu1 %3404  ;;  %v4068_v58 = vsub.f32 %v8550_v36, %v3993_v30  ;;  %v3864_v10 = vmul.f32 %v5580_v1, %v8530_v2  ;;  %v3866_v48 = vmul.f32 %v5582_v12, %v8530_v2 }
 0x445   :  { %v3791_v46 = vadd.f32 1e-05, %v3759_v9  ;;  %v3760_v54 = vmax.f32 %v3728_v52, 0.0  ;;  %v8619_v28 = vmul.f32 0.00390625, %v3405_v29  ;;  %v3697_v63 = vmul.f32 %v8613_v7, %v8613_v7 }
 0x446   :  { %v4253_v19 = vpack.c.bf16 %v4193_v20, %v4191_v22  ;;  %v3595_v0 = vpop.xlane.xlu0 %3594  ;;  %v4070_v53 = vsub.f32 %v8550_v36, %v3995_v40  ;;  %v4132_v47 = vadd.f32 %v4068_v58, %v3929_v56  ;;  %v3928_v61 = vmul.f32 %v8135_v8, %v3864_v10 }
 0x447   :  { %5591 = vrsqrt.f32 %v3791_v46  ;;  %v3792_v3 = vadd.f32 1e-05, %v3760_v54  ;;  %v3665_v37 = vmul.f32 0.00390625, %v3595_v0  ;;  %v3698_v1 = vmul.f32 %v8619_v28, %v8619_v28 }
 0x448   :  { %4459 = vmatmul.mubr.bf16.gmra.mrb[100].mxu1 %v4253_v19  ;;  %v3598_v12 = vpop.xlane.xlu1 %3597  ;;  %v4134_v33 = vadd.f32 %v4070_v53, %v3931_v51  ;;  %v4196_v57 = vmax.f32 %v4132_v47, 0.0  ;;  %v3930_v43 = vmul.f32 %v8141_v17, %v3866_v48  ;;  %v3992_v39 = vmul.f32 %v3864_v10, %v8525_v13 }
 0x449   :  { %v8629_v16 = vpop.eup %5587  ;;  %5593 = vrsqrt.f32 %v3792_v3  ;;  %v3729_v56 = vsub.f32 %v3665_v37, %v3697_v63  ;;  %v3666_v22 = vmul.f32 0.00390625, %v3598_v12  ;;  %v3994_v8 = vmul.f32 %v3866_v48, %v8527_v31 }
 0x44a   :  { %v4198_v25 = vmax.f32 %v4134_v33, 0.0  ;;  %v4067_v30 = vsub.f32 %v8545_v15, %v3992_v39  ;;  %v3408_v9 = vpop.xlane.xlu0 %3407  ;;  %v3869_v52 = vmul.f32 %v8606_v49, %v8533_v35  ;;  %v3871_v51 = vmul.f32 %v8611_v34, %v8533_v35 }
 0x44b   :  { %v8637_v17 = vpop.eup %5589  ;;  %v3761_v13 = vmax.f32 %v3729_v56, 0.0  ;;  %v3730_v40 = vsub.f32 %v3666_v22, %v3698_v1  ;;  %v4069_v20 = vsub.f32 %v8545_v15, %v3994_v8  ;;  %v8640_v29 = vmul.f32 0.00390625, %v3408_v9 }
 0x44c   :  { %v4256_v58 = vpack.c.bf16 %v4198_v25, %v4196_v57  ;;  %v4131_v31 = vadd.f32 %v4067_v30, %v3928_v61  ;;  %v3411_v10 = vpop.xlane.xlu1 %3410  ;;  %v3933_v48 = vmul.f32 %v8162_v62, %v3869_v52  ;;  %v3935_v46 = vmul.f32 %v8168_v21, %v3871_v51 }
 0x44d   :  { %v3793_v54 = vadd.f32 1e-05, %v3761_v13  ;;  %v3762_v63 = vmax.f32 %v3730_v40, 0.0  ;;  %v4133_v19 = vadd.f32 %v4069_v20, %v3930_v43  ;;  %v8644_v0 = vmul.f32 0.00390625, %v3411_v10 }
 0x44e   :  { %4466 = vmatprep.mubr.bf16.mxu1 %v4256_v58  ;;  %v4195_v53 = vmax.f32 %v4131_v31, 0.0  ;;  %v3699_v47 = vmul.f32 %v8640_v29, %v8640_v29  ;;  %v3601_v3 = vpop.xlane.xlu0 %3600  ;;  %v3997_v37 = vmul.f32 %v3869_v52, %v8547_v41  ;;  %v3999_v61 = vmul.f32 %v3871_v51, %v8556_v38 }
 0x44f   :  { %5595 = vrsqrt.f32 %v3793_v54  ;;  %v3794_v1 = vadd.f32 1e-05, %v3762_v63  ;;  %v4197_v62 = vmax.f32 %v4133_v19, 0.0  ;;  %v3667_v12 = vmul.f32 0.00390625, %v3601_v3 }
 0x450   :  { %v3700_v21 = vmul.f32 %v8644_v0, %v8644_v0  ;;  %v3604_v33 = vpop.xlane.xlu1 %3603  ;;  %v4072_v57 = vsub.f32 %v8550_v36, %v3997_v37  ;;  %v4074_v43 = vsub.f32 %v8550_v36, %v3999_v61  ;;  %v3868_v39 = vmul.f32 %v8606_v49, %v8530_v2 }
 0x451   :  { %v8656_v56 = vpop.eup %5591  ;;  %5597 = vrsqrt.f32 %v3794_v1  ;;  %v4255_v22 = vpack.c.bf16 %v4197_v62, %v4195_v53  ;;  %v3731_v8 = vsub.f32 %v3667_v12, %v3699_v47  ;;  %v3668_v25 = vmul.f32 0.00390625, %v3604_v33 }
 0x452   :  { %v4136_v30 = vadd.f32 %v4072_v57, %v3933_v48  ;;  %v4138_v9 = vadd.f32 %v4074_v43, %v3935_v46  ;;  %v3870_v52 = vmul.f32 %v8611_v34, %v8530_v2  ;;  %v3932_v51 = vmul.f32 %v8159_v42, %v3868_v39  ;;  %v3414_v13 = vpop.xlane.xlu0 %3413 }
 0x453   :  { %v8661_v40 = vpop.eup %5593  ;;  %4467 = vmatmul.mubr.bf16.gmra.mrb[104].mxu1 %v4255_v22  ;;  %v3763_v20 = vmax.f32 %v3731_v8, 0.0  ;;  %v3732_v58 = vsub.f32 %v3668_v25, %v3700_v21  ;;  %v3996_v49 = vmul.f32 %v3868_v39, %v8547_v41  ;;  %v8664_v31 = vmul.f32 0.00390625, %v3414_v13 }
 0x454   :  { %v4200_v10 = vmax.f32 %v4136_v30, 0.0  ;;  %v4202_v54 = vmax.f32 %v4138_v9, 0.0  ;;  %v3934_v48 = vmul.f32 %v8165_v6, %v3870_v52  ;;  %v3998_v46 = vmul.f32 %v3870_v52, %v8556_v38  ;;  %v3417_v63 = vpop.xlane.xlu1 %3416 }
 0x455   :  { %v3795_v34 = vadd.f32 1e-05, %v3763_v20  ;;  %v3764_v19 = vmax.f32 %v3732_v58, 0.0  ;;  %v4071_v42 = vsub.f32 %v8545_v15, %v3996_v49  ;;  %v8669_v53 = vmul.f32 0.00390625, %v3417_v63 }
 0x456   :  { %v4258_v47 = vpack.c.bf16 %v4202_v54, %v4200_v10  ;;  %v4073_v3 = vsub.f32 %v8545_v15, %v3998_v46  ;;  %v3701_v41 = vmul.f32 %v8664_v31, %v8664_v31  ;;  %v3607_v37 = vpop.xlane.xlu0 %3606  ;;  %v3873_v61 = vmul.f32 %v8629_v16, %v8533_v35 }
 0x457   :  { %5599 = vrsqrt.f32 %v3795_v34  ;;  %v3796_v6 = vadd.f32 1e-05, %v3764_v19  ;;  %v4135_v38 = vadd.f32 %v4071_v42, %v3932_v51  ;;  %v3669_v1 = vmul.f32 0.00390625, %v3607_v37 }
 0x458   :  { %4474 = vmatprep.mubr.bf16.mxu1 %v4258_v47  ;;  %v4137_v62 = vadd.f32 %v4073_v3, %v3934_v48  ;;  %v3702_v12 = vmul.f32 %v8669_v53, %v8669_v53  ;;  %v3610_v21 = vpop.xlane.xlu1 %3609  ;;  %v3875_v33 = vmul.f32 %v8637_v17, %v8533_v35  ;;  %v3937_v57 = vmul.f32 %v8186_v50, %v3873_v61 }
 0x459   :  { %v8681_v43 = vpop.eup %5595  ;;  %5601 = vrsqrt.f32 %v3796_v6  ;;  %v4199_v39 = vmax.f32 %v4135_v38, 0.0  ;;  %v3733_v22 = vsub.f32 %v3669_v1, %v3701_v41  ;;  %v3670_v8 = vmul.f32 0.00390625, %v3610_v21 }
 0x45a   :  { %v4201_v25 = vmax.f32 %v4137_v62, 0.0  ;;  %v3939_v30 = vmul.f32 %v8192_v18, %v3875_v33  ;;  %v4001_v9 = vmul.f32 %v3873_v61, %v8573_v45  ;;  %v4003_v52 = vmul.f32 %v3875_v33, %v8576_v14  ;;  %v3420_v51 = vpop.xlane.xlu0 %3419 }
 0x45b   :  { %v8686_v13 = vpop.eup %5597  ;;  %v3765_v20 = vmax.f32 %v3733_v22, 0.0  ;;  %v3734_v58 = vsub.f32 %v3670_v8, %v3702_v12  ;;  %v3872_v50 = vmul.f32 %v8629_v16, %v8530_v2  ;;  %v3874_v49 = vmul.f32 %v8637_v17, %v8530_v2 }
 0x45c   :  { %v4257_v10 = vpack.c.bf16 %v4201_v25, %v4199_v39  ;;  %v4076_v54 = vsub.f32 %v8550_v36, %v4001_v9  ;;  %v4078_v18 = vsub.f32 %v8550_v36, %v4003_v52  ;;  %v8694_v48 = vmul.f32 0.00390625, %v3420_v51  ;;  %v3423_v46 = vpop.xlane.xlu1 %3422 }
 0x45d   :  { %v3797_v63 = vadd.f32 1e-05, %v3765_v20  ;;  %v3766_v34 = vmax.f32 %v3734_v58, 0.0  ;;  %v3936_v19 = vmul.f32 %v8183_v55, %v3872_v50  ;;  %v3938_v42 = vmul.f32 %v8189_v44, %v3874_v49 }
 0x45e   :  { %4475 = vmatmul.mubr.bf16.gmra.mrb[108].mxu1 %v4257_v10  ;;  %v4140_v47 = vadd.f32 %v4076_v54, %v3937_v57  ;;  %v4142_v16 = vadd.f32 %v4078_v18, %v3939_v30  ;;  %v4000_v3 = vmul.f32 %v3872_v50, %v8573_v45  ;;  %v4002_v17 = vmul.f32 %v3874_v49, %v8576_v14  ;;  %v3613_v41 = vpop.xlane.xlu0 %3612 }
 0x45f   :  { %5603 = vrsqrt.f32 %v3797_v63  ;;  %v3798_v37 = vadd.f32 1e-05, %v3766_v34  ;;  %v8700_v61 = vmul.f32 0.00390625, %v3423_v46  ;;  %v3703_v6 = vmul.f32 %v8694_v48, %v8694_v48 }
 0x460   :  { %v4204_v38 = vmax.f32 %v4140_v47, 0.0  ;;  %v4206_v1 = vmax.f32 %v4142_v16, 0.0  ;;  %v4075_v55 = vsub.f32 %v8545_v15, %v4000_v3  ;;  %v4077_v44 = vsub.f32 %v8545_v15, %v4002_v17  ;;  %v3616_v62 = vpop.xlane.xlu1 %3615 }
 0x461   :  { %v8706_v12 = vpop.eup %5599  ;;  %5605 = vrsqrt.f32 %v3798_v37  ;;  %v3671_v45 = vmul.f32 0.00390625, %v3613_v41  ;;  %v3704_v14 = vmul.f32 %v8700_v61, %v8700_v61  ;;  %v3672_v21 = vmul.f32 0.00390625, %v3616_v62 }
 0x462   :  { %v4260_v33 = vpack.c.bf16 %v4206_v1, %v4204_v38  ;;  %v4139_v57 = vadd.f32 %v4075_v55, %v3936_v19  ;;  %v4141_v39 = vadd.f32 %v4077_v44, %v3938_v42  ;;  %v3877_v22 = vmul.f32 %v8656_v56, %v8533_v35  ;;  %v3426_v8 = vpop.xlane.xlu0 %3425 }
 0x463   :  { %v8712_v25 = vpop.eup %5601  ;;  %v3735_v30 = vsub.f32 %v3671_v45, %v3703_v6  ;;  %v3736_v9 = vsub.f32 %v3672_v21, %v3704_v14  ;;  %v3879_v52 = vmul.f32 %v8661_v40, %v8533_v35  ;;  %v3876_v51 = vmul.f32 %v8656_v56, %v8530_v2 }
 0x464   :  { %4482 = vmatprep.mubr.bf16.mxu1 %v4260_v33  ;;  %v4203_v20 = vmax.f32 %v4139_v57, 0.0  ;;  %v4205_v58 = vmax.f32 %v4141_v39, 0.0  ;;  %v3941_v50 = vmul.f32 %v8210_v23, %v3877_v22  ;;  %v4005_v49 = vmul.f32 %v3877_v22, %v8591_v27  ;;  %v3429_v10 = vpop.xlane.xlu1 %3428 }
 0x465   :  { %v3767_v54 = vmax.f32 %v3735_v30, 0.0  ;;  %v3768_v18 = vmax.f32 %v3736_v9, 0.0  ;;  %v3943_v46 = vmul.f32 %v8216_v4, %v3879_v52  ;;  %v4007_v63 = vmul.f32 %v3879_v52, %v8596_v26 }
 0x466   :  { %v4259_v34 = vpack.c.bf16 %v4205_v58, %v4203_v20  ;;  %v4080_v19 = vsub.f32 %v8550_v36, %v4005_v49  ;;  %v3878_v56 = vmul.f32 %v8661_v40, %v8530_v2  ;;  %v3940_v42 = vmul.f32 %v8207_v60, %v3876_v51  ;;  %v3619_v47 = vpop.xlane.xlu0 %3618 }
 0x467   :  { %v3799_v16 = vadd.f32 1e-05, %v3767_v54  ;;  %v3800_v23 = vadd.f32 1e-05, %v3768_v18  ;;  %v4082_v3 = vsub.f32 %v8550_v36, %v4007_v63  ;;  %v4004_v17 = vmul.f32 %v3876_v51, %v8591_v27 }
 0x468   :  { %4483 = vmatmul.mubr.bf16.gmra.mrb[112].mxu1 %v4259_v34  ;;  %v4144_v41 = vadd.f32 %v4080_v19, %v3941_v50  ;;  %v3942_v4 = vmul.f32 %v8213_v11, %v3878_v56  ;;  %v4006_v37 = vmul.f32 %v3878_v56, %v8596_v26  ;;  %v8730_v6 = vmul.f32 0.00390625, %v3426_v8  ;;  %v3622_v38 = vpop.xlane.xlu1 %3621 }
 0x469   :  { %v8732_v1 = vpop.eup %5603  ;;  %5607 = vrsqrt.f32 %v3799_v16  ;;  %v4146_v60 = vadd.f32 %v4082_v3, %v3943_v46  ;;  %v4079_v40 = vsub.f32 %v8545_v15, %v4004_v17  ;;  %v8735_v55 = vmul.f32 0.00390625, %v3429_v10 }
 0x46a   :  { %5609 = vrsqrt.f32 %v3800_v23  ;;  %v4208_v44 = vmax.f32 %v4144_v41, 0.0  ;;  %v4081_v27 = vsub.f32 %v8545_v15, %v4006_v37  ;;  %v3705_v11 = vmul.f32 %v8730_v6, %v8730_v6  ;;  %v3432_v62 = vpop.xlane.xlu0 %3431 }
 0x46b   :  { %v8740_v26 = vpop.eup %5605  ;;  %v4210_v45 = vmax.f32 %v4146_v60, 0.0  ;;  %v4143_v14 = vadd.f32 %v4079_v40, %v3940_v42  ;;  %v3673_v21 = vmul.f32 0.00390625, %v3619_v47  ;;  %v3706_v33 = vmul.f32 %v8735_v55, %v8735_v55 }
 0x46c   :  { %v4145_v57 = vadd.f32 %v4081_v27, %v3942_v4  ;;  %v3674_v39 = vmul.f32 0.00390625, %v3622_v38  ;;  %v3881_v22 = vmul.f32 %v8681_v43, %v8533_v35  ;;  %v3883_v8 = vmul.f32 %v8686_v13, %v8533_v35  ;;  %v3435_v30 = vpop.xlane.xlu1 %3434 }
 0x46d   :  { %v4262_v9 = vpack.c.bf16 %v4210_v45, %v4208_v44  ;;  %v4207_v52 = vmax.f32 %v4143_v14, 0.0  ;;  %v3737_v51 = vsub.f32 %v3673_v21, %v3705_v11  ;;  %v3880_v20 = vmul.f32 %v8681_v43, %v8530_v2 }
 0x46e   :  { %v4209_v58 = vmax.f32 %v4145_v57, 0.0  ;;  %v3738_v50 = vsub.f32 %v3674_v39, %v3706_v33  ;;  %v3945_v49 = vmul.f32 %v8243_v59, %v3881_v22  ;;  %v3947_v10 = vmul.f32 %v8255_v5, %v3883_v8  ;;  %v3625_v54 = vpop.xlane.xlu0 %3624 }
 0x46f   :  { %4490 = vmatprep.mubr.bf16.mxu1 %v4262_v9  ;;  %v3769_v18 = vmax.f32 %v3737_v51, 0.0  ;;  %v4009_v46 = vmul.f32 %v3881_v22, %v8613_v7  ;;  %v4011_v63 = vmul.f32 %v3883_v8, %v8619_v28  ;;  %v3882_v34 = vmul.f32 %v8686_v13, %v8530_v2 }
 0x470   :  { %v4261_v19 = vpack.c.bf16 %v4209_v58, %v4207_v52  ;;  %v3770_v56 = vmax.f32 %v3738_v50, 0.0  ;;  %v3944_v43 = vmul.f32 %v8240_v32, %v3880_v20  ;;  %v4008_v42 = vmul.f32 %v3880_v20, %v8613_v7  ;;  %v3628_v47 = vpop.xlane.xlu1 %3627  ;;  %v9712_v20 = vld [vmem:[#allocation18_spill] sm:$0xff] }
 0x471   :  { %v3801_v59 = vadd.f32 1e-05, %v3769_v18  ;;  %v4084_v5 = vsub.f32 %v8550_v36, %v4009_v46  ;;  %v4086_v16 = vsub.f32 %v8550_v36, %v4011_v63  ;;  %v3946_v23 = vmul.f32 %v8249_v24, %v3882_v34 }
 0x472   :  { %4491 = vmatmul.mubr.bf16.gmra.mrb[116].mxu1 %v4261_v19  ;;  %v3802_v3 = vadd.f32 1e-05, %v3770_v56  ;;  %v4010_v17 = vmul.f32 %v3882_v34, %v8619_v28  ;;  %v4083_v13 = vsub.f32 %v8545_v15, %v4008_v42  ;;  %v8763_v41 = vmul.f32 0.00390625, %v3432_v62  ;;  %v3438_v4 = vpop.xlane.xlu0 %3437  ;;  %v9714_v56 = vld [vmem:[#allocation16_spill] sm:$0xff] }
 0x473   :  { %v8765_v32 = vpop.eup %5607  ;;  %5611 = vrsqrt.f32 %v3801_v59  ;;  %v4148_v7 = vadd.f32 %v4084_v5, %v3945_v49  ;;  %v4150_v37 = vadd.f32 %v4086_v16, %v3947_v10  ;;  %v8767_v38 = vmul.f32 0.00390625, %v3435_v30  ;;  %v9715_v59 = vld [vmem:[#allocation21_spill] sm:$0xff] }
 0x474   :  { %v8769_v60 = vpop.eup %5609  ;;  %5613 = vrsqrt.f32 %v3802_v3  ;;  %v4085_v24 = vsub.f32 %v8545_v15, %v4010_v17  ;;  %v4147_v40 = vadd.f32 %v4083_v13, %v3944_v43  ;;  %v3707_v28 = vmul.f32 %v8763_v41, %v8763_v41  ;;  %v3441_v44 = vpop.xlane.xlu1 %3440 }
 0x475   :  { %v4212_v27 = vmax.f32 %v4148_v7, 0.0  ;;  %v4214_v11 = vmax.f32 %v4150_v37, 0.0  ;;  %v3675_v62 = vmul.f32 0.00390625, %v3625_v54  ;;  %v3708_v45 = vmul.f32 %v8767_v38, %v8767_v38  ;;  %v9713_v54 = vld [vmem:[#allocation23_spill] sm:$0xff] }
 0x476   :  { %v4149_v14 = vadd.f32 %v4085_v24, %v3946_v23  ;;  %v4211_v21 = vmax.f32 %v4147_v40, 0.0  ;;  %v3676_v33 = vmul.f32 0.00390625, %v3628_v47  ;;  %v3885_v57 = vmul.f32 %v8706_v12, %v8533_v35  ;;  %v3631_v39 = vpop.xlane.xlu0 %3630 }
 0x477   :  { %v4264_v22 = vpack.c.bf16 %v4214_v11, %v4212_v27  ;;  %v3739_v8 = vsub.f32 %v3675_v62, %v3707_v28  ;;  %v3887_v30 = vmul.f32 %v8712_v25, %v8533_v35  ;;  %v3884_v9 = vmul.f32 %v8706_v12, %v8530_v2 }
 0x478   :  { %v4213_v52 = vmax.f32 %v4149_v14, 0.0  ;;  %v3740_v51 = vsub.f32 %v3676_v33, %v3708_v45  ;;  %v3949_v58 = vmul.f32 %v9712_v20, %v3885_v57  ;;  %v4013_v50 = vmul.f32 %v3885_v57, %v8640_v29  ;;  %v3634_v49 = vpop.xlane.xlu1 %3633 }
 0x479   :  { %4498 = vmatprep.mubr.bf16.mxu1 %v4264_v22  ;;  %v3771_v10 = vmax.f32 %v3739_v8, 0.0  ;;  %v3951_v18 = vmul.f32 %v9713_v54, %v3887_v30  ;;  %v4015_v46 = vmul.f32 %v3887_v30, %v8644_v0  ;;  %v3886_v63 = vmul.f32 %v8712_v25, %v8530_v2 }
 0x47a   :  { %v4263_v34 = vpack.c.bf16 %v4213_v52, %v4211_v21  ;;  %v3772_v19 = vmax.f32 %v3740_v51, 0.0  ;;  %v4088_v12 = vsub.f32 %v8550_v36, %v4013_v50  ;;  %v3948_v43 = vmul.f32 %v9714_v56, %v3884_v9  ;;  %v3444_v25 = vpop.xlane.xlu0 %3443 }
 0x47b   :  { %v3803_v42 = vadd.f32 1e-05, %v3771_v10  ;;  %v4090_v47 = vsub.f32 %v8550_v36, %v4015_v46  ;;  %v3950_v5 = vmul.f32 %v9715_v59, %v3886_v63  ;;  %v4012_v16 = vmul.f32 %v3884_v9, %v8640_v29  ;;  %v9719_v59 = vld [vmem:[#allocation25_spill] sm:$0xff] }
 0x47c   :  { %4499 = vmatmul.mubr.bf16.gmra.mrb[120].mxu1 %v4263_v34  ;;  %v3804_v23 = vadd.f32 1e-05, %v3772_v19  ;;  %v4152_v3 = vadd.f32 %v4088_v12, %v3949_v58  ;;  %v4014_v17 = vmul.f32 %v3886_v63, %v8644_v0  ;;  %v8794_v13 = vmul.f32 0.00390625, %v3438_v4  ;;  %v3447_v28 = vpop.xlane.xlu1 %3446  ;;  %v9717_v58 = vld [vmem:[#allocation27_spill] sm:$0xff] }
 0x47d   :  { %v8796_v7 = vpop.eup %5611  ;;  %5615 = vrsqrt.f32 %v3803_v42  ;;  %v4154_v37 = vadd.f32 %v4090_v47, %v3951_v18  ;;  %v4087_v24 = vsub.f32 %v8545_v15, %v4012_v16  ;;  %v8799_v40 = vmul.f32 0.00390625, %v3441_v44 }
 0x47e   :  { %v8801_v27 = vpop.eup %5613  ;;  %5617 = vrsqrt.f32 %v3804_v23  ;;  %v4216_v29 = vmax.f32 %v4152_v3, 0.0  ;;  %v4089_v11 = vsub.f32 %v8545_v15, %v4014_v17  ;;  %v3709_v0 = vmul.f32 %v8794_v13, %v8794_v13  ;;  %v3637_v10 = vpop.xlane.xlu0 %3636 }
 0x47f   :  { %v4218_v4 = vmax.f32 %v4154_v37, 0.0  ;;  %v4151_v62 = vadd.f32 %v4087_v24, %v3948_v43  ;;  %v3677_v45 = vmul.f32 0.00390625, %v3631_v39  ;;  %v3710_v14 = vmul.f32 %v8799_v40, %v8799_v40  ;;  %v9716_v39 = vld [vmem:[#allocation22_spill] sm:$0xff] }
 0x480   :  { %v4153_v21 = vadd.f32 %v4089_v11, %v3950_v5  ;;  %v3678_v33 = vmul.f32 0.00390625, %v3634_v49  ;;  %v3889_v44 = vmul.f32 %v8732_v1, %v8533_v35  ;;  %v3891_v57 = vmul.f32 %v8740_v26, %v8533_v35  ;;  %v3640_v63 = vpop.xlane.xlu1 %3639 }
 0x481   :  { %v4266_v22 = vpack.c.bf16 %v4218_v4, %v4216_v29  ;;  %v4215_v8 = vmax.f32 %v4151_v62, 0.0  ;;  %v3741_v30 = vsub.f32 %v3677_v45, %v3709_v0  ;;  %v3888_v9 = vmul.f32 %v8732_v1, %v8530_v2  ;;  %v9718_v1 = vld [vmem:[#allocation20_spill] sm:$0xff] }
 0x482   :  { %v4217_v52 = vmax.f32 %v4153_v21, 0.0  ;;  %v3742_v51 = vsub.f32 %v3678_v33, %v3710_v14  ;;  %v3953_v20 = vmul.f32 %v9716_v39, %v3889_v44  ;;  %v3955_v50 = vmul.f32 %v9717_v58, %v3891_v57  ;;  %v3450_v4 = vpop.xlane.xlu0 %3449  ;;  %v9720_v39 = vld [vmem:[#allocation26_spill] sm:$0xff] }
 0x483   :  { %4506 = vmatprep.mubr.bf16.mxu1 %v4266_v22  ;;  %v3773_v49 = vmax.f32 %v3741_v30, 0.0  ;;  %v4017_v54 = vmul.f32 %v3889_v44, %v8664_v31  ;;  %v4019_v18 = vmul.f32 %v3891_v57, %v8669_v53  ;;  %v3890_v46 = vmul.f32 %v8740_v26, %v8530_v2 }
 0x484   :  { %v4265_v34 = vpack.c.bf16 %v4217_v52, %v4215_v8  ;;  %v3774_v19 = vmax.f32 %v3742_v51, 0.0  ;;  %v3952_v12 = vmul.f32 %v9718_v1, %v3888_v9  ;;  %v4016_v56 = vmul.f32 %v3888_v9, %v8664_v31  ;;  %v3453_v21 = vpop.xlane.xlu1 %3452 }
 0x485   :  { %v3805_v43 = vadd.f32 1e-05, %v3773_v49  ;;  %v4092_v42 = vsub.f32 %v8550_v36, %v4017_v54  ;;  %v4094_v47 = vsub.f32 %v8550_v36, %v4019_v18  ;;  %v3954_v5 = vmul.f32 %v9719_v59, %v3890_v46 }
 0x486   :  { %4507 = vmatmul.mubr.bf16.gmra.mrb[124].mxu1 %v4265_v34  ;;  %v3806_v16 = vadd.f32 1e-05, %v3774_v19  ;;  %v4018_v23 = vmul.f32 %v3890_v46, %v8669_v53  ;;  %v4091_v26 = vsub.f32 %v8545_v15, %v4016_v56  ;;  %v8827_v3 = vmul.f32 0.00390625, %v3444_v25  ;;  %v3643_v1 = vpop.xlane.xlu0 %3642 }
 0x487   :  { %v8829_v17 = vpop.eup %5615  ;;  %5619 = vrsqrt.f32 %v3805_v43  ;;  %v4156_v37 = vadd.f32 %v4092_v42, %v3953_v20  ;;  %v4158_v31 = vadd.f32 %v4094_v47, %v3955_v50  ;;  %v8831_v24 = vmul.f32 0.00390625, %v3447_v28  ;;  %v9723_v43 = vld [vmem:[#allocation29_spill] sm:$0xff] }
 0x488   :  { %v8833_v29 = vpop.eup %5617  ;;  %5621 = vrsqrt.f32 %v3806_v16  ;;  %v4093_v11 = vsub.f32 %v8545_v15, %v4018_v23  ;;  %v4155_v0 = vadd.f32 %v4091_v26, %v3952_v12  ;;  %v3711_v53 = vmul.f32 %v8827_v3, %v8827_v3  ;;  %v3646_v59 = vpop.xlane.xlu1 %3645 }
 0x489   :  { %v4220_v62 = vmax.f32 %v4156_v37, 0.0  ;;  %v4222_v25 = vmax.f32 %v4158_v31, 0.0  ;;  %v3679_v45 = vmul.f32 0.00390625, %v3637_v10  ;;  %v3712_v14 = vmul.f32 %v8831_v24, %v8831_v24  ;;  %v9721_v10 = vld [vmem:[#allocation31_spill] sm:$0xff] }
 0x48a   :  { %v4157_v33 = vadd.f32 %v4093_v11, %v3954_v5  ;;  %v4219_v28 = vmax.f32 %v4155_v0, 0.0  ;;  %v3680_v44 = vmul.f32 0.00390625, %v3640_v63  ;;  %v3893_v57 = vmul.f32 %v8765_v32, %v8533_v35 }
 0x48b   :  { %v4268_v22 = vpack.c.bf16 %v4222_v25, %v4220_v62  ;;  %v3743_v8 = vsub.f32 %v3679_v45, %v3711_v53  ;;  %v3895_v30 = vmul.f32 %v8769_v60, %v8533_v35  ;;  %v3892_v9 = vmul.f32 %v8765_v32, %v8530_v2  ;;  %v9722_v32 = vld [vmem:[#allocation24_spill] sm:$0xff] }
 0x48c   :  { %v4221_v52 = vmax.f32 %v4157_v33, 0.0  ;;  %v3744_v51 = vsub.f32 %v3680_v44, %v3712_v14  ;;  %v3957_v20 = vmul.f32 %v9720_v39, %v3893_v57  ;;  %v4021_v58 = vmul.f32 %v3893_v57, %v8694_v48  ;;  %v3456_v44 = vpop.xlane.xlu0 %3455  ;;  %v9724_v39 = vld [vmem:[#allocation30_spill] sm:$0xff] }
 0x48d   :  { %4514 = vmatprep.mubr.bf16.mxu1 %v4268_v22  ;;  %v3775_v50 = vmax.f32 %v3743_v8, 0.0  ;;  %v3959_v49 = vmul.f32 %v9721_v10, %v3895_v30  ;;  %v4023_v54 = vmul.f32 %v3895_v30, %v8700_v61  ;;  %v3894_v18 = vmul.f32 %v8769_v60, %v8530_v2 }
 0x48e   :  { %v4267_v46 = vpack.c.bf16 %v4221_v52, %v4219_v28  ;;  %v3776_v63 = vmax.f32 %v3744_v51, 0.0  ;;  %v4096_v34 = vsub.f32 %v8550_v36, %v4021_v58  ;;  %v3956_v19 = vmul.f32 %v9722_v32, %v3892_v9  ;;  %v9725_v58 = vld [vmem:[#allocation41_spill] sm:$0xff] }
 0x48f   :  { %v3807_v12 = vadd.f32 1e-05, %v3775_v50  ;;  %v4098_v56 = vsub.f32 %v8550_v36, %v4023_v54  ;;  %v3958_v42 = vmul.f32 %v9723_v43, %v3894_v18  ;;  %v4020_v47 = vmul.f32 %v3892_v9, %v8694_v48  ;;  %v3459_v9 = vpop.xlane.xlu1 %3458 }
 0x490   :  { %4515 = vmatmul.mubr.bf16.gmra.mrb[128].mxu1 %v4267_v46  ;;  %v3808_v5 = vadd.f32 1e-05, %v3776_v63  ;;  %v4160_v16 = vadd.f32 %v4096_v34, %v3957_v20  ;;  %v4022_v60 = vmul.f32 %v3894_v18, %v8700_v61  ;;  %v8858_v23 = vmul.f32 0.00390625, %v3450_v4  ;;  %v9726_v34 = vld [vmem:[#allocation28_spill] sm:$0xff] }
 0x491   :  { %v8860_v26 = vpop.eup %5619  ;;  %5623 = vrsqrt.f32 %v3807_v12  ;;  %v4162_v37 = vadd.f32 %v4098_v56, %v3959_v49  ;;  %v4095_v31 = vsub.f32 %v8545_v15, %v4020_v47  ;;  %v8863_v11 = vmul.f32 0.00390625, %v3453_v21  ;;  %v9727_v56 = vld [vmem:[#allocation37_spill] sm:$0xff] }
 0x492   :  { %v8865_v0 = vpop.eup %5621  ;;  %5625 = vrsqrt.f32 %v3808_v5  ;;  %v4224_v48 = vmax.f32 %v4160_v16, 0.0  ;;  %v4097_v53 = vsub.f32 %v8545_v15, %v4022_v60  ;;  %v3713_v62 = vmul.f32 %v8858_v23, %v8858_v23  ;;  %v3649_v5 = vpop.xlane.xlu0 %3648 }
 0x493   :  { %v4226_v61 = vmax.f32 %v4162_v37, 0.0  ;;  %v4159_v4 = vadd.f32 %v4095_v31, %v3956_v19  ;;  %v3681_v25 = vmul.f32 0.00390625, %v3643_v1  ;;  %v3714_v45 = vmul.f32 %v8863_v11, %v8863_v11  ;;  %v3652_v31 = vpop.xlane.xlu1 %3651 }
 0x494   :  { %v4161_v14 = vadd.f32 %v4097_v53, %v3958_v42  ;;  %v3682_v33 = vmul.f32 0.00390625, %v3646_v59  ;;  %v3897_v21 = vmul.f32 %v8796_v7, %v8533_v35  ;;  %v3899_v28 = vmul.f32 %v8801_v27, %v8533_v35 }
 0x495   :  { %v4270_v57 = vpack.c.bf16 %v4226_v61, %v4224_v48  ;;  %v4223_v22 = vmax.f32 %v4159_v4, 0.0  ;;  %v3745_v8 = vsub.f32 %v3681_v25, %v3713_v62  ;;  %v3896_v30 = vmul.f32 %v8796_v7, %v8530_v2 }
 0x496   :  { %v4225_v52 = vmax.f32 %v4161_v14, 0.0  ;;  %v3746_v51 = vsub.f32 %v3682_v33, %v3714_v45  ;;  %v3961_v20 = vmul.f32 %v9724_v39, %v3897_v21  ;;  %v3963_v50 = vmul.f32 %v9725_v58, %v3899_v28  ;;  %v9729_v58 = vld [vmem:[#allocation117_spill] sm:$0xff] }
 0x497   :  { %4522 = vmatprep.mubr.bf16.mxu1 %v4270_v57  ;;  %v3777_v10 = vmax.f32 %v3745_v8, 0.0  ;;  %v4025_v49 = vmul.f32 %v3897_v21, %v8730_v6  ;;  %v4027_v54 = vmul.f32 %v3899_v28, %v8735_v55  ;;  %v3898_v18 = vmul.f32 %v8801_v27, %v8530_v2 }
 0x498   :  { %v4269_v46 = vpack.c.bf16 %v4225_v52, %v4223_v22  ;;  %v3778_v63 = vmax.f32 %v3746_v51, 0.0  ;;  %v3960_v7 = vmul.f32 %v9726_v34, %v3896_v30  ;;  %v4024_v32 = vmul.f32 %v3896_v30, %v8730_v6  ;;  %v9728_v52 = vld [vmem:[#allocation38_spill] sm:$0xff] }
 0x499   :  { %v3809_v19 = vadd.f32 1e-05, %v3777_v10  ;;  %v4100_v1 = vsub.f32 %v8550_v36, %v4025_v49  ;;  %v4102_v12 = vsub.f32 %v8550_v36, %v4027_v54  ;;  %v3962_v43 = vmul.f32 %v9727_v56, %v3898_v18 }
 0x49a   :  { %4523 = vmatmul.mubr.bf16.gmra.mrb[132].mxu1 %v4269_v46  ;;  %v3810_v42 = vadd.f32 1e-05, %v3778_v63  ;;  %v4026_v47 = vmul.f32 %v3898_v18, %v8735_v55  ;;  %v4099_v59 = vsub.f32 %v8545_v15, %v4024_v32  ;;  %v8891_v27 = vmul.f32 0.00390625, %v3456_v44  ;;  %v9731_v32 = vld [vmem:[#allocation110_spill] sm:$0xff] }
 0x49b   :  { %v8893_v16 = vpop.eup %5623  ;;  %5627 = vrsqrt.f32 %v3809_v19  ;;  %v4164_v6 = vadd.f32 %v4100_v1, %v3961_v20  ;;  %v4166_v60 = vadd.f32 %v4102_v12, %v3963_v50  ;;  %v8895_v37 = vmul.f32 0.00390625, %v3459_v9 }
 0x49c   :  { %v8897_v48 = vpop.eup %5625  ;;  %5629 = vrsqrt.f32 %v3810_v42  ;;  %v4101_v53 = vsub.f32 %v8545_v15, %v4026_v47  ;;  %v4163_v62 = vadd.f32 %v4099_v59, %v3960_v7  ;;  %v3715_v55 = vmul.f32 %v8891_v27, %v8891_v27 }
 0x49d   :  { %v4228_v61 = vmax.f32 %v4164_v6, 0.0  ;;  %v4230_v4 = vmax.f32 %v4166_v60, 0.0  ;;  %v3683_v25 = vmul.f32 0.00390625, %v3649_v5  ;;  %v3716_v45 = vmul.f32 %v8895_v37, %v8895_v37 }
 0x49e   :  { %v4165_v14 = vadd.f32 %v4101_v53, %v3962_v43  ;;  %v4227_v33 = vmax.f32 %v4163_v62, 0.0  ;;  %v3684_v21 = vmul.f32 0.00390625, %v3652_v31  ;;  %v3901_v28 = vmul.f32 %v8829_v17, %v8533_v35  ;;  %v9732_v31 = vld [vmem:[#allocation35_spill] sm:$0xff] }
 0x49f   :  { %v4272_v44 = vpack.c.bf16 %v4230_v4, %v4228_v61  ;;  %v3747_v57 = vsub.f32 %v3683_v25, %v3715_v55  ;;  %v3903_v22 = vmul.f32 %v8833_v29, %v8533_v35  ;;  %v3900_v8 = vmul.f32 %v8829_v17, %v8530_v2  ;;  %v9730_v17 = vld [vmem:[#allocation34_spill] sm:$0xff]  ;;  %v9733_v55 = vld [vmem:[#allocation48_spill] sm:$0xff] }
 0x4a0   :  { %v4229_v30 = vmax.f32 %v4165_v14, 0.0  ;;  %v3748_v9 = vsub.f32 %v3684_v21, %v3716_v45  ;;  %v3965_v51 = vmul.f32 %v9728_v52, %v3901_v28  ;;  %v4029_v39 = vmul.f32 %v3901_v28, %v8763_v41  ;;  %v9735_v52 = vld [vmem:[#allocation33_spill] sm:$0xff] }
 0x4a1   :  { %4530 = vmatprep.mubr.bf16.mxu1 %v4272_v44  ;;  %v3779_v20 = vmax.f32 %v3747_v57, 0.0  ;;  %v3967_v50 = vmul.f32 %v9729_v58, %v3903_v22  ;;  %v4031_v10 = vmul.f32 %v3903_v22, %v8767_v38  ;;  %v3902_v49 = vmul.f32 %v8833_v29, %v8530_v2 }
 0x4a2   :  { %v4271_v54 = vpack.c.bf16 %v4229_v30, %v4227_v33  ;;  %v3780_v18 = vmax.f32 %v3748_v9, 0.0  ;;  %v4104_v46 = vsub.f32 %v8550_v36, %v4029_v39  ;;  %v3964_v63 = vmul.f32 %v9730_v17, %v3900_v8  ;;  %v9734_v30 = vld [vmem:[#allocation111_spill] sm:$0xff] }
 0x4a3   :  { %v3811_v34 = vadd.f32 1e-05, %v3779_v20  ;;  %v4106_v7 = vsub.f32 %v8550_v36, %v4031_v10  ;;  %v3966_v19 = vmul.f32 %v9731_v32, %v3902_v49  ;;  %v4028_v1 = vmul.f32 %v3900_v8, %v8763_v41  ;;  %v9736_v10 = vld [vmem:[#allocation115_spill] sm:$0xff] }
 0x4a4   :  { %4531 = vmatmul.mubr.bf16.gmra.mrb[136].mxu1 %v4271_v54  ;;  %v3812_v12 = vadd.f32 1e-05, %v3780_v18  ;;  %v4168_v56 = vadd.f32 %v4104_v46, %v3965_v51  ;;  %v4030_v43 = vmul.f32 %v3902_v49, %v8767_v38  ;;  %v3905_v29 = vmul.f32 %v8860_v26, %v8533_v35 }
 0x4a5   :  { %v8924_v42 = vpop.eup %5627  ;;  %5631 = vrsqrt.f32 %v3811_v34  ;;  %v4170_v47 = vadd.f32 %v4106_v7, %v3967_v50  ;;  %v4103_v59 = vsub.f32 %v8545_v15, %v4028_v1  ;;  %v3907_v5 = vmul.f32 %v8865_v0, %v8533_v35 }
 0x4a6   :  { %v8929_v6 = vpop.eup %5629  ;;  %5633 = vrsqrt.f32 %v3812_v12  ;;  %v4232_v41 = vmax.f32 %v4168_v56, 0.0  ;;  %v4105_v60 = vsub.f32 %v8545_v15, %v4030_v43  ;;  %v3969_v38 = vmul.f32 %v9732_v31, %v3905_v29 }
 0x4a7   :  { %v4234_v53 = vmax.f32 %v4170_v47, 0.0  ;;  %v4167_v62 = vadd.f32 %v4103_v59, %v3964_v63  ;;  %v3971_v61 = vmul.f32 %v9733_v55, %v3907_v5  ;;  %v4033_v4 = vmul.f32 %v3905_v29, %v8794_v13  ;;  %v9737_v63 = vld [vmem:[#allocation40_spill] sm:$0xff] }
 0x4a8   :  { %v4169_v25 = vadd.f32 %v4105_v60, %v3966_v19  ;;  %v4035_v45 = vmul.f32 %v3907_v5, %v8799_v40  ;;  %v3904_v14 = vmul.f32 %v8860_v26, %v8530_v2  ;;  %v3906_v33 = vmul.f32 %v8865_v0, %v8530_v2 }
 0x4a9   :  { %v4274_v21 = vpack.c.bf16 %v4234_v53, %v4232_v41  ;;  %v4231_v28 = vmax.f32 %v4167_v62, 0.0  ;;  %v4108_v44 = vsub.f32 %v8550_v36, %v4033_v4  ;;  %v3909_v57 = vmul.f32 %v8893_v16, %v8533_v35  ;;  %v9738_v41 = vld [vmem:[#allocation32_spill] sm:$0xff] }
 0x4aa   :  { %v4233_v22 = vmax.f32 %v4169_v25, 0.0  ;;  %v4110_v8 = vsub.f32 %v8550_v36, %v4035_v45  ;;  %v3968_v9 = vmul.f32 %v9734_v30, %v3904_v14  ;;  %v3970_v51 = vmul.f32 %v9735_v52, %v3906_v33  ;;  %v9739_v53 = vld [vmem:[#allocation36_spill] sm:$0xff] }
 0x4ab   :  { %4538 = vmatprep.mubr.bf16.mxu1 %v4274_v21  ;;  %v4172_v39 = vadd.f32 %v4108_v44, %v3969_v38  ;;  %v4032_v26 = vmul.f32 %v3904_v14, %v8794_v13  ;;  %v4034_v0 = vmul.f32 %v3906_v33, %v8799_v40  ;;  %v3911_v20 = vmul.f32 %v8897_v48, %v8533_v35  ;;  %v9740_v14 = vld [vmem:[#allocation118_spill] sm:$0xff] }
 0x4ac   :  { %v4273_v58 = vpack.c.bf16 %v4233_v22, %v4231_v28  ;;  %v4174_v50 = vadd.f32 %v4110_v8, %v3971_v61  ;;  %v3973_v49 = vmul.f32 %v9736_v10, %v3909_v57  ;;  %v4037_v54 = vmul.f32 %v3909_v57, %v8827_v3  ;;  %v9741_v57 = vld [vmem:[#allocation112_spill] sm:$0xff] }
 0x4ad   :  { %v4236_v18 = vmax.f32 %v4172_v39, 0.0  ;;  %v4107_v46 = vsub.f32 %v8545_v15, %v4032_v26  ;;  %v4109_v17 = vsub.f32 %v8545_v15, %v4034_v0  ;;  %v3975_v34 = vmul.f32 %v9737_v63, %v3911_v20 }
 0x4ae   :  { %4539 = vmatmul.mubr.bf16.gmra.mrb[140].mxu1 %v4273_v58  ;;  %v4238_v13 = vmax.f32 %v4174_v50, 0.0  ;;  %v4039_v40 = vmul.f32 %v3911_v20, %v8831_v24  ;;  %v4112_v7 = vsub.f32 %v8550_v36, %v4037_v54  ;;  %v3908_v32 = vmul.f32 %v8893_v16, %v8530_v2  ;;  %v9742_v58 = vld [vmem:[#allocation116_spill] sm:$0xff] }
 0x4af   :  { %v5632_v19 = vpop.eup %5631  ;;  %v4171_v1 = vadd.f32 %v4107_v46, %v3968_v9  ;;  %v4173_v12 = vadd.f32 %v4109_v17, %v3970_v51  ;;  %v3910_v56 = vmul.f32 %v8897_v48, %v8530_v2  ;;  %v3913_v43 = vmul.f32 %v8924_v42, %v8533_v35 }
 0x4b0   :  { %v5634_v29 = vpop.eup %5633  ;;  %v4276_v47 = vpack.c.bf16 %v4238_v13, %v4236_v18  ;;  %v4114_v59 = vsub.f32 %v8550_v36, %v4039_v40  ;;  %v4176_v5 = vadd.f32 %v4112_v7, %v3973_v49  ;;  %v3972_v60 = vmul.f32 %v9738_v41, %v3908_v32 }
 0x4b1   :  { %v4235_v31 = vmax.f32 %v4171_v1, 0.0  ;;  %v4237_v38 = vmax.f32 %v4173_v12, 0.0  ;;  %v3974_v16 = vmul.f32 %v9739_v53, %v3910_v56  ;;  %v4036_v62 = vmul.f32 %v3908_v32, %v8827_v3  ;;  %v9744_v32 = vld [vmem:[#allocation47_spill] sm:$0xff] }
 0x4b2   :  { %4546 = vmatprep.mubr.bf16.mxu1 %v4276_v47  ;;  %v4178_v55 = vadd.f32 %v4114_v59, %v3975_v34  ;;  %v4240_v61 = vmax.f32 %v4176_v5, 0.0  ;;  %v4038_v48 = vmul.f32 %v3910_v56, %v8831_v24  ;;  %v3915_v4 = vmul.f32 %v8929_v6, %v8533_v35  ;;  %v9745_v59 = vld [vmem:[#allocation53_spill] sm:$0xff] }
 0x4b3   :  { %v4275_v25 = vpack.c.bf16 %v4237_v38, %v4235_v31  ;;  %v4111_v45 = vsub.f32 %v8545_v15, %v4036_v62  ;;  %v3977_v33 = vmul.f32 %v9740_v14, %v3913_v43  ;;  %v4041_v21 = vmul.f32 %v3913_v43, %v8858_v23 }
 0x4b4   :  { %v4242_v28 = vmax.f32 %v4178_v55, 0.0  ;;  %v4113_v44 = vsub.f32 %v8545_v15, %v4038_v48  ;;  %v3979_v3 = vmul.f32 %v9741_v57, %v3915_v4  ;;  %v4043_v22 = vmul.f32 %v3915_v4, %v8863_v11 }
 0x4b5   :  { %v4175_v8 = vadd.f32 %v4111_v45, %v3972_v60  ;;  %v4116_v24 = vsub.f32 %v8550_v36, %v4041_v21  ;;  %v3912_v30 = vmul.f32 %v8924_v42, %v8530_v2  ;;  %v3914_v9 = vmul.f32 %v8929_v6, %v8530_v2  ;;  %v9743_v6 = vld [vmem:[#allocation45_spill] sm:$0xff] }
 0x4b6   :  { %4547 = vmatmul.mubr.bf16.gmra.mrb[144].mxu1 %v4275_v25  ;;  %v4278_v52 = vpack.c.bf16 %v4242_v28, %v4240_v61  ;;  %v4177_v51 = vadd.f32 %v4113_v44, %v3974_v16  ;;  %v4118_v39 = vsub.f32 %v8550_v36, %v4043_v22  ;;  %v3917_v26 = vmul.f32 %v5632_v19, %v8533_v35  ;;  %v9007_v44 = vld [vmem:[%s9109_s10] ss:$0 sm:$0xff] }
 0x4b7   :  { %v4239_v0 = vmax.f32 %v4175_v8, 0.0  ;;  %v4180_v20 = vadd.f32 %v4116_v24, %v3977_v33  ;;  %v3976_v50 = vmul.f32 %v9742_v58, %v3912_v30  ;;  %v4040_v54 = vmul.f32 %v3912_v30, %v8858_v23 }
 0x4b8   :  { %4554 = vmatprep.mubr.bf16.mxu1 %v4278_v52  ;;  %v4241_v10 = vmax.f32 %v4177_v51, 0.0  ;;  %v4182_v49 = vadd.f32 %v4118_v39, %v3979_v3  ;;  %v4042_v42 = vmul.f32 %v3914_v9, %v8863_v11  ;;  %v3978_v46 = vmul.f32 %v9743_v6, %v3914_v9 }
 0x4b9   :  { %v4244_v18 = vmax.f32 %v4180_v20, 0.0  ;;  %v3919_v17 = vmul.f32 %v5634_v29, %v8533_v35  ;;  %v4045_v63 = vmul.f32 %v3917_v26, %v8891_v27  ;;  %v4115_v40 = vsub.f32 %v8545_v15, %v4040_v54 }
 0x4ba   :  { %v4277_v34 = vpack.c.bf16 %v4241_v10, %v4239_v0  ;;  %v4246_v13 = vmax.f32 %v4182_v49, 0.0  ;;  %v4117_v7 = vsub.f32 %v8545_v15, %v4042_v42  ;;  %v3981_v1 = vmul.f32 %v9744_v32, %v3917_v26 }
 0x4bb   :  { %v4047_v12 = vmul.f32 %v3919_v17, %v8895_v37  ;;  %v4120_v23 = vsub.f32 %v8550_v36, %v4045_v63  ;;  %v3916_v11 = vmul.f32 %v5632_v19, %v8530_v2  ;;  %v4179_v43 = vadd.f32 %v4115_v40, %v3976_v50  ;;  %v9746_v19 = vld [vmem:[#allocation50_spill] sm:$0xff] }
 0x4bc   :  { %v4280_v56 = vpack.c.bf16 %v4246_v13, %v4244_v18  ;;  %v4181_v47 = vadd.f32 %v4117_v7, %v3978_v46  ;;  %v3918_v35 = vmul.f32 %v5634_v29, %v8530_v2  ;;  %v3983_v5 = vmul.f32 %v9745_v59, %v3919_v17 }
 0x4bd   :  { %v4122_v41 = vsub.f32 %v8550_v36, %v4047_v12  ;;  %v4184_v60 = vadd.f32 %v4120_v23, %v3981_v1  ;;  %v4044_v31 = vmul.f32 %v3916_v11, %v8891_v27  ;;  %v4243_v62 = vmax.f32 %v4179_v43, 0.0  ;;  %v9747_v36 = vld [vmem:[#allocation113_spill] sm:$0xff]  ;;  %v9022_v12 = vld [vmem:[%s9110_s11] sm:$0x1] }
 0x4be   :  { %4555 = vmatmul.mubr.bf16.gmra.mrb[148].mxu1 %v4277_v34  ;;  %v4245_v38 = vmax.f32 %v4181_v47, 0.0  ;;  %v4046_v53 = vmul.f32 %v3918_v35, %v8895_v37  ;;  %v3982_v55 = vmul.f32 %v9746_v19, %v3918_v35  ;;  %v3980_v25 = vmul.f32 %v9747_v36, %v3916_v11 }
 0x4bf   :  { %4562 = vmatprep.mubr.bf16.mxu1 %v4280_v56  ;;  %v4186_v16 = vadd.f32 %v4122_v41, %v3983_v5  ;;  %v4119_v61 = vsub.f32 %v8545_v15, %v4044_v31  ;;  %v4248_v29 = vmax.f32 %v4184_v60, 0.0  ;;  %v5645_v41 = vmov 0  }
 0x4c0   :  { %v4121_v2 = vsub.f32 %v8545_v15, %v4046_v53  ;;  %v4279_v4 = vpack.c.bf16 %v4245_v38, %v4243_v62  ;;  %5250 = vset.pattern.permute.xlu0 %v5645_v41  ;;  %v18_v60 = vstv %s9111_s12 }
 0x4c1   :  { %v4250_v48 = vmax.f32 %v4186_v16, 0.0  ;;  %v4183_v14 = vadd.f32 %v4119_v61, %v3980_v25  ;;  %19 = vst [vmem:[#allocation2] sm:$0x1] %v18_v60 }
 0x4c2   :  { %v4185_v45 = vadd.f32 %v4121_v2, %v3982_v55 }
 0x4c3   :  { %v4282_v27 = vpack.c.bf16 %v4250_v48, %v4248_v29  ;;  %v4247_v37 = vmax.f32 %v4183_v14, 0.0 }
 0x4c4   :  { %v4249_v33 = vmax.f32 %v4185_v45, 0.0 }
 0x4c6   :  { %4563 = vmatmul.mubr.bf16.gmra.mrb[152].mxu1 %v4279_v4  ;;  %v4281_v21 = vpack.c.bf16 %v4249_v33, %v4247_v37 }
 0x4c7   :  { %4570 = vmatprep.mubr.bf16.mxu1 %v4282_v27 }
 0x4c8   :  { %v4628_v29 = vld [vmem:[#allocation2] sm:$0x1] }
 0x4c9   :  { %4631 = vperm.xlu0 %5250, %v4628_v29  }
 0x4ce   :  { %4571 = vmatmul.mubr.bf16.gmra.mrb[156].mxu1 %v4281_v21 }
 0x4cf   :  { %5078 = vmatprep.mubr.msk.bf16.mxu1 %vm4638_vm0, %v9022_v12 }
 0x50d   :  { %v4966_v28 = vpop.f32.mrb[96].mxu1 }
 0x50e   :  { %v4967_v15 = vpop.f32.mrb[97].mxu1 }
 0x50f   :  { %v4968_v57 = vadd.f32 %v4967_v15, %v4966_v28  ;;  %v4969_v3 = vpop.f32.mrb[98].mxu1 }
 0x510   :  { %v4970_v22 = vpop.f32.mrb[99].mxu1 }
 0x511   :  { %v4453_v8 = vadd.f32 %v4968_v57, %v9007_v44  ;;  %v4971_v24 = vadd.f32 %v4970_v22, %v4969_v3 }
 0x513   :  { %v4456_v30 = vadd.f32 %v4971_v24, %v9007_v44  ;;  %v4579_v9 = vmax.f32 %v4453_v8, 0.0 }
 0x515   :  { %v4580_v52 = vmax.f32 %v4456_v30, 0.0 }
 0x517   :  { %v9011_v51 = vpack.c.bf16 %v4580_v52, %v4579_v9 }
 0x51b   :  { %v4972_v39 = vpop.f32.mrb[100].mxu1 }
 0x51c   :  { %v4973_v26 = vpop.f32.mrb[101].mxu1 }
 0x51d   :  { %v4974_v0 = vadd.f32 %v4973_v26, %v4972_v39  ;;  %v4975_v20 = vpop.f32.mrb[102].mxu1 }
 0x51e   :  { %v4976_v58 = vpop.f32.mrb[103].mxu1 }
 0x51f   :  { %v4461_v50 = vadd.f32 %v4974_v0, %v9007_v44  ;;  %v4977_v10 = vadd.f32 %v4976_v58, %v4975_v20 }
 0x521   :  { %v4464_v49 = vadd.f32 %v4977_v10, %v9007_v44  ;;  %v4581_v54 = vmax.f32 %v4461_v50, 0.0 }
 0x523   :  { %v4582_v42 = vmax.f32 %v4464_v49, 0.0 }
 0x525   :  { %v9015_v18 = vpack.c.bf16 %v4582_v42, %v4581_v54 }
 0x526   :  { %v4978_v6 = vpop.f32.mrb[104].mxu1 }
 0x527   :  { %v4979_v46 = vpop.f32.mrb[105].mxu1 }
 0x528   :  { %v4980_v17 = vadd.f32 %v4979_v46, %v4978_v6  ;;  %v4981_v63 = vpop.f32.mrb[106].mxu1 }
 0x529   :  { %v4982_v34 = vpop.f32.mrb[107].mxu1 }
 0x52a   :  { %v4469_v13 = vadd.f32 %v4980_v17, %v9007_v44  ;;  %v4983_v40 = vadd.f32 %v4982_v34, %v4981_v63 }
 0x52c   :  { %v4472_v7 = vadd.f32 %v4983_v40, %v9007_v44  ;;  %v4583_v32 = vmax.f32 %v4469_v13, 0.0 }
 0x52e   :  { %v4584_v1 = vmax.f32 %v4472_v7, 0.0 }
 0x530   :  { %v9024_v23 = vpack.c.bf16 %v4584_v1, %v4583_v32 }
 0x531   :  { %v4984_v11 = vpop.f32.mrb[108].mxu1 }
 0x532   :  { %v4985_v56 = vpop.f32.mrb[109].mxu1 }
 0x533   :  { %v4986_v43 = vadd.f32 %v4985_v56, %v4984_v11  ;;  %v4987_v47 = vpop.f32.mrb[110].mxu1 }
 0x534   :  { %v4988_v35 = vpop.f32.mrb[111].mxu1 }
 0x535   :  { %v4477_v59 = vadd.f32 %v4986_v43, %v9007_v44  ;;  %v4989_v5 = vadd.f32 %v4988_v35, %v4987_v47 }
 0x537   :  { %v4480_v31 = vadd.f32 %v4989_v5, %v9007_v44  ;;  %v4585_v38 = vmax.f32 %v4477_v59, 0.0 }
 0x539   :  { %v4586_v53 = vmax.f32 %v4480_v31, 0.0 }
 0x53b   :  { %v9033_v16 = vpack.c.bf16 %v4586_v53, %v4585_v38  ;;  %v4990_v62 = vpop.f32.mrb[112].mxu1 }
 0x53c   :  { %v4991_v19 = vpop.f32.mrb[113].mxu1 }
 0x53d   :  { %v4992_v55 = vadd.f32 %v4991_v19, %v4990_v62  ;;  %v4993_v61 = vpop.f32.mrb[114].mxu1 }
 0x53e   :  { %v4994_v2 = vpop.f32.mrb[115].mxu1 }
 0x53f   :  { %v4485_v48 = vadd.f32 %v4992_v55, %v9007_v44  ;;  %v4995_v4 = vadd.f32 %v4994_v2, %v4993_v61  ;;  %v4643_v55 = vsel %vm4638_vm0, %v9011_v51, 0 }
 0x541   :  { %v4488_v36 = vadd.f32 %v4995_v4, %v9007_v44  ;;  %v4587_v25 = vmax.f32 %v4485_v48, 0.0 }
 0x543   :  { %v4588_v45 = vmax.f32 %v4488_v36, 0.0 }
 0x545   :  { %v9037_v27 = vpack.c.bf16 %v4588_v45, %v4587_v25  ;;  %v4996_v14 = vpop.f32.mrb[116].mxu1 }
 0x546   :  { %v4997_v33 = vpop.f32.mrb[117].mxu1 }
 0x547   :  { %v4998_v37 = vadd.f32 %v4997_v33, %v4996_v14  ;;  %v4999_v21 = vpop.f32.mrb[118].mxu1 }
 0x548   :  { %v5000_v28 = vpop.f32.mrb[119].mxu1 }
 0x549   :  { %v4493_v15 = vadd.f32 %v4998_v37, %v9007_v44  ;;  %v5001_v57 = vadd.f32 %v5000_v28, %v4999_v21  ;;  %v4646_v21 = vsel %vm4638_vm0, %v9015_v18, 0 }
 0x54b   :  { %v4496_v3 = vadd.f32 %v5001_v57, %v9007_v44  ;;  %v4589_v22 = vmax.f32 %v4493_v15, 0.0 }
 0x54d   :  { %v4590_v8 = vmax.f32 %v4496_v3, 0.0 }
 0x54f   :  { %v9041_v24 = vpack.c.bf16 %v4590_v8, %v4589_v22  ;;  %v5002_v30 = vpop.f32.mrb[120].mxu1 }
 0x550   :  { %v5003_v9 = vpop.f32.mrb[121].mxu1 }
 0x551   :  { %v5004_v52 = vadd.f32 %v5003_v9, %v5002_v30  ;;  %v5005_v39 = vpop.f32.mrb[122].mxu1 }
 0x552   :  { %v5006_v26 = vpop.f32.mrb[123].mxu1 }
 0x553   :  { %v4501_v0 = vadd.f32 %v5004_v52, %v9007_v44  ;;  %v5007_v20 = vadd.f32 %v5006_v26, %v5005_v39  ;;  %v4649_v26 = vsel %vm4638_vm0, %v9024_v23, 0  ;;  %v4652_v23 = vsel %vm4638_vm0, %v9033_v16, 0 }
 0x555   :  { %v4504_v58 = vadd.f32 %v5007_v20, %v9007_v44  ;;  %v4591_v50 = vmax.f32 %v4501_v0, 0.0 }
 0x557   :  { %v4592_v10 = vmax.f32 %v4504_v58, 0.0 }
 0x559   :  { %v9045_v49 = vpack.c.bf16 %v4592_v10, %v4591_v50  ;;  %v5008_v54 = vpop.f32.mrb[124].mxu1 }
 0x55a   :  { %v5009_v42 = vpop.f32.mrb[125].mxu1 }
 0x55b   :  { %v5010_v6 = vadd.f32 %v5009_v42, %v5008_v54  ;;  %v5011_v46 = vpop.f32.mrb[126].mxu1 }
 0x55c   :  { %v5012_v17 = vpop.f32.mrb[127].mxu1 }
 0x55d   :  { %v4509_v63 = vadd.f32 %v5010_v6, %v9007_v44  ;;  %v5013_v34 = vadd.f32 %v5012_v17, %v5011_v46 }
 0x55f   :  { %v4512_v13 = vadd.f32 %v5013_v34, %v9007_v44  ;;  %v4593_v40 = vmax.f32 %v4509_v63, 0.0 }
 0x561   :  { %v4594_v7 = vmax.f32 %v4512_v13, 0.0 }
 0x563   :  { %v9049_v32 = vpack.c.bf16 %v4594_v7, %v4593_v40  ;;  %v5014_v1 = vpop.f32.mrb[128].mxu1 }
 0x564   :  { %v5015_v11 = vpop.f32.mrb[129].mxu1 }
 0x565   :  { %v5016_v56 = vadd.f32 %v5015_v11, %v5014_v1  ;;  %v5017_v43 = vpop.f32.mrb[130].mxu1 }
 0x566   :  { %v5018_v47 = vpop.f32.mrb[131].mxu1 }
 0x567   :  { %v4517_v35 = vadd.f32 %v5016_v56, %v9007_v44  ;;  %v5019_v59 = vadd.f32 %v5018_v47, %v5017_v43 }
 0x569   :  { %v4520_v5 = vadd.f32 %v5019_v59, %v9007_v44  ;;  %v4595_v41 = vmax.f32 %v4517_v35, 0.0 }
 0x56b   :  { %v4596_v60 = vmax.f32 %v4520_v5, 0.0 }
 0x56d   :  { %v4620_v31 = vpack.c.bf16 %v4596_v60, %v4595_v41  ;;  %v5020_v38 = vpop.f32.mrb[132].mxu1  ;;  %v4655_v60 = vsel %vm4638_vm0, %v9037_v27, 0 }
 0x56e   :  { %v5021_v53 = vpop.f32.mrb[133].mxu1 }
 0x56f   :  { %v5022_v62 = vadd.f32 %v5021_v53, %v5020_v38  ;;  %v5023_v19 = vpop.f32.mrb[134].mxu1  ;;  %5240 = vmatprep.subr.msk.bf16.mxu1 %vm4638_vm0, %v4620_v31 }
 0x570   :  { %v5024_v61 = vpop.f32.mrb[135].mxu1  ;;  %5063 = vmatpush3.bf16.xpose.msra.mxu1 %v4643_v55 }
 0x571   :  { %v4525_v2 = vadd.f32 %v5022_v62, %v9007_v44  ;;  %v5025_v29 = vadd.f32 %v5024_v61, %v5023_v19 }
 0x573   :  { %v4528_v48 = vadd.f32 %v5025_v29, %v9007_v44  ;;  %v4597_v4 = vmax.f32 %v4525_v2, 0.0 }
 0x575   :  { %v4598_v36 = vmax.f32 %v4528_v48, 0.0 }
 0x577   :  { %v4621_v25 = vpack.c.bf16 %v4598_v36, %v4597_v4  ;;  %v5026_v45 = vpop.f32.mrb[136].mxu1  ;;  %v4658_v4 = vsel %vm4638_vm0, %v9041_v24, 0 }
 0x578   :  { %v5027_v14 = vpop.f32.mrb[137].mxu1 }
 0x579   :  { %v5028_v33 = vadd.f32 %v5027_v14, %v5026_v45  ;;  %v5029_v37 = vpop.f32.mrb[138].mxu1  ;;  %5241 = vmatprep.subr.msk.bf16.mxu1 %vm4638_vm0, %v4621_v25 }
 0x57a   :  { %v5030_v51 = vpop.f32.mrb[139].mxu1  ;;  %5065 = vmatpush3.bf16.xpose.msra.mxu1 %v4646_v21 }
 0x57b   :  { %v4533_v28 = vadd.f32 %v5028_v33, %v9007_v44  ;;  %v5031_v15 = vadd.f32 %v5030_v51, %v5029_v37 }
 0x57d   :  { %v4536_v57 = vadd.f32 %v5031_v15, %v9007_v44  ;;  %v4599_v3 = vmax.f32 %v4533_v28, 0.0 }
 0x57f   :  { %v4600_v22 = vmax.f32 %v4536_v57, 0.0  ;;  %v4661_v57 = vsel %vm4638_vm0, %v9045_v49, 0 }
 0x581   :  { %v4622_v8 = vpack.c.bf16 %v4600_v22, %v4599_v3  ;;  %v5032_v30 = vpop.f32.mrb[140].mxu1 }
 0x582   :  { %v5033_v9 = vpop.f32.mrb[141].mxu1 }
 0x583   :  { %v5034_v52 = vadd.f32 %v5033_v9, %v5032_v30  ;;  %v5035_v39 = vpop.f32.mrb[142].mxu1  ;;  %5242 = vmatprep.subr.msk.bf16.mxu1 %vm4638_vm0, %v4622_v8  ;;  %v4664_v30 = vsel %vm4638_vm0, %v9049_v32, 0  ;;  %v4632_v9 = vpop.permute.xlu0 %4631 }
 0x584   :  { %v5036_v18 = vpop.f32.mrb[143].mxu1  ;;  %5067 = vmatpush3.bf16.xpose.msra.mxu1 %v4649_v26 }
 0x585   :  { %v4541_v0 = vadd.f32 %v5034_v52, %v9007_v44  ;;  %v5037_v20 = vadd.f32 %v5036_v18, %v5035_v39  ;;  %v9748_v52 = vld [vmem:[#allocation4_spill] sm:$0xff] }
 0x586   :  { %v4637_v39 = vrot.slane %v4632_v9, %v9748_v52 }
 0x587   :  { %v4544_v58 = vadd.f32 %v5037_v20, %v9007_v44  ;;  %v4601_v50 = vmax.f32 %v4541_v0, 0.0 }
 0x589   :  { %v4602_v10 = vmax.f32 %v4544_v58, 0.0  ;;  %v5038_v54 = vpop.f32.mrb[144].mxu1 }
 0x58a   :  { %v5039_v42 = vpop.f32.mrb[145].mxu1 }
 0x58b   :  { %v4623_v6 = vpack.c.bf16 %v4602_v10, %v4601_v50  ;;  %v5040_v46 = vadd.f32 %v5039_v42, %v5038_v54  ;;  %v5041_v17 = vpop.f32.mrb[146].mxu1 }
 0x58c   :  { %v5042_v63 = vpop.f32.mrb[147].mxu1 }
 0x58d   :  { %v4549_v34 = vadd.f32 %v5040_v46, %v9007_v44  ;;  %v5043_v13 = vadd.f32 %v5042_v63, %v5041_v17  ;;  %5243 = vmatprep.subr.msk.bf16.mxu1 %vm4638_vm0, %v4623_v6  ;;  %v9749_v63 = vld [vmem:[#allocation3_spill] sm:$0xff] }
 0x58e   :  { %5069 = vmatpush3.bf16.xpose.msra.mxu1 %v4652_v23 }
 0x58f   :  { %v4552_v40 = vadd.f32 %v5043_v13, %v9007_v44  ;;  %v4603_v7 = vmax.f32 %v4549_v34, 0.0 }
 0x591   :  { %v4604_v1 = vmax.f32 %v4552_v40, 0.0  ;;  %v5044_v11 = vpop.f32.mrb[148].mxu1 }
 0x592   :  { %v5045_v56 = vpop.f32.mrb[149].mxu1 }
 0x593   :  { %v4624_v43 = vpack.c.bf16 %v4604_v1, %v4603_v7  ;;  %v5046_v47 = vadd.f32 %v5045_v56, %v5044_v11  ;;  %v5047_v35 = vpop.f32.mrb[150].mxu1  ;;  %v9750_v7 = vlaneseq }
 0x594   :  { %v5048_v59 = vpop.f32.mrb[151].mxu1 }
 0x595   :  { %v4557_v5 = vadd.f32 %v5046_v47, %v9007_v44  ;;  %v5049_v41 = vadd.f32 %v5048_v59, %v5047_v35  ;;  %5244 = vmatprep.subr.msk.bf16.mxu1 %vm4638_vm0, %v4624_v43  ;;  %vm4763_vm1 = vcmp.lt.s32.totalorder %v9750_v7, 256 }
 0x596   :  { %5071 = vmatpush3.bf16.xpose.msra.mxu1 %v4655_v60 }
 0x597   :  { %v4560_v16 = vadd.f32 %v5049_v41, %v9007_v44  ;;  %v4605_v31 = vmax.f32 %v4557_v5, 0.0 }
 0x599   :  { %v4606_v38 = vmax.f32 %v4560_v16, 0.0  ;;  %v5050_v53 = vpop.f32.mrb[152].mxu1 }
 0x59a   :  { %v5051_v62 = vpop.f32.mrb[153].mxu1 }
 0x59b   :  { %v4625_v19 = vpack.c.bf16 %v4606_v38, %v4605_v31  ;;  %v5052_v55 = vadd.f32 %v5051_v62, %v5050_v53  ;;  %v5053_v61 = vpop.f32.mrb[154].mxu1 }
 0x59c   :  { %v5054_v2 = vpop.f32.mrb[155].mxu1 }
 0x59d   :  { %v4565_v29 = vadd.f32 %v5052_v55, %v9007_v44  ;;  %v5055_v48 = vadd.f32 %v5054_v2, %v5053_v61  ;;  %5245 = vmatprep.subr.msk.bf16.mxu1 %vm4638_vm0, %v4625_v19 }
 0x59e   :  { %5073 = vmatpush3.bf16.xpose.msra.mxu1 %v4658_v4 }
 0x59f   :  { %v4568_v27 = vadd.f32 %v5055_v48, %v9007_v44  ;;  %v4607_v36 = vmax.f32 %v4565_v29, 0.0 }
 0x5a1   :  { %v4608_v25 = vmax.f32 %v4568_v27, 0.0  ;;  %v5056_v45 = vpop.f32.mrb[156].mxu1 }
 0x5a2   :  { %v5057_v14 = vpop.f32.mrb[157].mxu1 }
 0x5a3   :  { %v4626_v33 = vpack.c.bf16 %v4608_v25, %v4607_v36  ;;  %v5058_v37 = vadd.f32 %v5057_v14, %v5056_v45  ;;  %v5059_v21 = vpop.f32.mrb[158].mxu1 }
 0x5a4   :  { %v5060_v51 = vpop.f32.mrb[159].mxu1 }
 0x5a5   :  { %v4573_v28 = vadd.f32 %v5058_v37, %v9007_v44  ;;  %v5061_v15 = vadd.f32 %v5060_v51, %v5059_v21  ;;  %5246 = vmatprep.subr.msk.bf16.mxu1 %vm4638_vm0, %v4626_v33 }
 0x5a6   :  { %5075 = vmatpush3.bf16.xpose.msra.mxu1 %v4661_v57 }
 0x5a7   :  { %v4576_v24 = vadd.f32 %v5061_v15, %v9007_v44  ;;  %v4609_v3 = vmax.f32 %v4573_v28, 0.0 }
 0x5a9   :  { %v4610_v22 = vmax.f32 %v4576_v24, 0.0 }
 0x5ab   :  { %v4627_v8 = vpack.c.bf16 %v4610_v22, %v4609_v3 }
 0x5ad   :  { %5247 = vmatprep.subr.msk.bf16.mxu1 %vm4638_vm0, %v4627_v8 }
 0x5ae   :  { %5077 = vmatpush3.bf16.xpose.msra.mxu1 %v4664_v30 }
 0x5b5   :  { %5079 = vmatmul.mubr.msk.bf16.vlgmr.msra.gmra.mrb[160].mxu1 %vm4638_vm0, %v9022_v12  ;;  %v5646_v12 = vmov 1966171168  }
 0x5b6   :  { %v4747_v6 = vunpack.c.l.s4 %v5646_v12 }
 0x5b8   :  { %v4748_v46 = vunpack.c.0.s8 %v4747_v6 }
 0x5ba   :  { %v4751_v34 = vsub.s32 %v4748_v46, %v9749_v63 }
 0x688   :  { %v4724_v26 = vpop.f32.mrb[160].mxu1 }
 0x689   :  { %v4726_v49 = vpop.f32.mrb[161].mxu1  ;;  %v4725_v18 = vadd.f32 %v4724_v26, %v4637_v39 }
 0x68a   :  { %v4727_v0 = vadd.f32 %v4726_v49, %v4637_v39  ;;  %v4728_v44 = vpop.f32.mrb[162].mxu1 }
 0x68b   :  { %v4948_v20 = vmul.f32 -1.442695, %v4725_v18  ;;  %v4729_v58 = vpop.f32.mrb[163].mxu1 }
 0x68c   :  { %v4949_v50 = vmul.f32 -1.442695, %v4727_v0 }
 0x68d   :  { %5635 = vpow2.f32 %v4948_v20 }
 0x68e   :  { %5637 = vpow2.f32 %v4949_v50 }
 0x697   :  { %v5636_v10 = vpop.eup %5635 }
 0x698   :  { %v5638_v54 = vpop.eup %5637  ;;  %v4737_v32 = vadd.f32 1.0, %v5636_v10 }
 0x699   :  { %v4738_v42 = vadd.f32 1.0, %v5638_v54 }
 0x69a   :  { %5639 = vrcp.f32 %v4737_v32 }
 0x69b   :  { %5641 = vrcp.f32 %v4738_v42 }
 0x6a4   :  { %v5640_v17 = vpop.eup %5639 }
 0x6a5   :  { %v5642_v13 = vpop.eup %5641 }
 0x6a6   :  { %v4745_v23 = vcombine.low %v5640_v17, %v5642_v13 }
 0x6a8   :  { %v4752_v40 = vrot.slane %v4745_v23, %v4751_v34 }
 0x6aa   :  { %v4759_v1 = vrot.slane %v4752_v40, %v4751_v34 }
 0x6ac   :  { %4765 = vst.msk [vmem:[%s9112_s13] sm:$0x3] %vm4763_vm1, %v4759_v1 }

</bundles_post_ra>
